<compile_context>
chip_gen: v7x
topology: tpu7x:2x2x1
jax: 0.10.0
libtpu: 0.0.40
codegen_flags: <defaults>
</compile_context>

<pallas_src>
import jax
import jax.numpy as jnp
from jax import lax
from jax.experimental import pallas as pl
from jax.experimental.pallas import tpu as pltpu

# ---- model hyper-parameters (small, consistent with the PyTorch forward) ----
B = 4        # batch_size
N = 6        # num_nodes
S = 16       # sequence_length == transformer d_model
NF = 1       # num_features (must be 1, see note above)
F = 8        # num_out_features
H = 2        # n_heads
DH = S // H  # per-head dim
G = 16       # gnn_output_dim
EPS = 1e-5   # LayerNorm eps (PyTorch default)


def _layer_norm(x, gamma, beta):
    mu = jnp.mean(x, axis=-1, keepdims=True)
    var = jnp.mean((x - mu) ** 2, axis=-1, keepdims=True)
    return (x - mu) * lax.rsqrt(var + EPS) * gamma + beta


def _softmax_lastdim(e):
    e = e - jnp.max(e, axis=-1, keepdims=True)
    p = jnp.exp(e)
    return p * pl.reciprocal(jnp.sum(p, axis=-1, keepdims=True), approx=True)


# --------------------------------------------------------------------------
# Single fused kernel (no grid): temporal transformer for all nodes at once,
# then GAT + predictor for all batch elements, everything resident in VMEM.
# --------------------------------------------------------------------------
def fused_kernel(x_ref,
                 wq_ref, bq_ref, wk_ref, bk_ref, wv_ref, bv_ref,
                 wo_ref, bo_ref, g1_ref, be1_ref,
                 w1_ref, b1_ref, w2_ref, b2_ref, g2_ref, be2_ref,
                 fcw_ref, fcb_ref,
                 adj_ref, gatw_ref, asrc_ref, adst_ref, gatb_ref,
                 pw_ref, pb_ref,
                 out_ref, tflat_ref):
    f32 = jnp.float32
    x = x_ref[...]                                     # (N, B, S); B acts as the "sequence"
    scale = 1.0 / float(DH) ** 0.5

    # ---- two TransformerEncoder layers, batched over nodes ----
    for l in range(2):                                 # layers unrolled (static)
        attn = None
        for h in range(H):                             # heads unrolled, accumulated (no concat)
            qh = jnp.einsum('nbs,nsd->nbd', x, wq_ref[l, h],
                            preferred_element_type=f32) + bq_ref[l, h]
            kh = jnp.einsum('nbs,nsd->nbd', x, wk_ref[l, h],
                            preferred_element_type=f32) + bk_ref[l, h]
            vh = jnp.einsum('nbs,nsd->nbd', x, wv_ref[l, h],
                            preferred_element_type=f32) + bv_ref[l, h]
            sc = jnp.einsum('nbd,ncd->nbc', qh, kh,
                            preferred_element_type=f32) * scale      # (N, B, B)
            p = _softmax_lastdim(sc)
            ctx = jnp.einsum('nbc,ncd->nbd', p, vh,
                             preferred_element_type=f32)             # (N, B, DH)
            contrib = jnp.einsum('nbd,nds->nbs', ctx, wo_ref[l, h],
                                 preferred_element_type=f32)         # (N, B, S)
            attn = contrib if attn is None else attn + contrib
        attn = attn + bo_ref[l]
        x = _layer_norm(x + attn, g1_ref[l], be1_ref[l])

        ff = jnp.einsum('nbs,nst->nbt', x, w1_ref[l],
                        preferred_element_type=f32) + b1_ref[l]
        ff = jnp.maximum(ff, 0.0)                                     # ReLU
        ff = jnp.einsum('nbt,nts->nbs', ff, w2_ref[l],
                        preferred_element_type=f32) + b2_ref[l]
        x = _layer_norm(x + ff, g2_ref[l], be2_ref[l])

    # ---- shared fc (weights replicated per node on the host -> batched einsum) ----
    t = jnp.einsum('nbs,nsf->nbf', x, fcw_ref[...],
                   preferred_element_type=f32) + fcb_ref[...]         # (N, B, F)

    # reproduce torch.cat([...], dim=0).view(B, N, F):
    # flat row r = node*B + b_inner; re-read as (b, n) = (r // N, r % N).
    for n in range(N):
        tflat_ref[n * B:(n + 1) * B, :] = t[n]

    # ---- GATConv (1 head) + Linear predictor, per batch element ----
    adj = adj_ref[...]                                 # (N, N): adj[i, j] = 1 iff edge j -> i
    gatw = gatw_ref[...]                               # (F, G)   pre-transposed
    asrc = asrc_ref[...]                               # (G, 1)
    adst = adst_ref[...]                               # (G, 1)
    for b in range(B):                                 # B = 4, unrolled
        hx = tflat_ref[b * N:(b + 1) * N, :]           # (N, F)
        hfeat = jnp.dot(hx, gatw, preferred_element_type=f32)         # (N, G)
        a_src = jnp.dot(hfeat, asrc, preferred_element_type=f32)      # (N, 1)
        a_dst = jnp.dot(hfeat, adst, preferred_element_type=f32)      # (N, 1)
        e = a_dst + a_src.T                            # e[i, j] = a_dst[i] + a_src[j]
        e = jnp.where(e >= 0.0, e, 0.2 * e)            # LeakyReLU(0.2)
        e = jnp.where(adj > 0.0, e, f32(-1e30))        # mask non-edges (softmax over j)
        p = _softmax_lastdim(e)
        gat = jnp.dot(p, hfeat, preferred_element_type=f32) + gatb_ref[...]   # (N, G)
        out_ref[b] = (jnp.dot(gat, pw_ref[...], preferred_element_type=f32)
                      + pb_ref[...])                   # (N, 2)


# --------------------------------------------------------------------------
# Host-side glue: parameter init (PyTorch-style layout), layout preparation
# (head split + pre-transpose), adjacency build, forward wrapper.
# --------------------------------------------------------------------------
def init_torch_layout_params(key):
    ks = jax.random.split(key, 16)
    sd = 0.1
    temporal = dict(
        ipw=jax.random.normal(ks[0], (N, 2, 3 * S, S), jnp.float32) * sd,   # in_proj W
        ipb=jax.random.normal(ks[1], (N, 2, 3 * S), jnp.float32) * sd,      # in_proj b
        opw=jax.random.normal(ks[2], (N, 2, S, S), jnp.float32) * sd,       # out_proj W
        opb=jax.random.normal(ks[3], (N, 2, S), jnp.float32) * sd,          # out_proj b
        l1w=jax.random.normal(ks[4], (N, 2, S, S), jnp.float32) * sd,       # linear1 W
        l1b=jax.random.normal(ks[5], (N, 2, S), jnp.float32) * sd,          # linear1 b
        l2w=jax.random.normal(ks[6], (N, 2, S, S), jnp.float32) * sd,       # linear2 W
        l2b=jax.random.normal(ks[7], (N, 2, S), jnp.float32) * sd,          # linear2 b
        g1=jnp.ones((N, 2, S), jnp.float32), be1=jnp.zeros((N, 2, S), jnp.float32),
        g2=jnp.ones((N, 2, S), jnp.float32), be2=jnp.zeros((N, 2, S), jnp.float32),
        fcw=jax.random.normal(ks[8], (F, S * NF), jnp.float32) * sd,        # fc W
        fcb=jax.random.normal(ks[9], (F,), jnp.float32) * sd,               # fc b
    )
    spatial = dict(
        gat_w=jax.random.normal(ks[10], (G, F), jnp.float32) * sd,          # GAT lin W
        att_src=jax.random.normal(ks[11], (G,), jnp.float32) * sd,
        att_dst=jax.random.normal(ks[12], (G,), jnp.float32) * sd,
        gat_b=jnp.zeros((G,), jnp.float32),
        pw=jax.random.normal(ks[13], (2, G), jnp.float32) * sd,             # predictor W
        pb=jax.random.normal(ks[14], (2,), jnp.float32) * sd,               # predictor b
    )
    return temporal, spatial


def prepare_kernel_params(temporal, spatial):
    """Pre-split per head + pre-transpose every weight on the host (zero runtime cost)."""
    ipw, ipb = temporal['ipw'], temporal['ipb']

    def _w_head(mat):   # (N, 2, S, S) slice of in_proj -> (2, H, N, S_in, DH)
        return jnp.transpose(mat.reshape(N, 2, H, DH, S), (1, 2, 0, 4, 3))

    def _b_head(vec):   # (N, 2, S) slice of in_proj bias -> (2, H, N, 1, DH)
        return jnp.transpose(vec.reshape(N, 2, H, DH), (1, 2, 0, 3))[:, :, :, None, :]

    wq = _w_head(ipw[:, :, 0 * S:1 * S, :])
    wk = _w_head(ipw[:, :, 1 * S:2 * S, :])
    wv = _w_head(ipw[:, :, 2 * S:3 * S, :])
    bq = _b_head(ipb[:, :, 0 * S:1 * S])
    bk = _b_head(ipb[:, :, 1 * S:2 * S])
    bv = _b_head(ipb[:, :, 2 * S:3 * S])

    # out_proj: head h contributes ctx_h @ W_o[:, h*DH:(h+1)*DH].T  -> (2, H, N, DH, S)
    wo = jnp.transpose(temporal['opw'].reshape(N, 2, S, H, DH), (1, 3, 0, 4, 2))

    def _row(vec):      # (N, 2, S) -> (2, N, 1, S)
        return jnp.transpose(vec, (1, 0, 2))[:, :, None, :]

    def _wt(mat):       # (N, 2, Dout, Din) -> (2, N, Din, Dout)   (pre-transposed)
        return jnp.transpose(mat, (1, 0, 3, 2))

    temporal_k = (
        wq, bq, wk, bk, wv, bv,
        wo, _row(temporal['opb']), _row(temporal['g1']), _row(temporal['be1']),
        _wt(temporal['l1w']), _row(temporal['l1b']),
        _wt(temporal['l2w']), _row(temporal['l2b']),
        _row(temporal['g2']), _row(temporal['be2']),
        jnp.tile(temporal['fcw'].T[None, :, :], (N, 1, 1)),   # (N, S, F) replicated fc W
        temporal['fcb'][None, :],                             # (1, F)
    )
    spatial_k = (
        spatial['gat_w'].T,                 # (F, G)
        spatial['att_src'][:, None],        # (G, 1)
        spatial['att_dst'][:, None],        # (G, 1)
        spatial['gat_b'][None, :],          # (1, G)
        spatial['pw'].T,                    # (G, 2)
        spatial['pb'][None, :],             # (1, 2)
    )
    return temporal_k, spatial_k


def build_adj(edge_index, num_nodes):
    src, dst = edge_index[0], edge_index[1]
    adj = jnp.zeros((num_nodes, num_nodes), jnp.float32)
    adj = adj.at[dst, src].set(1.0)                 # edge j -> i : row i, col j
    diag = jnp.arange(num_nodes)
    adj = adj.at[diag, diag].set(1.0)               # GATConv add_self_loops=True
    return adj


def spatio_temporal_forward(x, adj, temporal_k, spatial_k):
    # x: (batch, num_nodes, seq_len)  -- same layout as the PyTorch input
    x_nbs = jnp.transpose(x, (1, 0, 2)).astype(jnp.float32)   # (N, B, S) per-node slices
    return pl.pallas_call(
        fused_kernel,
        out_shape=jax.ShapeDtypeStruct((B, N, 2), jnp.float32),
        scratch_shapes=[pltpu.VMEM((N * B, F), jnp.float32)],  # cat(dim=0).view scratch
    )(x_nbs, *temporal_k, adj, *spatial_k)


if __name__ == "__main__":
    key = jax.random.PRNGKey(0)
    k_x, k_p = jax.random.split(key)

    x = jax.random.normal(k_x, (B, N, S), jnp.float32)

    # simple bidirectional ring graph, no self loops / duplicates
    edges_src, edges_dst = [], []
    for i in range(N):
        edges_src += [i, (i + 1) % N]
        edges_dst += [(i + 1) % N, i]
    edge_index = jnp.array([edges_src, edges_dst], dtype=jnp.int32)

    temporal, spatial = init_torch_layout_params(k_p)
    temporal_k, spatial_k = prepare_kernel_params(temporal, spatial)
    adj = build_adj(edge_index, N)

    fwd = jax.jit(spatio_temporal_forward)
    out = fwd(x, adj, temporal_k, spatial_k)
    out = jax.block_until_ready(out)
    assert out.shape == (B, N, 2) and out.dtype == jnp.float32
    print("KERNEL_OK")
</pallas_src>

<mosaic_0001>
module attributes {stable_mosaic.version = 11 : i64} {
  func.func @fused_kernel(%arg0: memref<6x4x16xf32, #tpu.memory_space<vmem>>, %arg1: memref<2x2x6x16x8xf32, #tpu.memory_space<vmem>>, %arg2: memref<2x2x6x1x8xf32, #tpu.memory_space<vmem>>, %arg3: memref<2x2x6x16x8xf32, #tpu.memory_space<vmem>>, %arg4: memref<2x2x6x1x8xf32, #tpu.memory_space<vmem>>, %arg5: memref<2x2x6x16x8xf32, #tpu.memory_space<vmem>>, %arg6: memref<2x2x6x1x8xf32, #tpu.memory_space<vmem>>, %arg7: memref<2x2x6x8x16xf32, #tpu.memory_space<vmem>>, %arg8: memref<2x6x1x16xf32, #tpu.memory_space<vmem>>, %arg9: memref<2x6x1x16xf32, #tpu.memory_space<vmem>>, %arg10: memref<2x6x1x16xf32, #tpu.memory_space<vmem>>, %arg11: memref<2x6x16x16xf32, #tpu.memory_space<vmem>>, %arg12: memref<2x6x1x16xf32, #tpu.memory_space<vmem>>, %arg13: memref<2x6x16x16xf32, #tpu.memory_space<vmem>>, %arg14: memref<2x6x1x16xf32, #tpu.memory_space<vmem>>, %arg15: memref<2x6x1x16xf32, #tpu.memory_space<vmem>>, %arg16: memref<2x6x1x16xf32, #tpu.memory_space<vmem>>, %arg17: memref<6x16x8xf32, #tpu.memory_space<vmem>>, %arg18: memref<1x8xf32, #tpu.memory_space<vmem>>, %arg19: memref<6x6xf32, #tpu.memory_space<vmem>>, %arg20: memref<8x16xf32, #tpu.memory_space<vmem>>, %arg21: memref<16x1xf32, #tpu.memory_space<vmem>>, %arg22: memref<16x1xf32, #tpu.memory_space<vmem>>, %arg23: memref<1x16xf32, #tpu.memory_space<vmem>>, %arg24: memref<16x2xf32, #tpu.memory_space<vmem>>, %arg25: memref<1x2xf32, #tpu.memory_space<vmem>>, %arg26: memref<4x6x2xf32, #tpu.memory_space<vmem>>, %arg27: memref<24x8xf32, #tpu.memory_space<vmem>>) attributes {dimension_semantics = [], scalar_prefetch = 0 : i64, scratch_operands = 1 : i64, tpu.core_type = #tpu.core_type<tc>} {
    %c0 = arith.constant 0 : index
    %c0_0 = arith.constant 0 : index
    %c0_1 = arith.constant 0 : index
    %0 = vector.load %arg0[%c0, %c0_0, %c0_1] : memref<6x4x16xf32, #tpu.memory_space<vmem>>, vector<6x4x16xf32>
    %c0_2 = arith.constant 0 : index
    %c0_3 = arith.constant 0 : index
    %c0_4 = arith.constant 0 : index
    %c0_5 = arith.constant 0 : index
    %c0_6 = arith.constant 0 : index
    %1 = vector.load %arg1[%c0_2, %c0_3, %c0_4, %c0_5, %c0_6] : memref<2x2x6x16x8xf32, #tpu.memory_space<vmem>>, vector<1x1x6x16x8xf32>
    %2 = vector.shape_cast %1 : vector<1x1x6x16x8xf32> to vector<6x16x8xf32>
    "tpu.trace_start"() <{level = 10 : i32, message = "nbs,nsd->nbd"}> : () -> ()
    %cst = arith.constant dense<0.000000e+00> : vector<6x4x8xf32>
    %3 = tpu.matmul %0, %2, %cst {dimension_numbers = #tpu.dot_dimension_numbers<[2], [1], [1], [2], [0, 0, 0, 1, 1, 2], [0], [0]>} : vector<6x4x16xf32>, vector<6x16x8xf32>, vector<6x4x8xf32> -> vector<6x4x8xf32>
    "tpu.trace_stop"() : () -> ()
    %c0_7 = arith.constant 0 : index
    %c0_8 = arith.constant 0 : index
    %c0_9 = arith.constant 0 : index
    %c0_10 = arith.constant 0 : index
    %c0_11 = arith.constant 0 : index
    %4 = vector.load %arg2[%c0_7, %c0_8, %c0_9, %c0_10, %c0_11] : memref<2x2x6x1x8xf32, #tpu.memory_space<vmem>>, vector<1x1x6x1x8xf32>
    %5 = vector.shape_cast %4 : vector<1x1x6x1x8xf32> to vector<6x1x8xf32>
    %6 = vector.broadcast %5 : vector<6x1x8xf32> to vector<6x4x8xf32>
    %7 = arith.addf %3, %6 : vector<6x4x8xf32>
    %c0_12 = arith.constant 0 : index
    %c0_13 = arith.constant 0 : index
    %c0_14 = arith.constant 0 : index
    %c0_15 = arith.constant 0 : index
    %c0_16 = arith.constant 0 : index
    %8 = vector.load %arg3[%c0_12, %c0_13, %c0_14, %c0_15, %c0_16] : memref<2x2x6x16x8xf32, #tpu.memory_space<vmem>>, vector<1x1x6x16x8xf32>
    %9 = vector.shape_cast %8 : vector<1x1x6x16x8xf32> to vector<6x16x8xf32>
    "tpu.trace_start"() <{level = 10 : i32, message = "nbs,nsd->nbd"}> : () -> ()
    %cst_17 = arith.constant dense<0.000000e+00> : vector<6x4x8xf32>
    %10 = tpu.matmul %0, %9, %cst_17 {dimension_numbers = #tpu.dot_dimension_numbers<[2], [1], [1], [2], [0, 0, 0, 1, 1, 2], [0], [0]>} : vector<6x4x16xf32>, vector<6x16x8xf32>, vector<6x4x8xf32> -> vector<6x4x8xf32>
    "tpu.trace_stop"() : () -> ()
    %c0_18 = arith.constant 0 : index
    %c0_19 = arith.constant 0 : index
    %c0_20 = arith.constant 0 : index
    %c0_21 = arith.constant 0 : index
    %c0_22 = arith.constant 0 : index
    %11 = vector.load %arg4[%c0_18, %c0_19, %c0_20, %c0_21, %c0_22] : memref<2x2x6x1x8xf32, #tpu.memory_space<vmem>>, vector<1x1x6x1x8xf32>
    %12 = vector.shape_cast %11 : vector<1x1x6x1x8xf32> to vector<6x1x8xf32>
    %13 = vector.broadcast %12 : vector<6x1x8xf32> to vector<6x4x8xf32>
    %14 = arith.addf %10, %13 : vector<6x4x8xf32>
    %c0_23 = arith.constant 0 : index
    %c0_24 = arith.constant 0 : index
    %c0_25 = arith.constant 0 : index
    %c0_26 = arith.constant 0 : index
    %c0_27 = arith.constant 0 : index
    %15 = vector.load %arg5[%c0_23, %c0_24, %c0_25, %c0_26, %c0_27] : memref<2x2x6x16x8xf32, #tpu.memory_space<vmem>>, vector<1x1x6x16x8xf32>
    %16 = vector.shape_cast %15 : vector<1x1x6x16x8xf32> to vector<6x16x8xf32>
    "tpu.trace_start"() <{level = 10 : i32, message = "nbs,nsd->nbd"}> : () -> ()
    %cst_28 = arith.constant dense<0.000000e+00> : vector<6x4x8xf32>
    %17 = tpu.matmul %0, %16, %cst_28 {dimension_numbers = #tpu.dot_dimension_numbers<[2], [1], [1], [2], [0, 0, 0, 1, 1, 2], [0], [0]>} : vector<6x4x16xf32>, vector<6x16x8xf32>, vector<6x4x8xf32> -> vector<6x4x8xf32>
    "tpu.trace_stop"() : () -> ()
    %c0_29 = arith.constant 0 : index
    %c0_30 = arith.constant 0 : index
    %c0_31 = arith.constant 0 : index
    %c0_32 = arith.constant 0 : index
    %c0_33 = arith.constant 0 : index
    %18 = vector.load %arg6[%c0_29, %c0_30, %c0_31, %c0_32, %c0_33] : memref<2x2x6x1x8xf32, #tpu.memory_space<vmem>>, vector<1x1x6x1x8xf32>
    %19 = vector.shape_cast %18 : vector<1x1x6x1x8xf32> to vector<6x1x8xf32>
    %20 = vector.broadcast %19 : vector<6x1x8xf32> to vector<6x4x8xf32>
    %21 = arith.addf %17, %20 : vector<6x4x8xf32>
    "tpu.trace_start"() <{level = 10 : i32, message = "nbd,ncd->nbc"}> : () -> ()
    %cst_34 = arith.constant dense<0.000000e+00> : vector<6x4x4xf32>
    %22 = tpu.matmul %7, %14, %cst_34 {dimension_numbers = #tpu.dot_dimension_numbers<[2], [2], [1], [1], [0, 0, 0, 1, 1, 1], [0], [0]>} : vector<6x4x8xf32>, vector<6x4x8xf32>, vector<6x4x4xf32> -> vector<6x4x4xf32>
    "tpu.trace_stop"() : () -> ()
    %cst_35 = arith.constant 0.353553385 : f32
    %23 = vector.broadcast %cst_35 : f32 to vector<6x4x4xf32>
    %24 = arith.mulf %22, %23 : vector<6x4x4xf32>
    %cst_36 = arith.constant dense<0xFF800000> : vector<6x4xf32>
    %25 = vector.multi_reduction <maximumf>, %24, %cst_36 [2] : vector<6x4x4xf32> to vector<6x4xf32>
    %26 = vector.shape_cast %25 : vector<6x4xf32> to vector<6x4x1xf32>
    %27 = vector.broadcast %26 : vector<6x4x1xf32> to vector<6x4x4xf32>
    %28 = arith.subf %24, %27 : vector<6x4x4xf32>
    %29 = math.exp %28 : vector<6x4x4xf32>
    %cst_37 = arith.constant dense<0.000000e+00> : vector<6x4xf32>
    %30 = vector.multi_reduction <add>, %29, %cst_37 [2] : vector<6x4x4xf32> to vector<6x4xf32>
    %31 = vector.shape_cast %30 : vector<6x4xf32> to vector<6x4x1xf32>
    %32 = tpu.reciprocal %31 {approx = true} : vector<6x4x1xf32> -> vector<6x4x1xf32>
    %33 = vector.broadcast %32 : vector<6x4x1xf32> to vector<6x4x4xf32>
    %34 = arith.mulf %29, %33 : vector<6x4x4xf32>
    "tpu.trace_start"() <{level = 10 : i32, message = "nbc,ncd->nbd"}> : () -> ()
    %cst_38 = arith.constant dense<0.000000e+00> : vector<6x4x8xf32>
    %35 = tpu.matmul %34, %21, %cst_38 {dimension_numbers = #tpu.dot_dimension_numbers<[2], [1], [1], [2], [0, 0, 0, 1, 1, 2], [0], [0]>} : vector<6x4x4xf32>, vector<6x4x8xf32>, vector<6x4x8xf32> -> vector<6x4x8xf32>
    "tpu.trace_stop"() : () -> ()
    %c0_39 = arith.constant 0 : index
    %c0_40 = arith.constant 0 : index
    %c0_41 = arith.constant 0 : index
    %c0_42 = arith.constant 0 : index
    %c0_43 = arith.constant 0 : index
    %36 = vector.load %arg7[%c0_39, %c0_40, %c0_41, %c0_42, %c0_43] : memref<2x2x6x8x16xf32, #tpu.memory_space<vmem>>, vector<1x1x6x8x16xf32>
    %37 = vector.shape_cast %36 : vector<1x1x6x8x16xf32> to vector<6x8x16xf32>
    "tpu.trace_start"() <{level = 10 : i32, message = "nbd,nds->nbs"}> : () -> ()
    %cst_44 = arith.constant dense<0.000000e+00> : vector<6x4x16xf32>
    %38 = tpu.matmul %35, %37, %cst_44 {dimension_numbers = #tpu.dot_dimension_numbers<[2], [1], [1], [2], [0, 0, 0, 1, 1, 2], [0], [0]>} : vector<6x4x8xf32>, vector<6x8x16xf32>, vector<6x4x16xf32> -> vector<6x4x16xf32>
    "tpu.trace_stop"() : () -> ()
    %c0_45 = arith.constant 0 : index
    %c1 = arith.constant 1 : index
    %c0_46 = arith.constant 0 : index
    %c0_47 = arith.constant 0 : index
    %c0_48 = arith.constant 0 : index
    %39 = vector.load %arg1[%c0_45, %c1, %c0_46, %c0_47, %c0_48] : memref<2x2x6x16x8xf32, #tpu.memory_space<vmem>>, vector<1x1x6x16x8xf32>
    %40 = vector.shape_cast %39 : vector<1x1x6x16x8xf32> to vector<6x16x8xf32>
    "tpu.trace_start"() <{level = 10 : i32, message = "nbs,nsd->nbd"}> : () -> ()
    %cst_49 = arith.constant dense<0.000000e+00> : vector<6x4x8xf32>
    %41 = tpu.matmul %0, %40, %cst_49 {dimension_numbers = #tpu.dot_dimension_numbers<[2], [1], [1], [2], [0, 0, 0, 1, 1, 2], [0], [0]>} : vector<6x4x16xf32>, vector<6x16x8xf32>, vector<6x4x8xf32> -> vector<6x4x8xf32>
    "tpu.trace_stop"() : () -> ()
    %c0_50 = arith.constant 0 : index
    %c1_51 = arith.constant 1 : index
    %c0_52 = arith.constant 0 : index
    %c0_53 = arith.constant 0 : index
    %c0_54 = arith.constant 0 : index
    %42 = vector.load %arg2[%c0_50, %c1_51, %c0_52, %c0_53, %c0_54] : memref<2x2x6x1x8xf32, #tpu.memory_space<vmem>>, vector<1x1x6x1x8xf32>
    %43 = vector.shape_cast %42 : vector<1x1x6x1x8xf32> to vector<6x1x8xf32>
    %44 = vector.broadcast %43 : vector<6x1x8xf32> to vector<6x4x8xf32>
    %45 = arith.addf %41, %44 : vector<6x4x8xf32>
    %c0_55 = arith.constant 0 : index
    %c1_56 = arith.constant 1 : index
    %c0_57 = arith.constant 0 : index
    %c0_58 = arith.constant 0 : index
    %c0_59 = arith.constant 0 : index
    %46 = vector.load %arg3[%c0_55, %c1_56, %c0_57, %c0_58, %c0_59] : memref<2x2x6x16x8xf32, #tpu.memory_space<vmem>>, vector<1x1x6x16x8xf32>
    %47 = vector.shape_cast %46 : vector<1x1x6x16x8xf32> to vector<6x16x8xf32>
    "tpu.trace_start"() <{level = 10 : i32, message = "nbs,nsd->nbd"}> : () -> ()
    %cst_60 = arith.constant dense<0.000000e+00> : vector<6x4x8xf32>
    %48 = tpu.matmul %0, %47, %cst_60 {dimension_numbers = #tpu.dot_dimension_numbers<[2], [1], [1], [2], [0, 0, 0, 1, 1, 2], [0], [0]>} : vector<6x4x16xf32>, vector<6x16x8xf32>, vector<6x4x8xf32> -> vector<6x4x8xf32>
    "tpu.trace_stop"() : () -> ()
    %c0_61 = arith.constant 0 : index
    %c1_62 = arith.constant 1 : index
    %c0_63 = arith.constant 0 : index
    %c0_64 = arith.constant 0 : index
    %c0_65 = arith.constant 0 : index
    %49 = vector.load %arg4[%c0_61, %c1_62, %c0_63, %c0_64, %c0_65] : memref<2x2x6x1x8xf32, #tpu.memory_space<vmem>>, vector<1x1x6x1x8xf32>
    %50 = vector.shape_cast %49 : vector<1x1x6x1x8xf32> to vector<6x1x8xf32>
    %51 = vector.broadcast %50 : vector<6x1x8xf32> to vector<6x4x8xf32>
    %52 = arith.addf %48, %51 : vector<6x4x8xf32>
    %c0_66 = arith.constant 0 : index
    %c1_67 = arith.constant 1 : index
    %c0_68 = arith.constant 0 : index
    %c0_69 = arith.constant 0 : index
    %c0_70 = arith.constant 0 : index
    %53 = vector.load %arg5[%c0_66, %c1_67, %c0_68, %c0_69, %c0_70] : memref<2x2x6x16x8xf32, #tpu.memory_space<vmem>>, vector<1x1x6x16x8xf32>
    %54 = vector.shape_cast %53 : vector<1x1x6x16x8xf32> to vector<6x16x8xf32>
    "tpu.trace_start"() <{level = 10 : i32, message = "nbs,nsd->nbd"}> : () -> ()
    %cst_71 = arith.constant dense<0.000000e+00> : vector<6x4x8xf32>
    %55 = tpu.matmul %0, %54, %cst_71 {dimension_numbers = #tpu.dot_dimension_numbers<[2], [1], [1], [2], [0, 0, 0, 1, 1, 2], [0], [0]>} : vector<6x4x16xf32>, vector<6x16x8xf32>, vector<6x4x8xf32> -> vector<6x4x8xf32>
    "tpu.trace_stop"() : () -> ()
    %c0_72 = arith.constant 0 : index
    %c1_73 = arith.constant 1 : index
    %c0_74 = arith.constant 0 : index
    %c0_75 = arith.constant 0 : index
    %c0_76 = arith.constant 0 : index
    %56 = vector.load %arg6[%c0_72, %c1_73, %c0_74, %c0_75, %c0_76] : memref<2x2x6x1x8xf32, #tpu.memory_space<vmem>>, vector<1x1x6x1x8xf32>
    %57 = vector.shape_cast %56 : vector<1x1x6x1x8xf32> to vector<6x1x8xf32>
    %58 = vector.broadcast %57 : vector<6x1x8xf32> to vector<6x4x8xf32>
    %59 = arith.addf %55, %58 : vector<6x4x8xf32>
    "tpu.trace_start"() <{level = 10 : i32, message = "nbd,ncd->nbc"}> : () -> ()
    %cst_77 = arith.constant dense<0.000000e+00> : vector<6x4x4xf32>
    %60 = tpu.matmul %45, %52, %cst_77 {dimension_numbers = #tpu.dot_dimension_numbers<[2], [2], [1], [1], [0, 0, 0, 1, 1, 1], [0], [0]>} : vector<6x4x8xf32>, vector<6x4x8xf32>, vector<6x4x4xf32> -> vector<6x4x4xf32>
    "tpu.trace_stop"() : () -> ()
    %cst_78 = arith.constant 0.353553385 : f32
    %61 = vector.broadcast %cst_78 : f32 to vector<6x4x4xf32>
    %62 = arith.mulf %60, %61 : vector<6x4x4xf32>
    %cst_79 = arith.constant dense<0xFF800000> : vector<6x4xf32>
    %63 = vector.multi_reduction <maximumf>, %62, %cst_79 [2] : vector<6x4x4xf32> to vector<6x4xf32>
    %64 = vector.shape_cast %63 : vector<6x4xf32> to vector<6x4x1xf32>
    %65 = vector.broadcast %64 : vector<6x4x1xf32> to vector<6x4x4xf32>
    %66 = arith.subf %62, %65 : vector<6x4x4xf32>
    %67 = math.exp %66 : vector<6x4x4xf32>
    %cst_80 = arith.constant dense<0.000000e+00> : vector<6x4xf32>
    %68 = vector.multi_reduction <add>, %67, %cst_80 [2] : vector<6x4x4xf32> to vector<6x4xf32>
    %69 = vector.shape_cast %68 : vector<6x4xf32> to vector<6x4x1xf32>
    %70 = tpu.reciprocal %69 {approx = true} : vector<6x4x1xf32> -> vector<6x4x1xf32>
    %71 = vector.broadcast %70 : vector<6x4x1xf32> to vector<6x4x4xf32>
    %72 = arith.mulf %67, %71 : vector<6x4x4xf32>
    "tpu.trace_start"() <{level = 10 : i32, message = "nbc,ncd->nbd"}> : () -> ()
    %cst_81 = arith.constant dense<0.000000e+00> : vector<6x4x8xf32>
    %73 = tpu.matmul %72, %59, %cst_81 {dimension_numbers = #tpu.dot_dimension_numbers<[2], [1], [1], [2], [0, 0, 0, 1, 1, 2], [0], [0]>} : vector<6x4x4xf32>, vector<6x4x8xf32>, vector<6x4x8xf32> -> vector<6x4x8xf32>
    "tpu.trace_stop"() : () -> ()
    %c0_82 = arith.constant 0 : index
    %c1_83 = arith.constant 1 : index
    %c0_84 = arith.constant 0 : index
    %c0_85 = arith.constant 0 : index
    %c0_86 = arith.constant 0 : index
    %74 = vector.load %arg7[%c0_82, %c1_83, %c0_84, %c0_85, %c0_86] : memref<2x2x6x8x16xf32, #tpu.memory_space<vmem>>, vector<1x1x6x8x16xf32>
    %75 = vector.shape_cast %74 : vector<1x1x6x8x16xf32> to vector<6x8x16xf32>
    "tpu.trace_start"() <{level = 10 : i32, message = "nbd,nds->nbs"}> : () -> ()
    %cst_87 = arith.constant dense<0.000000e+00> : vector<6x4x16xf32>
    %76 = tpu.matmul %73, %75, %cst_87 {dimension_numbers = #tpu.dot_dimension_numbers<[2], [1], [1], [2], [0, 0, 0, 1, 1, 2], [0], [0]>} : vector<6x4x8xf32>, vector<6x8x16xf32>, vector<6x4x16xf32> -> vector<6x4x16xf32>
    "tpu.trace_stop"() : () -> ()
    %77 = arith.addf %38, %76 : vector<6x4x16xf32>
    %c0_88 = arith.constant 0 : index
    %c0_89 = arith.constant 0 : index
    %c0_90 = arith.constant 0 : index
    %c0_91 = arith.constant 0 : index
    %78 = vector.load %arg8[%c0_88, %c0_89, %c0_90, %c0_91] : memref<2x6x1x16xf32, #tpu.memory_space<vmem>>, vector<1x6x1x16xf32>
    %79 = vector.shape_cast %78 : vector<1x6x1x16xf32> to vector<6x1x16xf32>
    %80 = vector.broadcast %79 : vector<6x1x16xf32> to vector<6x4x16xf32>
    %81 = arith.addf %77, %80 : vector<6x4x16xf32>
    %82 = arith.addf %0, %81 : vector<6x4x16xf32>
    %c0_92 = arith.constant 0 : index
    %c0_93 = arith.constant 0 : index
    %c0_94 = arith.constant 0 : index
    %c0_95 = arith.constant 0 : index
    %83 = vector.load %arg9[%c0_92, %c0_93, %c0_94, %c0_95] : memref<2x6x1x16xf32, #tpu.memory_space<vmem>>, vector<1x6x1x16xf32>
    %84 = vector.shape_cast %83 : vector<1x6x1x16xf32> to vector<6x1x16xf32>
    %c0_96 = arith.constant 0 : index
    %c0_97 = arith.constant 0 : index
    %c0_98 = arith.constant 0 : index
    %c0_99 = arith.constant 0 : index
    %85 = vector.load %arg10[%c0_96, %c0_97, %c0_98, %c0_99] : memref<2x6x1x16xf32, #tpu.memory_space<vmem>>, vector<1x6x1x16xf32>
    %86 = vector.shape_cast %85 : vector<1x6x1x16xf32> to vector<6x1x16xf32>
    %cst_100 = arith.constant dense<0.000000e+00> : vector<6x4xf32>
    %87 = vector.multi_reduction <add>, %82, %cst_100 [2] : vector<6x4x16xf32> to vector<6x4xf32>
    %88 = vector.shape_cast %87 : vector<6x4xf32> to vector<6x4x1xf32>
    %cst_101 = arith.constant 1.600000e+01 : f32
    %89 = vector.broadcast %cst_101 : f32 to vector<6x4x1xf32>
    %90 = arith.divf %88, %89 : vector<6x4x1xf32>
    %91 = vector.broadcast %90 : vector<6x4x1xf32> to vector<6x4x16xf32>
    %92 = arith.subf %82, %91 : vector<6x4x16xf32>
    %93 = arith.mulf %92, %92 : vector<6x4x16xf32>
    %cst_102 = arith.constant dense<0.000000e+00> : vector<6x4xf32>
    %94 = vector.multi_reduction <add>, %93, %cst_102 [2] : vector<6x4x16xf32> to vector<6x4xf32>
    %95 = vector.shape_cast %94 : vector<6x4xf32> to vector<6x4x1xf32>
    %cst_103 = arith.constant 1.600000e+01 : f32
    %96 = vector.broadcast %cst_103 : f32 to vector<6x4x1xf32>
    %97 = arith.divf %95, %96 : vector<6x4x1xf32>
    %98 = vector.broadcast %90 : vector<6x4x1xf32> to vector<6x4x16xf32>
    %99 = arith.subf %82, %98 : vector<6x4x16xf32>
    %cst_104 = arith.constant 9.99999974E-6 : f32
    %100 = vector.broadcast %cst_104 : f32 to vector<6x4x1xf32>
    %101 = arith.addf %97, %100 : vector<6x4x1xf32>
    %102 = math.rsqrt %101 : vector<6x4x1xf32>
    %103 = vector.broadcast %102 : vector<6x4x1xf32> to vector<6x4x16xf32>
    %104 = arith.mulf %99, %103 : vector<6x4x16xf32>
    %105 = vector.broadcast %84 : vector<6x1x16xf32> to vector<6x4x16xf32>
    %106 = arith.mulf %104, %105 : vector<6x4x16xf32>
    %107 = vector.broadcast %86 : vector<6x1x16xf32> to vector<6x4x16xf32>
    %108 = arith.addf %106, %107 : vector<6x4x16xf32>
    %c0_105 = arith.constant 0 : index
    %c0_106 = arith.constant 0 : index
    %c0_107 = arith.constant 0 : index
    %c0_108 = arith.constant 0 : index
    %109 = vector.load %arg11[%c0_105, %c0_106, %c0_107, %c0_108] : memref<2x6x16x16xf32, #tpu.memory_space<vmem>>, vector<1x6x16x16xf32>
    %110 = vector.shape_cast %109 : vector<1x6x16x16xf32> to vector<6x16x16xf32>
    "tpu.trace_start"() <{level = 10 : i32, message = "nbs,nst->nbt"}> : () -> ()
    %cst_109 = arith.constant dense<0.000000e+00> : vector<6x4x16xf32>
    %111 = tpu.matmul %108, %110, %cst_109 {dimension_numbers = #tpu.dot_dimension_numbers<[2], [1], [1], [2], [0, 0, 0, 1, 1, 2], [0], [0]>} : vector<6x4x16xf32>, vector<6x16x16xf32>, vector<6x4x16xf32> -> vector<6x4x16xf32>
    "tpu.trace_stop"() : () -> ()
    %c0_110 = arith.constant 0 : index
    %c0_111 = arith.constant 0 : index
    %c0_112 = arith.constant 0 : index
    %c0_113 = arith.constant 0 : index
    %112 = vector.load %arg12[%c0_110, %c0_111, %c0_112, %c0_113] : memref<2x6x1x16xf32, #tpu.memory_space<vmem>>, vector<1x6x1x16xf32>
    %113 = vector.shape_cast %112 : vector<1x6x1x16xf32> to vector<6x1x16xf32>
    %114 = vector.broadcast %113 : vector<6x1x16xf32> to vector<6x4x16xf32>
    %115 = arith.addf %111, %114 : vector<6x4x16xf32>
    %cst_114 = arith.constant 0.000000e+00 : f32
    %116 = vector.broadcast %cst_114 : f32 to vector<6x4x16xf32>
    %117 = arith.maximumf %115, %116 : vector<6x4x16xf32>
    %c0_115 = arith.constant 0 : index
    %c0_116 = arith.constant 0 : index
    %c0_117 = arith.constant 0 : index
    %c0_118 = arith.constant 0 : index
    %118 = vector.load %arg13[%c0_115, %c0_116, %c0_117, %c0_118] : memref<2x6x16x16xf32, #tpu.memory_space<vmem>>, vector<1x6x16x16xf32>
    %119 = vector.shape_cast %118 : vector<1x6x16x16xf32> to vector<6x16x16xf32>
    "tpu.trace_start"() <{level = 10 : i32, message = "nbt,nts->nbs"}> : () -> ()
    %cst_119 = arith.constant dense<0.000000e+00> : vector<6x4x16xf32>
    %120 = tpu.matmul %117, %119, %cst_119 {dimension_numbers = #tpu.dot_dimension_numbers<[2], [1], [1], [2], [0, 0, 0, 1, 1, 2], [0], [0]>} : vector<6x4x16xf32>, vector<6x16x16xf32>, vector<6x4x16xf32> -> vector<6x4x16xf32>
    "tpu.trace_stop"() : () -> ()
    %c0_120 = arith.constant 0 : index
    %c0_121 = arith.constant 0 : index
    %c0_122 = arith.constant 0 : index
    %c0_123 = arith.constant 0 : index
    %121 = vector.load %arg14[%c0_120, %c0_121, %c0_122, %c0_123] : memref<2x6x1x16xf32, #tpu.memory_space<vmem>>, vector<1x6x1x16xf32>
    %122 = vector.shape_cast %121 : vector<1x6x1x16xf32> to vector<6x1x16xf32>
    %123 = vector.broadcast %122 : vector<6x1x16xf32> to vector<6x4x16xf32>
    %124 = arith.addf %120, %123 : vector<6x4x16xf32>
    %125 = arith.addf %108, %124 : vector<6x4x16xf32>
    %c0_124 = arith.constant 0 : index
    %c0_125 = arith.constant 0 : index
    %c0_126 = arith.constant 0 : index
    %c0_127 = arith.constant 0 : index
    %126 = vector.load %arg15[%c0_124, %c0_125, %c0_126, %c0_127] : memref<2x6x1x16xf32, #tpu.memory_space<vmem>>, vector<1x6x1x16xf32>
    %127 = vector.shape_cast %126 : vector<1x6x1x16xf32> to vector<6x1x16xf32>
    %c0_128 = arith.constant 0 : index
    %c0_129 = arith.constant 0 : index
    %c0_130 = arith.constant 0 : index
    %c0_131 = arith.constant 0 : index
    %128 = vector.load %arg16[%c0_128, %c0_129, %c0_130, %c0_131] : memref<2x6x1x16xf32, #tpu.memory_space<vmem>>, vector<1x6x1x16xf32>
    %129 = vector.shape_cast %128 : vector<1x6x1x16xf32> to vector<6x1x16xf32>
    %cst_132 = arith.constant dense<0.000000e+00> : vector<6x4xf32>
    %130 = vector.multi_reduction <add>, %125, %cst_132 [2] : vector<6x4x16xf32> to vector<6x4xf32>
    %131 = vector.shape_cast %130 : vector<6x4xf32> to vector<6x4x1xf32>
    %cst_133 = arith.constant 1.600000e+01 : f32
    %132 = vector.broadcast %cst_133 : f32 to vector<6x4x1xf32>
    %133 = arith.divf %131, %132 : vector<6x4x1xf32>
    %134 = vector.broadcast %133 : vector<6x4x1xf32> to vector<6x4x16xf32>
    %135 = arith.subf %125, %134 : vector<6x4x16xf32>
    %136 = arith.mulf %135, %135 : vector<6x4x16xf32>
    %cst_134 = arith.constant dense<0.000000e+00> : vector<6x4xf32>
    %137 = vector.multi_reduction <add>, %136, %cst_134 [2] : vector<6x4x16xf32> to vector<6x4xf32>
    %138 = vector.shape_cast %137 : vector<6x4xf32> to vector<6x4x1xf32>
    %cst_135 = arith.constant 1.600000e+01 : f32
    %139 = vector.broadcast %cst_135 : f32 to vector<6x4x1xf32>
    %140 = arith.divf %138, %139 : vector<6x4x1xf32>
    %141 = vector.broadcast %133 : vector<6x4x1xf32> to vector<6x4x16xf32>
    %142 = arith.subf %125, %141 : vector<6x4x16xf32>
    %cst_136 = arith.constant 9.99999974E-6 : f32
    %143 = vector.broadcast %cst_136 : f32 to vector<6x4x1xf32>
    %144 = arith.addf %140, %143 : vector<6x4x1xf32>
    %145 = math.rsqrt %144 : vector<6x4x1xf32>
    %146 = vector.broadcast %145 : vector<6x4x1xf32> to vector<6x4x16xf32>
    %147 = arith.mulf %142, %146 : vector<6x4x16xf32>
    %148 = vector.broadcast %127 : vector<6x1x16xf32> to vector<6x4x16xf32>
    %149 = arith.mulf %147, %148 : vector<6x4x16xf32>
    %150 = vector.broadcast %129 : vector<6x1x16xf32> to vector<6x4x16xf32>
    %151 = arith.addf %149, %150 : vector<6x4x16xf32>
    %c1_137 = arith.constant 1 : index
    %c0_138 = arith.constant 0 : index
    %c0_139 = arith.constant 0 : index
    %c0_140 = arith.constant 0 : index
    %c0_141 = arith.constant 0 : index
    %152 = vector.load %arg1[%c1_137, %c0_138, %c0_139, %c0_140, %c0_141] : memref<2x2x6x16x8xf32, #tpu.memory_space<vmem>>, vector<1x1x6x16x8xf32>
    %153 = vector.shape_cast %152 : vector<1x1x6x16x8xf32> to vector<6x16x8xf32>
    "tpu.trace_start"() <{level = 10 : i32, message = "nbs,nsd->nbd"}> : () -> ()
    %cst_142 = arith.constant dense<0.000000e+00> : vector<6x4x8xf32>
    %154 = tpu.matmul %151, %153, %cst_142 {dimension_numbers = #tpu.dot_dimension_numbers<[2], [1], [1], [2], [0, 0, 0, 1, 1, 2], [0], [0]>} : vector<6x4x16xf32>, vector<6x16x8xf32>, vector<6x4x8xf32> -> vector<6x4x8xf32>
    "tpu.trace_stop"() : () -> ()
    %c1_143 = arith.constant 1 : index
    %c0_144 = arith.constant 0 : index
    %c0_145 = arith.constant 0 : index
    %c0_146 = arith.constant 0 : index
    %c0_147 = arith.constant 0 : index
    %155 = vector.load %arg2[%c1_143, %c0_144, %c0_145, %c0_146, %c0_147] : memref<2x2x6x1x8xf32, #tpu.memory_space<vmem>>, vector<1x1x6x1x8xf32>
    %156 = vector.shape_cast %155 : vector<1x1x6x1x8xf32> to vector<6x1x8xf32>
    %157 = vector.broadcast %156 : vector<6x1x8xf32> to vector<6x4x8xf32>
    %158 = arith.addf %154, %157 : vector<6x4x8xf32>
    %c1_148 = arith.constant 1 : index
    %c0_149 = arith.constant 0 : index
    %c0_150 = arith.constant 0 : index
    %c0_151 = arith.constant 0 : index
    %c0_152 = arith.constant 0 : index
    %159 = vector.load %arg3[%c1_148, %c0_149, %c0_150, %c0_151, %c0_152] : memref<2x2x6x16x8xf32, #tpu.memory_space<vmem>>, vector<1x1x6x16x8xf32>
    %160 = vector.shape_cast %159 : vector<1x1x6x16x8xf32> to vector<6x16x8xf32>
    "tpu.trace_start"() <{level = 10 : i32, message = "nbs,nsd->nbd"}> : () -> ()
    %cst_153 = arith.constant dense<0.000000e+00> : vector<6x4x8xf32>
    %161 = tpu.matmul %151, %160, %cst_153 {dimension_numbers = #tpu.dot_dimension_numbers<[2], [1], [1], [2], [0, 0, 0, 1, 1, 2], [0], [0]>} : vector<6x4x16xf32>, vector<6x16x8xf32>, vector<6x4x8xf32> -> vector<6x4x8xf32>
    "tpu.trace_stop"() : () -> ()
    %c1_154 = arith.constant 1 : index
    %c0_155 = arith.constant 0 : index
    %c0_156 = arith.constant 0 : index
    %c0_157 = arith.constant 0 : index
    %c0_158 = arith.constant 0 : index
    %162 = vector.load %arg4[%c1_154, %c0_155, %c0_156, %c0_157, %c0_158] : memref<2x2x6x1x8xf32, #tpu.memory_space<vmem>>, vector<1x1x6x1x8xf32>
    %163 = vector.shape_cast %162 : vector<1x1x6x1x8xf32> to vector<6x1x8xf32>
    %164 = vector.broadcast %163 : vector<6x1x8xf32> to vector<6x4x8xf32>
    %165 = arith.addf %161, %164 : vector<6x4x8xf32>
    %c1_159 = arith.constant 1 : index
    %c0_160 = arith.constant 0 : index
    %c0_161 = arith.constant 0 : index
    %c0_162 = arith.constant 0 : index
    %c0_163 = arith.constant 0 : index
    %166 = vector.load %arg5[%c1_159, %c0_160, %c0_161, %c0_162, %c0_163] : memref<2x2x6x16x8xf32, #tpu.memory_space<vmem>>, vector<1x1x6x16x8xf32>
    %167 = vector.shape_cast %166 : vector<1x1x6x16x8xf32> to vector<6x16x8xf32>
    "tpu.trace_start"() <{level = 10 : i32, message = "nbs,nsd->nbd"}> : () -> ()
    %cst_164 = arith.constant dense<0.000000e+00> : vector<6x4x8xf32>
    %168 = tpu.matmul %151, %167, %cst_164 {dimension_numbers = #tpu.dot_dimension_numbers<[2], [1], [1], [2], [0, 0, 0, 1, 1, 2], [0], [0]>} : vector<6x4x16xf32>, vector<6x16x8xf32>, vector<6x4x8xf32> -> vector<6x4x8xf32>
    "tpu.trace_stop"() : () -> ()
    %c1_165 = arith.constant 1 : index
    %c0_166 = arith.constant 0 : index
    %c0_167 = arith.constant 0 : index
    %c0_168 = arith.constant 0 : index
    %c0_169 = arith.constant 0 : index
    %169 = vector.load %arg6[%c1_165, %c0_166, %c0_167, %c0_168, %c0_169] : memref<2x2x6x1x8xf32, #tpu.memory_space<vmem>>, vector<1x1x6x1x8xf32>
    %170 = vector.shape_cast %169 : vector<1x1x6x1x8xf32> to vector<6x1x8xf32>
    %171 = vector.broadcast %170 : vector<6x1x8xf32> to vector<6x4x8xf32>
    %172 = arith.addf %168, %171 : vector<6x4x8xf32>
    "tpu.trace_start"() <{level = 10 : i32, message = "nbd,ncd->nbc"}> : () -> ()
    %cst_170 = arith.constant dense<0.000000e+00> : vector<6x4x4xf32>
    %173 = tpu.matmul %158, %165, %cst_170 {dimension_numbers = #tpu.dot_dimension_numbers<[2], [2], [1], [1], [0, 0, 0, 1, 1, 1], [0], [0]>} : vector<6x4x8xf32>, vector<6x4x8xf32>, vector<6x4x4xf32> -> vector<6x4x4xf32>
    "tpu.trace_stop"() : () -> ()
    %cst_171 = arith.constant 0.353553385 : f32
    %174 = vector.broadcast %cst_171 : f32 to vector<6x4x4xf32>
    %175 = arith.mulf %173, %174 : vector<6x4x4xf32>
    %cst_172 = arith.constant dense<0xFF800000> : vector<6x4xf32>
    %176 = vector.multi_reduction <maximumf>, %175, %cst_172 [2] : vector<6x4x4xf32> to vector<6x4xf32>
    %177 = vector.shape_cast %176 : vector<6x4xf32> to vector<6x4x1xf32>
    %178 = vector.broadcast %177 : vector<6x4x1xf32> to vector<6x4x4xf32>
    %179 = arith.subf %175, %178 : vector<6x4x4xf32>
    %180 = math.exp %179 : vector<6x4x4xf32>
    %cst_173 = arith.constant dense<0.000000e+00> : vector<6x4xf32>
    %181 = vector.multi_reduction <add>, %180, %cst_173 [2] : vector<6x4x4xf32> to vector<6x4xf32>
    %182 = vector.shape_cast %181 : vector<6x4xf32> to vector<6x4x1xf32>
    %183 = tpu.reciprocal %182 {approx = true} : vector<6x4x1xf32> -> vector<6x4x1xf32>
    %184 = vector.broadcast %183 : vector<6x4x1xf32> to vector<6x4x4xf32>
    %185 = arith.mulf %180, %184 : vector<6x4x4xf32>
    "tpu.trace_start"() <{level = 10 : i32, message = "nbc,ncd->nbd"}> : () -> ()
    %cst_174 = arith.constant dense<0.000000e+00> : vector<6x4x8xf32>
    %186 = tpu.matmul %185, %172, %cst_174 {dimension_numbers = #tpu.dot_dimension_numbers<[2], [1], [1], [2], [0, 0, 0, 1, 1, 2], [0], [0]>} : vector<6x4x4xf32>, vector<6x4x8xf32>, vector<6x4x8xf32> -> vector<6x4x8xf32>
    "tpu.trace_stop"() : () -> ()
    %c1_175 = arith.constant 1 : index
    %c0_176 = arith.constant 0 : index
    %c0_177 = arith.constant 0 : index
    %c0_178 = arith.constant 0 : index
    %c0_179 = arith.constant 0 : index
    %187 = vector.load %arg7[%c1_175, %c0_176, %c0_177, %c0_178, %c0_179] : memref<2x2x6x8x16xf32, #tpu.memory_space<vmem>>, vector<1x1x6x8x16xf32>
    %188 = vector.shape_cast %187 : vector<1x1x6x8x16xf32> to vector<6x8x16xf32>
    "tpu.trace_start"() <{level = 10 : i32, message = "nbd,nds->nbs"}> : () -> ()
    %cst_180 = arith.constant dense<0.000000e+00> : vector<6x4x16xf32>
    %189 = tpu.matmul %186, %188, %cst_180 {dimension_numbers = #tpu.dot_dimension_numbers<[2], [1], [1], [2], [0, 0, 0, 1, 1, 2], [0], [0]>} : vector<6x4x8xf32>, vector<6x8x16xf32>, vector<6x4x16xf32> -> vector<6x4x16xf32>
    "tpu.trace_stop"() : () -> ()
    %c1_181 = arith.constant 1 : index
    %c1_182 = arith.constant 1 : index
    %c0_183 = arith.constant 0 : index
    %c0_184 = arith.constant 0 : index
    %c0_185 = arith.constant 0 : index
    %190 = vector.load %arg1[%c1_181, %c1_182, %c0_183, %c0_184, %c0_185] : memref<2x2x6x16x8xf32, #tpu.memory_space<vmem>>, vector<1x1x6x16x8xf32>
    %191 = vector.shape_cast %190 : vector<1x1x6x16x8xf32> to vector<6x16x8xf32>
    "tpu.trace_start"() <{level = 10 : i32, message = "nbs,nsd->nbd"}> : () -> ()
    %cst_186 = arith.constant dense<0.000000e+00> : vector<6x4x8xf32>
    %192 = tpu.matmul %151, %191, %cst_186 {dimension_numbers = #tpu.dot_dimension_numbers<[2], [1], [1], [2], [0, 0, 0, 1, 1, 2], [0], [0]>} : vector<6x4x16xf32>, vector<6x16x8xf32>, vector<6x4x8xf32> -> vector<6x4x8xf32>
    "tpu.trace_stop"() : () -> ()
    %c1_187 = arith.constant 1 : index
    %c1_188 = arith.constant 1 : index
    %c0_189 = arith.constant 0 : index
    %c0_190 = arith.constant 0 : index
    %c0_191 = arith.constant 0 : index
    %193 = vector.load %arg2[%c1_187, %c1_188, %c0_189, %c0_190, %c0_191] : memref<2x2x6x1x8xf32, #tpu.memory_space<vmem>>, vector<1x1x6x1x8xf32>
    %194 = vector.shape_cast %193 : vector<1x1x6x1x8xf32> to vector<6x1x8xf32>
    %195 = vector.broadcast %194 : vector<6x1x8xf32> to vector<6x4x8xf32>
    %196 = arith.addf %192, %195 : vector<6x4x8xf32>
    %c1_192 = arith.constant 1 : index
    %c1_193 = arith.constant 1 : index
    %c0_194 = arith.constant 0 : index
    %c0_195 = arith.constant 0 : index
    %c0_196 = arith.constant 0 : index
    %197 = vector.load %arg3[%c1_192, %c1_193, %c0_194, %c0_195, %c0_196] : memref<2x2x6x16x8xf32, #tpu.memory_space<vmem>>, vector<1x1x6x16x8xf32>
    %198 = vector.shape_cast %197 : vector<1x1x6x16x8xf32> to vector<6x16x8xf32>
    "tpu.trace_start"() <{level = 10 : i32, message = "nbs,nsd->nbd"}> : () -> ()
    %cst_197 = arith.constant dense<0.000000e+00> : vector<6x4x8xf32>
    %199 = tpu.matmul %151, %198, %cst_197 {dimension_numbers = #tpu.dot_dimension_numbers<[2], [1], [1], [2], [0, 0, 0, 1, 1, 2], [0], [0]>} : vector<6x4x16xf32>, vector<6x16x8xf32>, vector<6x4x8xf32> -> vector<6x4x8xf32>
    "tpu.trace_stop"() : () -> ()
    %c1_198 = arith.constant 1 : index
    %c1_199 = arith.constant 1 : index
    %c0_200 = arith.constant 0 : index
    %c0_201 = arith.constant 0 : index
    %c0_202 = arith.constant 0 : index
    %200 = vector.load %arg4[%c1_198, %c1_199, %c0_200, %c0_201, %c0_202] : memref<2x2x6x1x8xf32, #tpu.memory_space<vmem>>, vector<1x1x6x1x8xf32>
    %201 = vector.shape_cast %200 : vector<1x1x6x1x8xf32> to vector<6x1x8xf32>
    %202 = vector.broadcast %201 : vector<6x1x8xf32> to vector<6x4x8xf32>
    %203 = arith.addf %199, %202 : vector<6x4x8xf32>
    %c1_203 = arith.constant 1 : index
    %c1_204 = arith.constant 1 : index
    %c0_205 = arith.constant 0 : index
    %c0_206 = arith.constant 0 : index
    %c0_207 = arith.constant 0 : index
    %204 = vector.load %arg5[%c1_203, %c1_204, %c0_205, %c0_206, %c0_207] : memref<2x2x6x16x8xf32, #tpu.memory_space<vmem>>, vector<1x1x6x16x8xf32>
    %205 = vector.shape_cast %204 : vector<1x1x6x16x8xf32> to vector<6x16x8xf32>
    "tpu.trace_start"() <{level = 10 : i32, message = "nbs,nsd->nbd"}> : () -> ()
    %cst_208 = arith.constant dense<0.000000e+00> : vector<6x4x8xf32>
    %206 = tpu.matmul %151, %205, %cst_208 {dimension_numbers = #tpu.dot_dimension_numbers<[2], [1], [1], [2], [0, 0, 0, 1, 1, 2], [0], [0]>} : vector<6x4x16xf32>, vector<6x16x8xf32>, vector<6x4x8xf32> -> vector<6x4x8xf32>
    "tpu.trace_stop"() : () -> ()
    %c1_209 = arith.constant 1 : index
    %c1_210 = arith.constant 1 : index
    %c0_211 = arith.constant 0 : index
    %c0_212 = arith.constant 0 : index
    %c0_213 = arith.constant 0 : index
    %207 = vector.load %arg6[%c1_209, %c1_210, %c0_211, %c0_212, %c0_213] : memref<2x2x6x1x8xf32, #tpu.memory_space<vmem>>, vector<1x1x6x1x8xf32>
    %208 = vector.shape_cast %207 : vector<1x1x6x1x8xf32> to vector<6x1x8xf32>
    %209 = vector.broadcast %208 : vector<6x1x8xf32> to vector<6x4x8xf32>
    %210 = arith.addf %206, %209 : vector<6x4x8xf32>
    "tpu.trace_start"() <{level = 10 : i32, message = "nbd,ncd->nbc"}> : () -> ()
    %cst_214 = arith.constant dense<0.000000e+00> : vector<6x4x4xf32>
    %211 = tpu.matmul %196, %203, %cst_214 {dimension_numbers = #tpu.dot_dimension_numbers<[2], [2], [1], [1], [0, 0, 0, 1, 1, 1], [0], [0]>} : vector<6x4x8xf32>, vector<6x4x8xf32>, vector<6x4x4xf32> -> vector<6x4x4xf32>
    "tpu.trace_stop"() : () -> ()
    %cst_215 = arith.constant 0.353553385 : f32
    %212 = vector.broadcast %cst_215 : f32 to vector<6x4x4xf32>
    %213 = arith.mulf %211, %212 : vector<6x4x4xf32>
    %cst_216 = arith.constant dense<0xFF800000> : vector<6x4xf32>
    %214 = vector.multi_reduction <maximumf>, %213, %cst_216 [2] : vector<6x4x4xf32> to vector<6x4xf32>
    %215 = vector.shape_cast %214 : vector<6x4xf32> to vector<6x4x1xf32>
    %216 = vector.broadcast %215 : vector<6x4x1xf32> to vector<6x4x4xf32>
    %217 = arith.subf %213, %216 : vector<6x4x4xf32>
    %218 = math.exp %217 : vector<6x4x4xf32>
    %cst_217 = arith.constant dense<0.000000e+00> : vector<6x4xf32>
    %219 = vector.multi_reduction <add>, %218, %cst_217 [2] : vector<6x4x4xf32> to vector<6x4xf32>
    %220 = vector.shape_cast %219 : vector<6x4xf32> to vector<6x4x1xf32>
    %221 = tpu.reciprocal %220 {approx = true} : vector<6x4x1xf32> -> vector<6x4x1xf32>
    %222 = vector.broadcast %221 : vector<6x4x1xf32> to vector<6x4x4xf32>
    %223 = arith.mulf %218, %222 : vector<6x4x4xf32>
    "tpu.trace_start"() <{level = 10 : i32, message = "nbc,ncd->nbd"}> : () -> ()
    %cst_218 = arith.constant dense<0.000000e+00> : vector<6x4x8xf32>
    %224 = tpu.matmul %223, %210, %cst_218 {dimension_numbers = #tpu.dot_dimension_numbers<[2], [1], [1], [2], [0, 0, 0, 1, 1, 2], [0], [0]>} : vector<6x4x4xf32>, vector<6x4x8xf32>, vector<6x4x8xf32> -> vector<6x4x8xf32>
    "tpu.trace_stop"() : () -> ()
    %c1_219 = arith.constant 1 : index
    %c1_220 = arith.constant 1 : index
    %c0_221 = arith.constant 0 : index
    %c0_222 = arith.constant 0 : index
    %c0_223 = arith.constant 0 : index
    %225 = vector.load %arg7[%c1_219, %c1_220, %c0_221, %c0_222, %c0_223] : memref<2x2x6x8x16xf32, #tpu.memory_space<vmem>>, vector<1x1x6x8x16xf32>
    %226 = vector.shape_cast %225 : vector<1x1x6x8x16xf32> to vector<6x8x16xf32>
    "tpu.trace_start"() <{level = 10 : i32, message = "nbd,nds->nbs"}> : () -> ()
    %cst_224 = arith.constant dense<0.000000e+00> : vector<6x4x16xf32>
    %227 = tpu.matmul %224, %226, %cst_224 {dimension_numbers = #tpu.dot_dimension_numbers<[2], [1], [1], [2], [0, 0, 0, 1, 1, 2], [0], [0]>} : vector<6x4x8xf32>, vector<6x8x16xf32>, vector<6x4x16xf32> -> vector<6x4x16xf32>
    "tpu.trace_stop"() : () -> ()
    %228 = arith.addf %189, %227 : vector<6x4x16xf32>
    %c1_225 = arith.constant 1 : index
    %c0_226 = arith.constant 0 : index
    %c0_227 = arith.constant 0 : index
    %c0_228 = arith.constant 0 : index
    %229 = vector.load %arg8[%c1_225, %c0_226, %c0_227, %c0_228] : memref<2x6x1x16xf32, #tpu.memory_space<vmem>>, vector<1x6x1x16xf32>
    %230 = vector.shape_cast %229 : vector<1x6x1x16xf32> to vector<6x1x16xf32>
    %231 = vector.broadcast %230 : vector<6x1x16xf32> to vector<6x4x16xf32>
    %232 = arith.addf %228, %231 : vector<6x4x16xf32>
    %233 = arith.addf %151, %232 : vector<6x4x16xf32>
    %c1_229 = arith.constant 1 : index
    %c0_230 = arith.constant 0 : index
    %c0_231 = arith.constant 0 : index
    %c0_232 = arith.constant 0 : index
    %234 = vector.load %arg9[%c1_229, %c0_230, %c0_231, %c0_232] : memref<2x6x1x16xf32, #tpu.memory_space<vmem>>, vector<1x6x1x16xf32>
    %235 = vector.shape_cast %234 : vector<1x6x1x16xf32> to vector<6x1x16xf32>
    %c1_233 = arith.constant 1 : index
    %c0_234 = arith.constant 0 : index
    %c0_235 = arith.constant 0 : index
    %c0_236 = arith.constant 0 : index
    %236 = vector.load %arg10[%c1_233, %c0_234, %c0_235, %c0_236] : memref<2x6x1x16xf32, #tpu.memory_space<vmem>>, vector<1x6x1x16xf32>
    %237 = vector.shape_cast %236 : vector<1x6x1x16xf32> to vector<6x1x16xf32>
    %cst_237 = arith.constant dense<0.000000e+00> : vector<6x4xf32>
    %238 = vector.multi_reduction <add>, %233, %cst_237 [2] : vector<6x4x16xf32> to vector<6x4xf32>
    %239 = vector.shape_cast %238 : vector<6x4xf32> to vector<6x4x1xf32>
    %cst_238 = arith.constant 1.600000e+01 : f32
    %240 = vector.broadcast %cst_238 : f32 to vector<6x4x1xf32>
    %241 = arith.divf %239, %240 : vector<6x4x1xf32>
    %242 = vector.broadcast %241 : vector<6x4x1xf32> to vector<6x4x16xf32>
    %243 = arith.subf %233, %242 : vector<6x4x16xf32>
    %244 = arith.mulf %243, %243 : vector<6x4x16xf32>
    %cst_239 = arith.constant dense<0.000000e+00> : vector<6x4xf32>
    %245 = vector.multi_reduction <add>, %244, %cst_239 [2] : vector<6x4x16xf32> to vector<6x4xf32>
    %246 = vector.shape_cast %245 : vector<6x4xf32> to vector<6x4x1xf32>
    %cst_240 = arith.constant 1.600000e+01 : f32
    %247 = vector.broadcast %cst_240 : f32 to vector<6x4x1xf32>
    %248 = arith.divf %246, %247 : vector<6x4x1xf32>
    %249 = vector.broadcast %241 : vector<6x4x1xf32> to vector<6x4x16xf32>
    %250 = arith.subf %233, %249 : vector<6x4x16xf32>
    %cst_241 = arith.constant 9.99999974E-6 : f32
    %251 = vector.broadcast %cst_241 : f32 to vector<6x4x1xf32>
    %252 = arith.addf %248, %251 : vector<6x4x1xf32>
    %253 = math.rsqrt %252 : vector<6x4x1xf32>
    %254 = vector.broadcast %253 : vector<6x4x1xf32> to vector<6x4x16xf32>
    %255 = arith.mulf %250, %254 : vector<6x4x16xf32>
    %256 = vector.broadcast %235 : vector<6x1x16xf32> to vector<6x4x16xf32>
    %257 = arith.mulf %255, %256 : vector<6x4x16xf32>
    %258 = vector.broadcast %237 : vector<6x1x16xf32> to vector<6x4x16xf32>
    %259 = arith.addf %257, %258 : vector<6x4x16xf32>
    %c1_242 = arith.constant 1 : index
    %c0_243 = arith.constant 0 : index
    %c0_244 = arith.constant 0 : index
    %c0_245 = arith.constant 0 : index
    %260 = vector.load %arg11[%c1_242, %c0_243, %c0_244, %c0_245] : memref<2x6x16x16xf32, #tpu.memory_space<vmem>>, vector<1x6x16x16xf32>
    %261 = vector.shape_cast %260 : vector<1x6x16x16xf32> to vector<6x16x16xf32>
    "tpu.trace_start"() <{level = 10 : i32, message = "nbs,nst->nbt"}> : () -> ()
    %cst_246 = arith.constant dense<0.000000e+00> : vector<6x4x16xf32>
    %262 = tpu.matmul %259, %261, %cst_246 {dimension_numbers = #tpu.dot_dimension_numbers<[2], [1], [1], [2], [0, 0, 0, 1, 1, 2], [0], [0]>} : vector<6x4x16xf32>, vector<6x16x16xf32>, vector<6x4x16xf32> -> vector<6x4x16xf32>
    "tpu.trace_stop"() : () -> ()
    %c1_247 = arith.constant 1 : index
    %c0_248 = arith.constant 0 : index
    %c0_249 = arith.constant 0 : index
    %c0_250 = arith.constant 0 : index
    %263 = vector.load %arg12[%c1_247, %c0_248, %c0_249, %c0_250] : memref<2x6x1x16xf32, #tpu.memory_space<vmem>>, vector<1x6x1x16xf32>
    %264 = vector.shape_cast %263 : vector<1x6x1x16xf32> to vector<6x1x16xf32>
    %265 = vector.broadcast %264 : vector<6x1x16xf32> to vector<6x4x16xf32>
    %266 = arith.addf %262, %265 : vector<6x4x16xf32>
    %cst_251 = arith.constant 0.000000e+00 : f32
    %267 = vector.broadcast %cst_251 : f32 to vector<6x4x16xf32>
    %268 = arith.maximumf %266, %267 : vector<6x4x16xf32>
    %c1_252 = arith.constant 1 : index
    %c0_253 = arith.constant 0 : index
    %c0_254 = arith.constant 0 : index
    %c0_255 = arith.constant 0 : index
    %269 = vector.load %arg13[%c1_252, %c0_253, %c0_254, %c0_255] : memref<2x6x16x16xf32, #tpu.memory_space<vmem>>, vector<1x6x16x16xf32>
    %270 = vector.shape_cast %269 : vector<1x6x16x16xf32> to vector<6x16x16xf32>
    "tpu.trace_start"() <{level = 10 : i32, message = "nbt,nts->nbs"}> : () -> ()
    %cst_256 = arith.constant dense<0.000000e+00> : vector<6x4x16xf32>
    %271 = tpu.matmul %268, %270, %cst_256 {dimension_numbers = #tpu.dot_dimension_numbers<[2], [1], [1], [2], [0, 0, 0, 1, 1, 2], [0], [0]>} : vector<6x4x16xf32>, vector<6x16x16xf32>, vector<6x4x16xf32> -> vector<6x4x16xf32>
    "tpu.trace_stop"() : () -> ()
    %c1_257 = arith.constant 1 : index
    %c0_258 = arith.constant 0 : index
    %c0_259 = arith.constant 0 : index
    %c0_260 = arith.constant 0 : index
    %272 = vector.load %arg14[%c1_257, %c0_258, %c0_259, %c0_260] : memref<2x6x1x16xf32, #tpu.memory_space<vmem>>, vector<1x6x1x16xf32>
    %273 = vector.shape_cast %272 : vector<1x6x1x16xf32> to vector<6x1x16xf32>
    %274 = vector.broadcast %273 : vector<6x1x16xf32> to vector<6x4x16xf32>
    %275 = arith.addf %271, %274 : vector<6x4x16xf32>
    %276 = arith.addf %259, %275 : vector<6x4x16xf32>
    %c1_261 = arith.constant 1 : index
    %c0_262 = arith.constant 0 : index
    %c0_263 = arith.constant 0 : index
    %c0_264 = arith.constant 0 : index
    %277 = vector.load %arg15[%c1_261, %c0_262, %c0_263, %c0_264] : memref<2x6x1x16xf32, #tpu.memory_space<vmem>>, vector<1x6x1x16xf32>
    %278 = vector.shape_cast %277 : vector<1x6x1x16xf32> to vector<6x1x16xf32>
    %c1_265 = arith.constant 1 : index
    %c0_266 = arith.constant 0 : index
    %c0_267 = arith.constant 0 : index
    %c0_268 = arith.constant 0 : index
    %279 = vector.load %arg16[%c1_265, %c0_266, %c0_267, %c0_268] : memref<2x6x1x16xf32, #tpu.memory_space<vmem>>, vector<1x6x1x16xf32>
    %280 = vector.shape_cast %279 : vector<1x6x1x16xf32> to vector<6x1x16xf32>
    %cst_269 = arith.constant dense<0.000000e+00> : vector<6x4xf32>
    %281 = vector.multi_reduction <add>, %276, %cst_269 [2] : vector<6x4x16xf32> to vector<6x4xf32>
    %282 = vector.shape_cast %281 : vector<6x4xf32> to vector<6x4x1xf32>
    %cst_270 = arith.constant 1.600000e+01 : f32
    %283 = vector.broadcast %cst_270 : f32 to vector<6x4x1xf32>
    %284 = arith.divf %282, %283 : vector<6x4x1xf32>
    %285 = vector.broadcast %284 : vector<6x4x1xf32> to vector<6x4x16xf32>
    %286 = arith.subf %276, %285 : vector<6x4x16xf32>
    %287 = arith.mulf %286, %286 : vector<6x4x16xf32>
    %cst_271 = arith.constant dense<0.000000e+00> : vector<6x4xf32>
    %288 = vector.multi_reduction <add>, %287, %cst_271 [2] : vector<6x4x16xf32> to vector<6x4xf32>
    %289 = vector.shape_cast %288 : vector<6x4xf32> to vector<6x4x1xf32>
    %cst_272 = arith.constant 1.600000e+01 : f32
    %290 = vector.broadcast %cst_272 : f32 to vector<6x4x1xf32>
    %291 = arith.divf %289, %290 : vector<6x4x1xf32>
    %292 = vector.broadcast %284 : vector<6x4x1xf32> to vector<6x4x16xf32>
    %293 = arith.subf %276, %292 : vector<6x4x16xf32>
    %cst_273 = arith.constant 9.99999974E-6 : f32
    %294 = vector.broadcast %cst_273 : f32 to vector<6x4x1xf32>
    %295 = arith.addf %291, %294 : vector<6x4x1xf32>
    %296 = math.rsqrt %295 : vector<6x4x1xf32>
    %297 = vector.broadcast %296 : vector<6x4x1xf32> to vector<6x4x16xf32>
    %298 = arith.mulf %293, %297 : vector<6x4x16xf32>
    %299 = vector.broadcast %278 : vector<6x1x16xf32> to vector<6x4x16xf32>
    %300 = arith.mulf %298, %299 : vector<6x4x16xf32>
    %301 = vector.broadcast %280 : vector<6x1x16xf32> to vector<6x4x16xf32>
    %302 = arith.addf %300, %301 : vector<6x4x16xf32>
    %c0_274 = arith.constant 0 : index
    %c0_275 = arith.constant 0 : index
    %c0_276 = arith.constant 0 : index
    %303 = vector.load %arg17[%c0_274, %c0_275, %c0_276] : memref<6x16x8xf32, #tpu.memory_space<vmem>>, vector<6x16x8xf32>
    "tpu.trace_start"() <{level = 10 : i32, message = "nbs,nsf->nbf"}> : () -> ()
    %cst_277 = arith.constant dense<0.000000e+00> : vector<6x4x8xf32>
    %304 = tpu.matmul %302, %303, %cst_277 {dimension_numbers = #tpu.dot_dimension_numbers<[2], [1], [1], [2], [0, 0, 0, 1, 1, 2], [0], [0]>} : vector<6x4x16xf32>, vector<6x16x8xf32>, vector<6x4x8xf32> -> vector<6x4x8xf32>
    "tpu.trace_stop"() : () -> ()
    %c0_278 = arith.constant 0 : index
    %c0_279 = arith.constant 0 : index
    %305 = vector.load %arg18[%c0_278, %c0_279] : memref<1x8xf32, #tpu.memory_space<vmem>>, vector<1x8xf32>
    %306 = vector.shape_cast %305 : vector<1x8xf32> to vector<1x1x8xf32>
    %307 = vector.broadcast %306 : vector<1x1x8xf32> to vector<6x4x8xf32>
    %308 = arith.addf %304, %307 : vector<6x4x8xf32>
    %309 = vector.extract_strided_slice %308 {offsets = [0, 0, 0], sizes = [1, 4, 8], strides = [1, 1, 1]} : vector<6x4x8xf32> to vector<1x4x8xf32>
    %310 = vector.shape_cast %309 : vector<1x4x8xf32> to vector<4x8xf32>
    %c0_280 = arith.constant 0 : index
    %c0_281 = arith.constant 0 : index
    %311 = vector.load %arg27[%c0_280, %c0_281] : memref<24x8xf32, #tpu.memory_space<vmem>>, vector<4x8xf32>
    tpu.vector_store %arg27[%c0_280, %c0_281], %310 {strides = array<i32>} : memref<24x8xf32, #tpu.memory_space<vmem>>, vector<4x8xf32>,
    %312 = vector.extract_strided_slice %308 {offsets = [1, 0, 0], sizes = [1, 4, 8], strides = [1, 1, 1]} : vector<6x4x8xf32> to vector<1x4x8xf32>
    %313 = vector.shape_cast %312 : vector<1x4x8xf32> to vector<4x8xf32>
    %c4 = arith.constant 4 : index
    %c0_282 = arith.constant 0 : index
    %314 = vector.load %arg27[%c4, %c0_282] : memref<24x8xf32, #tpu.memory_space<vmem>>, vector<4x8xf32>
    tpu.vector_store %arg27[%c4, %c0_282], %313 {strides = array<i32>} : memref<24x8xf32, #tpu.memory_space<vmem>>, vector<4x8xf32>,
    %315 = vector.extract_strided_slice %308 {offsets = [2, 0, 0], sizes = [1, 4, 8], strides = [1, 1, 1]} : vector<6x4x8xf32> to vector<1x4x8xf32>
    %316 = vector.shape_cast %315 : vector<1x4x8xf32> to vector<4x8xf32>
    %c8 = arith.constant 8 : index
    %c0_283 = arith.constant 0 : index
    %317 = vector.load %arg27[%c8, %c0_283] : memref<24x8xf32, #tpu.memory_space<vmem>>, vector<4x8xf32>
    tpu.vector_store %arg27[%c8, %c0_283], %316 {strides = array<i32>} : memref<24x8xf32, #tpu.memory_space<vmem>>, vector<4x8xf32>,
    %318 = vector.extract_strided_slice %308 {offsets = [3, 0, 0], sizes = [1, 4, 8], strides = [1, 1, 1]} : vector<6x4x8xf32> to vector<1x4x8xf32>
    %319 = vector.shape_cast %318 : vector<1x4x8xf32> to vector<4x8xf32>
    %c12 = arith.constant 12 : index
    %c0_284 = arith.constant 0 : index
    %320 = vector.load %arg27[%c12, %c0_284] : memref<24x8xf32, #tpu.memory_space<vmem>>, vector<4x8xf32>
    tpu.vector_store %arg27[%c12, %c0_284], %319 {strides = array<i32>} : memref<24x8xf32, #tpu.memory_space<vmem>>, vector<4x8xf32>,
    %321 = vector.extract_strided_slice %308 {offsets = [4, 0, 0], sizes = [1, 4, 8], strides = [1, 1, 1]} : vector<6x4x8xf32> to vector<1x4x8xf32>
    %322 = vector.shape_cast %321 : vector<1x4x8xf32> to vector<4x8xf32>
    %c16 = arith.constant 16 : index
    %c0_285 = arith.constant 0 : index
    %323 = vector.load %arg27[%c16, %c0_285] : memref<24x8xf32, #tpu.memory_space<vmem>>, vector<4x8xf32>
    tpu.vector_store %arg27[%c16, %c0_285], %322 {strides = array<i32>} : memref<24x8xf32, #tpu.memory_space<vmem>>, vector<4x8xf32>,
    %324 = vector.extract_strided_slice %308 {offsets = [5, 0, 0], sizes = [1, 4, 8], strides = [1, 1, 1]} : vector<6x4x8xf32> to vector<1x4x8xf32>
    %325 = vector.shape_cast %324 : vector<1x4x8xf32> to vector<4x8xf32>
    %c20 = arith.constant 20 : index
    %c0_286 = arith.constant 0 : index
    %326 = vector.load %arg27[%c20, %c0_286] : memref<24x8xf32, #tpu.memory_space<vmem>>, vector<4x8xf32>
    tpu.vector_store %arg27[%c20, %c0_286], %325 {strides = array<i32>} : memref<24x8xf32, #tpu.memory_space<vmem>>, vector<4x8xf32>,
    %c0_287 = arith.constant 0 : index
    %c0_288 = arith.constant 0 : index
    %327 = vector.load %arg19[%c0_287, %c0_288] : memref<6x6xf32, #tpu.memory_space<vmem>>, vector<6x6xf32>
    %c0_289 = arith.constant 0 : index
    %c0_290 = arith.constant 0 : index
    %328 = vector.load %arg20[%c0_289, %c0_290] : memref<8x16xf32, #tpu.memory_space<vmem>>, vector<8x16xf32>
    %c0_291 = arith.constant 0 : index
    %c0_292 = arith.constant 0 : index
    %329 = vector.load %arg21[%c0_291, %c0_292] : memref<16x1xf32, #tpu.memory_space<vmem>>, vector<16x1xf32>
    %c0_293 = arith.constant 0 : index
    %c0_294 = arith.constant 0 : index
    %330 = vector.load %arg22[%c0_293, %c0_294] : memref<16x1xf32, #tpu.memory_space<vmem>>, vector<16x1xf32>
    %c0_295 = arith.constant 0 : index
    %c0_296 = arith.constant 0 : index
    %331 = vector.load %arg27[%c0_295, %c0_296] : memref<24x8xf32, #tpu.memory_space<vmem>>, vector<6x8xf32>
    %cst_297 = arith.constant dense<0.000000e+00> : vector<6x16xf32>
    %332 = tpu.matmul %331, %328, %cst_297 {dimension_numbers = #tpu.dot_dimension_numbers<[1], [0], [0], [1], [0, 0, 1, 1], [], []>} : vector<6x8xf32>, vector<8x16xf32>, vector<6x16xf32> -> vector<6x16xf32>
    %cst_298 = arith.constant dense<0.000000e+00> : vector<6x1xf32>
    %333 = tpu.matmul %332, %329, %cst_298 {dimension_numbers = #tpu.dot_dimension_numbers<[1], [0], [0], [1], [0, 0, 1, 1], [], []>} : vector<6x16xf32>, vector<16x1xf32>, vector<6x1xf32> -> vector<6x1xf32>
    %cst_299 = arith.constant dense<0.000000e+00> : vector<6x1xf32>
    %334 = tpu.matmul %332, %330, %cst_299 {dimension_numbers = #tpu.dot_dimension_numbers<[1], [0], [0], [1], [0, 0, 1, 1], [], []>} : vector<6x16xf32>, vector<16x1xf32>, vector<6x1xf32> -> vector<6x1xf32>
    %335 = tpu.transpose %333, [1, 0] : vector<6x1xf32> -> vector<1x6xf32>
    %336 = vector.broadcast %334 : vector<6x1xf32> to vector<6x6xf32>
    %337 = vector.broadcast %335 : vector<1x6xf32> to vector<6x6xf32>
    %338 = arith.addf %336, %337 : vector<6x6xf32>
    %cst_300 = arith.constant 0.000000e+00 : f32
    %339 = vector.broadcast %cst_300 : f32 to vector<6x6xf32>
    %340 = arith.cmpf oge, %338, %339 : vector<6x6xf32>
    %cst_301 = arith.constant 2.000000e-01 : f32
    %341 = vector.broadcast %cst_301 : f32 to vector<6x6xf32>
    %342 = arith.mulf %341, %338 : vector<6x6xf32>
    %343 = arith.select %340, %338, %342 : vector<6x6xi1>, vector<6x6xf32>
    %cst_302 = arith.constant 0.000000e+00 : f32
    %344 = vector.broadcast %cst_302 : f32 to vector<6x6xf32>
    %345 = arith.cmpf ogt, %327, %344 : vector<6x6xf32>
    %cst_303 = arith.constant -1.000000e+30 : f32
    %346 = vector.broadcast %cst_303 : f32 to vector<6x6xf32>
    %347 = arith.select %345, %343, %346 : vector<6x6xi1>, vector<6x6xf32>
    %cst_304 = arith.constant dense<0xFF800000> : vector<6xf32>
    %348 = vector.multi_reduction <maximumf>, %347, %cst_304 [1] : vector<6x6xf32> to vector<6xf32>
    %349 = vector.shape_cast %348 : vector<6xf32> to vector<6x1xf32>
    %350 = vector.broadcast %349 : vector<6x1xf32> to vector<6x6xf32>
    %351 = arith.subf %347, %350 : vector<6x6xf32>
    %352 = math.exp %351 : vector<6x6xf32>
    %cst_305 = arith.constant dense<0.000000e+00> : vector<6xf32>
    %353 = vector.multi_reduction <add>, %352, %cst_305 [1] : vector<6x6xf32> to vector<6xf32>
    %354 = vector.shape_cast %353 : vector<6xf32> to vector<6x1xf32>
    %355 = tpu.reciprocal %354 {approx = true} : vector<6x1xf32> -> vector<6x1xf32>
    %356 = vector.broadcast %355 : vector<6x1xf32> to vector<6x6xf32>
    %357 = arith.mulf %352, %356 : vector<6x6xf32>
    %cst_306 = arith.constant dense<0.000000e+00> : vector<6x16xf32>
    %358 = tpu.matmul %357, %332, %cst_306 {dimension_numbers = #tpu.dot_dimension_numbers<[1], [0], [0], [1], [0, 0, 1, 1], [], []>} : vector<6x6xf32>, vector<6x16xf32>, vector<6x16xf32> -> vector<6x16xf32>
    %c0_307 = arith.constant 0 : index
    %c0_308 = arith.constant 0 : index
    %359 = vector.load %arg23[%c0_307, %c0_308] : memref<1x16xf32, #tpu.memory_space<vmem>>, vector<1x16xf32>
    %360 = vector.broadcast %359 : vector<1x16xf32> to vector<6x16xf32>
    %361 = arith.addf %358, %360 : vector<6x16xf32>
    %c0_309 = arith.constant 0 : index
    %c0_310 = arith.constant 0 : index
    %362 = vector.load %arg24[%c0_309, %c0_310] : memref<16x2xf32, #tpu.memory_space<vmem>>, vector<16x2xf32>
    %cst_311 = arith.constant dense<0.000000e+00> : vector<6x2xf32>
    %363 = tpu.matmul %361, %362, %cst_311 {dimension_numbers = #tpu.dot_dimension_numbers<[1], [0], [0], [1], [0, 0, 1, 1], [], []>} : vector<6x16xf32>, vector<16x2xf32>, vector<6x2xf32> -> vector<6x2xf32>
    %c0_312 = arith.constant 0 : index
    %c0_313 = arith.constant 0 : index
    %364 = vector.load %arg25[%c0_312, %c0_313] : memref<1x2xf32, #tpu.memory_space<vmem>>, vector<1x2xf32>
    %365 = vector.broadcast %364 : vector<1x2xf32> to vector<6x2xf32>
    %366 = arith.addf %363, %365 : vector<6x2xf32>
    %c0_314 = arith.constant 0 : index
    %c0_315 = arith.constant 0 : index
    %c0_316 = arith.constant 0 : index
    %367 = vector.load %arg26[%c0_314, %c0_315, %c0_316] : memref<4x6x2xf32, #tpu.memory_space<vmem>>, vector<1x6x2xf32>
    %368 = vector.shape_cast %367 : vector<1x6x2xf32> to vector<6x2xf32>
    %369 = vector.shape_cast %366 : vector<6x2xf32> to vector<1x6x2xf32>
    tpu.vector_store %arg26[%c0_314, %c0_315, %c0_316], %369 {strides = array<i32>} : memref<4x6x2xf32, #tpu.memory_space<vmem>>, vector<1x6x2xf32>,
    %c6 = arith.constant 6 : index
    %c0_317 = arith.constant 0 : index
    %370 = vector.load %arg27[%c6, %c0_317] : memref<24x8xf32, #tpu.memory_space<vmem>>, vector<6x8xf32>
    %cst_318 = arith.constant dense<0.000000e+00> : vector<6x16xf32>
    %371 = tpu.matmul %370, %328, %cst_318 {dimension_numbers = #tpu.dot_dimension_numbers<[1], [0], [0], [1], [0, 0, 1, 1], [], []>} : vector<6x8xf32>, vector<8x16xf32>, vector<6x16xf32> -> vector<6x16xf32>
    %cst_319 = arith.constant dense<0.000000e+00> : vector<6x1xf32>
    %372 = tpu.matmul %371, %329, %cst_319 {dimension_numbers = #tpu.dot_dimension_numbers<[1], [0], [0], [1], [0, 0, 1, 1], [], []>} : vector<6x16xf32>, vector<16x1xf32>, vector<6x1xf32> -> vector<6x1xf32>
    %cst_320 = arith.constant dense<0.000000e+00> : vector<6x1xf32>
    %373 = tpu.matmul %371, %330, %cst_320 {dimension_numbers = #tpu.dot_dimension_numbers<[1], [0], [0], [1], [0, 0, 1, 1], [], []>} : vector<6x16xf32>, vector<16x1xf32>, vector<6x1xf32> -> vector<6x1xf32>
    %374 = tpu.transpose %372, [1, 0] : vector<6x1xf32> -> vector<1x6xf32>
    %375 = vector.broadcast %373 : vector<6x1xf32> to vector<6x6xf32>
    %376 = vector.broadcast %374 : vector<1x6xf32> to vector<6x6xf32>
    %377 = arith.addf %375, %376 : vector<6x6xf32>
    %cst_321 = arith.constant 0.000000e+00 : f32
    %378 = vector.broadcast %cst_321 : f32 to vector<6x6xf32>
    %379 = arith.cmpf oge, %377, %378 : vector<6x6xf32>
    %cst_322 = arith.constant 2.000000e-01 : f32
    %380 = vector.broadcast %cst_322 : f32 to vector<6x6xf32>
    %381 = arith.mulf %380, %377 : vector<6x6xf32>
    %382 = arith.select %379, %377, %381 : vector<6x6xi1>, vector<6x6xf32>
    %cst_323 = arith.constant 0.000000e+00 : f32
    %383 = vector.broadcast %cst_323 : f32 to vector<6x6xf32>
    %384 = arith.cmpf ogt, %327, %383 : vector<6x6xf32>
    %cst_324 = arith.constant -1.000000e+30 : f32
    %385 = vector.broadcast %cst_324 : f32 to vector<6x6xf32>
    %386 = arith.select %384, %382, %385 : vector<6x6xi1>, vector<6x6xf32>
    %cst_325 = arith.constant dense<0xFF800000> : vector<6xf32>
    %387 = vector.multi_reduction <maximumf>, %386, %cst_325 [1] : vector<6x6xf32> to vector<6xf32>
    %388 = vector.shape_cast %387 : vector<6xf32> to vector<6x1xf32>
    %389 = vector.broadcast %388 : vector<6x1xf32> to vector<6x6xf32>
    %390 = arith.subf %386, %389 : vector<6x6xf32>
    %391 = math.exp %390 : vector<6x6xf32>
    %cst_326 = arith.constant dense<0.000000e+00> : vector<6xf32>
    %392 = vector.multi_reduction <add>, %391, %cst_326 [1] : vector<6x6xf32> to vector<6xf32>
    %393 = vector.shape_cast %392 : vector<6xf32> to vector<6x1xf32>
    %394 = tpu.reciprocal %393 {approx = true} : vector<6x1xf32> -> vector<6x1xf32>
    %395 = vector.broadcast %394 : vector<6x1xf32> to vector<6x6xf32>
    %396 = arith.mulf %391, %395 : vector<6x6xf32>
    %cst_327 = arith.constant dense<0.000000e+00> : vector<6x16xf32>
    %397 = tpu.matmul %396, %371, %cst_327 {dimension_numbers = #tpu.dot_dimension_numbers<[1], [0], [0], [1], [0, 0, 1, 1], [], []>} : vector<6x6xf32>, vector<6x16xf32>, vector<6x16xf32> -> vector<6x16xf32>
    %c0_328 = arith.constant 0 : index
    %c0_329 = arith.constant 0 : index
    %398 = vector.load %arg23[%c0_328, %c0_329] : memref<1x16xf32, #tpu.memory_space<vmem>>, vector<1x16xf32>
    %399 = vector.broadcast %398 : vector<1x16xf32> to vector<6x16xf32>
    %400 = arith.addf %397, %399 : vector<6x16xf32>
    %c0_330 = arith.constant 0 : index
    %c0_331 = arith.constant 0 : index
    %401 = vector.load %arg24[%c0_330, %c0_331] : memref<16x2xf32, #tpu.memory_space<vmem>>, vector<16x2xf32>
    %cst_332 = arith.constant dense<0.000000e+00> : vector<6x2xf32>
    %402 = tpu.matmul %400, %401, %cst_332 {dimension_numbers = #tpu.dot_dimension_numbers<[1], [0], [0], [1], [0, 0, 1, 1], [], []>} : vector<6x16xf32>, vector<16x2xf32>, vector<6x2xf32> -> vector<6x2xf32>
    %c0_333 = arith.constant 0 : index
    %c0_334 = arith.constant 0 : index
    %403 = vector.load %arg25[%c0_333, %c0_334] : memref<1x2xf32, #tpu.memory_space<vmem>>, vector<1x2xf32>
    %404 = vector.broadcast %403 : vector<1x2xf32> to vector<6x2xf32>
    %405 = arith.addf %402, %404 : vector<6x2xf32>
    %c1_335 = arith.constant 1 : index
    %c0_336 = arith.constant 0 : index
    %c0_337 = arith.constant 0 : index
    %406 = vector.load %arg26[%c1_335, %c0_336, %c0_337] : memref<4x6x2xf32, #tpu.memory_space<vmem>>, vector<1x6x2xf32>
    %407 = vector.shape_cast %406 : vector<1x6x2xf32> to vector<6x2xf32>
    %408 = vector.shape_cast %405 : vector<6x2xf32> to vector<1x6x2xf32>
    tpu.vector_store %arg26[%c1_335, %c0_336, %c0_337], %408 {strides = array<i32>} : memref<4x6x2xf32, #tpu.memory_space<vmem>>, vector<1x6x2xf32>,
    %c12_338 = arith.constant 12 : index
    %c0_339 = arith.constant 0 : index
    %409 = vector.load %arg27[%c12_338, %c0_339] : memref<24x8xf32, #tpu.memory_space<vmem>>, vector<6x8xf32>
    %cst_340 = arith.constant dense<0.000000e+00> : vector<6x16xf32>
    %410 = tpu.matmul %409, %328, %cst_340 {dimension_numbers = #tpu.dot_dimension_numbers<[1], [0], [0], [1], [0, 0, 1, 1], [], []>} : vector<6x8xf32>, vector<8x16xf32>, vector<6x16xf32> -> vector<6x16xf32>
    %cst_341 = arith.constant dense<0.000000e+00> : vector<6x1xf32>
    %411 = tpu.matmul %410, %329, %cst_341 {dimension_numbers = #tpu.dot_dimension_numbers<[1], [0], [0], [1], [0, 0, 1, 1], [], []>} : vector<6x16xf32>, vector<16x1xf32>, vector<6x1xf32> -> vector<6x1xf32>
    %cst_342 = arith.constant dense<0.000000e+00> : vector<6x1xf32>
    %412 = tpu.matmul %410, %330, %cst_342 {dimension_numbers = #tpu.dot_dimension_numbers<[1], [0], [0], [1], [0, 0, 1, 1], [], []>} : vector<6x16xf32>, vector<16x1xf32>, vector<6x1xf32> -> vector<6x1xf32>
    %413 = tpu.transpose %411, [1, 0] : vector<6x1xf32> -> vector<1x6xf32>
    %414 = vector.broadcast %412 : vector<6x1xf32> to vector<6x6xf32>
    %415 = vector.broadcast %413 : vector<1x6xf32> to vector<6x6xf32>
    %416 = arith.addf %414, %415 : vector<6x6xf32>
    %cst_343 = arith.constant 0.000000e+00 : f32
    %417 = vector.broadcast %cst_343 : f32 to vector<6x6xf32>
    %418 = arith.cmpf oge, %416, %417 : vector<6x6xf32>
    %cst_344 = arith.constant 2.000000e-01 : f32
    %419 = vector.broadcast %cst_344 : f32 to vector<6x6xf32>
    %420 = arith.mulf %419, %416 : vector<6x6xf32>
    %421 = arith.select %418, %416, %420 : vector<6x6xi1>, vector<6x6xf32>
    %cst_345 = arith.constant 0.000000e+00 : f32
    %422 = vector.broadcast %cst_345 : f32 to vector<6x6xf32>
    %423 = arith.cmpf ogt, %327, %422 : vector<6x6xf32>
    %cst_346 = arith.constant -1.000000e+30 : f32
    %424 = vector.broadcast %cst_346 : f32 to vector<6x6xf32>
    %425 = arith.select %423, %421, %424 : vector<6x6xi1>, vector<6x6xf32>
    %cst_347 = arith.constant dense<0xFF800000> : vector<6xf32>
    %426 = vector.multi_reduction <maximumf>, %425, %cst_347 [1] : vector<6x6xf32> to vector<6xf32>
    %427 = vector.shape_cast %426 : vector<6xf32> to vector<6x1xf32>
    %428 = vector.broadcast %427 : vector<6x1xf32> to vector<6x6xf32>
    %429 = arith.subf %425, %428 : vector<6x6xf32>
    %430 = math.exp %429 : vector<6x6xf32>
    %cst_348 = arith.constant dense<0.000000e+00> : vector<6xf32>
    %431 = vector.multi_reduction <add>, %430, %cst_348 [1] : vector<6x6xf32> to vector<6xf32>
    %432 = vector.shape_cast %431 : vector<6xf32> to vector<6x1xf32>
    %433 = tpu.reciprocal %432 {approx = true} : vector<6x1xf32> -> vector<6x1xf32>
    %434 = vector.broadcast %433 : vector<6x1xf32> to vector<6x6xf32>
    %435 = arith.mulf %430, %434 : vector<6x6xf32>
    %cst_349 = arith.constant dense<0.000000e+00> : vector<6x16xf32>
    %436 = tpu.matmul %435, %410, %cst_349 {dimension_numbers = #tpu.dot_dimension_numbers<[1], [0], [0], [1], [0, 0, 1, 1], [], []>} : vector<6x6xf32>, vector<6x16xf32>, vector<6x16xf32> -> vector<6x16xf32>
    %c0_350 = arith.constant 0 : index
    %c0_351 = arith.constant 0 : index
    %437 = vector.load %arg23[%c0_350, %c0_351] : memref<1x16xf32, #tpu.memory_space<vmem>>, vector<1x16xf32>
    %438 = vector.broadcast %437 : vector<1x16xf32> to vector<6x16xf32>
    %439 = arith.addf %436, %438 : vector<6x16xf32>
    %c0_352 = arith.constant 0 : index
    %c0_353 = arith.constant 0 : index
    %440 = vector.load %arg24[%c0_352, %c0_353] : memref<16x2xf32, #tpu.memory_space<vmem>>, vector<16x2xf32>
    %cst_354 = arith.constant dense<0.000000e+00> : vector<6x2xf32>
    %441 = tpu.matmul %439, %440, %cst_354 {dimension_numbers = #tpu.dot_dimension_numbers<[1], [0], [0], [1], [0, 0, 1, 1], [], []>} : vector<6x16xf32>, vector<16x2xf32>, vector<6x2xf32> -> vector<6x2xf32>
    %c0_355 = arith.constant 0 : index
    %c0_356 = arith.constant 0 : index
    %442 = vector.load %arg25[%c0_355, %c0_356] : memref<1x2xf32, #tpu.memory_space<vmem>>, vector<1x2xf32>
    %443 = vector.broadcast %442 : vector<1x2xf32> to vector<6x2xf32>
    %444 = arith.addf %441, %443 : vector<6x2xf32>
    %c2 = arith.constant 2 : index
    %c0_357 = arith.constant 0 : index
    %c0_358 = arith.constant 0 : index
    %445 = vector.load %arg26[%c2, %c0_357, %c0_358] : memref<4x6x2xf32, #tpu.memory_space<vmem>>, vector<1x6x2xf32>
    %446 = vector.shape_cast %445 : vector<1x6x2xf32> to vector<6x2xf32>
    %447 = vector.shape_cast %444 : vector<6x2xf32> to vector<1x6x2xf32>
    tpu.vector_store %arg26[%c2, %c0_357, %c0_358], %447 {strides = array<i32>} : memref<4x6x2xf32, #tpu.memory_space<vmem>>, vector<1x6x2xf32>,
    %c18 = arith.constant 18 : index
    %c0_359 = arith.constant 0 : index
    %448 = vector.load %arg27[%c18, %c0_359] : memref<24x8xf32, #tpu.memory_space<vmem>>, vector<6x8xf32>
    %cst_360 = arith.constant dense<0.000000e+00> : vector<6x16xf32>
    %449 = tpu.matmul %448, %328, %cst_360 {dimension_numbers = #tpu.dot_dimension_numbers<[1], [0], [0], [1], [0, 0, 1, 1], [], []>} : vector<6x8xf32>, vector<8x16xf32>, vector<6x16xf32> -> vector<6x16xf32>
    %cst_361 = arith.constant dense<0.000000e+00> : vector<6x1xf32>
    %450 = tpu.matmul %449, %329, %cst_361 {dimension_numbers = #tpu.dot_dimension_numbers<[1], [0], [0], [1], [0, 0, 1, 1], [], []>} : vector<6x16xf32>, vector<16x1xf32>, vector<6x1xf32> -> vector<6x1xf32>
    %cst_362 = arith.constant dense<0.000000e+00> : vector<6x1xf32>
    %451 = tpu.matmul %449, %330, %cst_362 {dimension_numbers = #tpu.dot_dimension_numbers<[1], [0], [0], [1], [0, 0, 1, 1], [], []>} : vector<6x16xf32>, vector<16x1xf32>, vector<6x1xf32> -> vector<6x1xf32>
    %452 = tpu.transpose %450, [1, 0] : vector<6x1xf32> -> vector<1x6xf32>
    %453 = vector.broadcast %451 : vector<6x1xf32> to vector<6x6xf32>
    %454 = vector.broadcast %452 : vector<1x6xf32> to vector<6x6xf32>
    %455 = arith.addf %453, %454 : vector<6x6xf32>
    %cst_363 = arith.constant 0.000000e+00 : f32
    %456 = vector.broadcast %cst_363 : f32 to vector<6x6xf32>
    %457 = arith.cmpf oge, %455, %456 : vector<6x6xf32>
    %cst_364 = arith.constant 2.000000e-01 : f32
    %458 = vector.broadcast %cst_364 : f32 to vector<6x6xf32>
    %459 = arith.mulf %458, %455 : vector<6x6xf32>
    %460 = arith.select %457, %455, %459 : vector<6x6xi1>, vector<6x6xf32>
    %cst_365 = arith.constant 0.000000e+00 : f32
    %461 = vector.broadcast %cst_365 : f32 to vector<6x6xf32>
    %462 = arith.cmpf ogt, %327, %461 : vector<6x6xf32>
    %cst_366 = arith.constant -1.000000e+30 : f32
    %463 = vector.broadcast %cst_366 : f32 to vector<6x6xf32>
    %464 = arith.select %462, %460, %463 : vector<6x6xi1>, vector<6x6xf32>
    %cst_367 = arith.constant dense<0xFF800000> : vector<6xf32>
    %465 = vector.multi_reduction <maximumf>, %464, %cst_367 [1] : vector<6x6xf32> to vector<6xf32>
    %466 = vector.shape_cast %465 : vector<6xf32> to vector<6x1xf32>
    %467 = vector.broadcast %466 : vector<6x1xf32> to vector<6x6xf32>
    %468 = arith.subf %464, %467 : vector<6x6xf32>
    %469 = math.exp %468 : vector<6x6xf32>
    %cst_368 = arith.constant dense<0.000000e+00> : vector<6xf32>
    %470 = vector.multi_reduction <add>, %469, %cst_368 [1] : vector<6x6xf32> to vector<6xf32>
    %471 = vector.shape_cast %470 : vector<6xf32> to vector<6x1xf32>
    %472 = tpu.reciprocal %471 {approx = true} : vector<6x1xf32> -> vector<6x1xf32>
    %473 = vector.broadcast %472 : vector<6x1xf32> to vector<6x6xf32>
    %474 = arith.mulf %469, %473 : vector<6x6xf32>
    %cst_369 = arith.constant dense<0.000000e+00> : vector<6x16xf32>
    %475 = tpu.matmul %474, %449, %cst_369 {dimension_numbers = #tpu.dot_dimension_numbers<[1], [0], [0], [1], [0, 0, 1, 1], [], []>} : vector<6x6xf32>, vector<6x16xf32>, vector<6x16xf32> -> vector<6x16xf32>
    %c0_370 = arith.constant 0 : index
    %c0_371 = arith.constant 0 : index
    %476 = vector.load %arg23[%c0_370, %c0_371] : memref<1x16xf32, #tpu.memory_space<vmem>>, vector<1x16xf32>
    %477 = vector.broadcast %476 : vector<1x16xf32> to vector<6x16xf32>
    %478 = arith.addf %475, %477 : vector<6x16xf32>
    %c0_372 = arith.constant 0 : index
    %c0_373 = arith.constant 0 : index
    %479 = vector.load %arg24[%c0_372, %c0_373] : memref<16x2xf32, #tpu.memory_space<vmem>>, vector<16x2xf32>
    %cst_374 = arith.constant dense<0.000000e+00> : vector<6x2xf32>
    %480 = tpu.matmul %478, %479, %cst_374 {dimension_numbers = #tpu.dot_dimension_numbers<[1], [0], [0], [1], [0, 0, 1, 1], [], []>} : vector<6x16xf32>, vector<16x2xf32>, vector<6x2xf32> -> vector<6x2xf32>
    %c0_375 = arith.constant 0 : index
    %c0_376 = arith.constant 0 : index
    %481 = vector.load %arg25[%c0_375, %c0_376] : memref<1x2xf32, #tpu.memory_space<vmem>>, vector<1x2xf32>
    %482 = vector.broadcast %481 : vector<1x2xf32> to vector<6x2xf32>
    %483 = arith.addf %480, %482 : vector<6x2xf32>
    %c3 = arith.constant 3 : index
    %c0_377 = arith.constant 0 : index
    %c0_378 = arith.constant 0 : index
    %484 = vector.load %arg26[%c3, %c0_377, %c0_378] : memref<4x6x2xf32, #tpu.memory_space<vmem>>, vector<1x6x2xf32>
    %485 = vector.shape_cast %484 : vector<1x6x2xf32> to vector<6x2xf32>
    %486 = vector.shape_cast %483 : vector<6x2xf32> to vector<1x6x2xf32>
    tpu.vector_store %arg26[%c3, %c0_377, %c0_378], %486 {strides = array<i32>} : memref<4x6x2xf32, #tpu.memory_space<vmem>>, vector<1x6x2xf32>,
    return
  }
}

</mosaic_0001>

<bundles_post_ra>
// kernel: spatio_temporal_forward.1
= control target key start
LH: loop header
LB: loop body
LE: loop exit
PB: predicated region body
PF: predicated region fallthrough
CT: control target
= control target key end

     0   :  { %v19470_v0 = vmov 0.0|0.0   ;;  %vm19471_vm0 = vmmov 0   ;;  %v19472_v6 = vmov 0.0   ;;  %vm143_vm1 = vcmask 130048   ;;  %s22196_s1 = inlined_call_operand.vmem [shape: f32[2,2,6,16,8], index: 1, kind: input, shape index: {}]   ;;  %s22197_s0 = inlined_call_operand.vmem [shape: f32[6,4,16], index: 0, kind: input, shape index: {}]   ;;  %s22198_s3 = inlined_call_operand.vmem [shape: f32[2,2,6,16,8], index: 3, kind: input, shape index: {}]   ;;  %s22199_s5 = inlined_call_operand.vmem [shape: f32[2,2,6,16,8], index: 5, kind: input, shape index: {}]   ;;  %s22200_s4 = inlined_call_operand.vmem [shape: f32[2,2,6,1,8], index: 4, kind: input, shape index: {}]   ;;  %s22201_s2 = inlined_call_operand.vmem [shape: f32[2,2,6,1,8], index: 2, kind: input, shape index: {}]   ;;  %s22202_s6 = inlined_call_operand.vmem [shape: f32[2,2,6,1,8], index: 6, kind: input, shape index: {}]   ;;  %s22203_s7 = inlined_call_operand.vmem [shape: f32[2,2,6,8,16], index: 7, kind: input, shape index: {}]   ;;  %s22204_s8 = inlined_call_operand.vmem [shape: f32[2,6,1,16], index: 8, kind: input, shape index: {}]   ;;  %s22205_s11 = inlined_call_operand.vmem [shape: f32[2,6,16,16], index: 11, kind: input, shape index: {}]   ;;  %s22206_s9 = inlined_call_operand.vmem [shape: f32[2,6,1,16], index: 9, kind: input, shape index: {}]   ;;  %s22207_s10 = inlined_call_operand.vmem [shape: f32[2,6,1,16], index: 10, kind: input, shape index: {}]   ;;  %s22208_s13 = inlined_call_operand.vmem [shape: f32[2,6,16,16], index: 13, kind: input, shape index: {}]   ;;  %s22209_s12 = inlined_call_operand.vmem [shape: f32[2,6,1,16], index: 12, kind: input, shape index: {}]   ;;  %s22210_s14 = inlined_call_operand.vmem [shape: f32[2,6,1,16], index: 14, kind: input, shape index: {}]   ;;  %s22211_s15 = inlined_call_operand.vmem [shape: f32[2,6,1,16], index: 15, kind: input, shape index: {}]   ;;  %s22212_s16 = inlined_call_operand.vmem [shape: f32[2,6,1,16], index: 16, kind: input, shape index: {}]   ;;  %s22213_s17 = inlined_call_operand.vmem [shape: f32[6,16,8], index: 17, kind: input, shape index: {}]   ;;  %s22214_s20 = inlined_call_operand.vmem [shape: f32[8,16], index: 20, kind: input, shape index: {}]   ;;  %s22215_s18 = inlined_call_operand.vmem [shape: f32[1,8], index: 18, kind: input, shape index: {}]   ;;  %s22216_s22 = inlined_call_operand.vmem [shape: f32[16,1], index: 22, kind: input, shape index: {}]   ;;  %s22217_s21 = inlined_call_operand.vmem [shape: f32[16,1], index: 21, kind: input, shape index: {}]   ;;  %s22218_s19 = inlined_call_operand.vmem [shape: f32[6,6], index: 19, kind: input, shape index: {}]   ;;  %s22219_s24 = inlined_call_operand.vmem [shape: f32[16,2], index: 24, kind: input, shape index: {}]   ;;  %s22220_s23 = inlined_call_operand.vmem [shape: f32[1,16], index: 23, kind: input, shape index: {}]   ;;  %s22221_s25 = inlined_call_operand.vmem [shape: f32[1,2], index: 25, kind: input, shape index: {}]   ;;  %s22222_s26 = inlined_call_operand.vmem [shape: f32[4,6,2], index: 26, kind: output, shape index: {}]  }
   0x1   :  { %22236 = sst [smem:[#allocation3_spill]] %s22196_s1  ;;  %18956 = vmatprep.subr.bf16.mxu0 %v19470_v0  ;;  %18959 = vmatprep.subr.bf16.mxu1 %v19470_v0  ;;  %vm1530_vm2 = vcmask 64512   ;;  %vm2064_vm3 = vcmask 1043456   ;;  %vm1993_vm4 = vcmask 27648   ;;  %vm2060_vm5 = vcmask 31744  }
   0x2   :  { %22237 = sst [smem:[#allocation4_spill]] %s22197_s0  ;;  %17762 = vmatprep.mubr.msk.f32.mxu0 %vm19471_vm0, %v19472_v6  ;;  %17769 = vmatprep.mubr.msk.f32.mxu1 %vm19471_vm0, %v19472_v6  ;;  %vm5885_vm6 = vcmask 125952   ;;  %vm14815_vm7 = vcmask 60416   ;;  %vm15115_vm8 = vcmask 1045504   ;;  %vm15092_vm11 = vcmask 46080  }
   0x3   :  { %22238 = sst [smem:[#allocation5_spill]] %s22198_s3  ;;  %s22253_s28 = sld [smem:[#allocation4_spill]]  ;;  %vm15111_vm12 = vcmask 48128   ;;  %vm15270_vm13 = vcmask 13312  }
   0x4   :  { %22239 = sst [smem:[#allocation6_spill]] %s22199_s5  ;;  %s22254_s30 = sld [smem:[#allocation5_spill]] }
   0x5   :  { %22240 = sst [smem:[#allocation7_spill]] %s22200_s4  ;;  %s22255_s0 = sld [smem:[#allocation6_spill]] }
   0x6   :  { %22241 = sst [smem:[#allocation8_spill]] %s22201_s2 }
   0x7   :  { %22242 = sst [smem:[#allocation9_spill]] %s22202_s6  ;;  %s22257_s2 = sld [smem:[#allocation8_spill]] }
   0x8   :  { %22243 = sst [smem:[#allocation10_spill]] %s22203_s7  ;;  %s22252_s7 = sld [smem:[#allocation3_spill]] }
   0x9   :  { %22244 = sst [smem:[#allocation11_spill]] %s22204_s8  ;;  %v19639_v11 = vld [vmem:[%s22253_s28] sm:$0xf]  ;;  %v19647_v14 = vld [vmem:[%s22253_s28 + $0x4] sm:$0xf]  ;;  %s22256_s8 = sld [smem:[#allocation7_spill]] }
   0xa   :  { %22245 = sst [smem:[#allocation12_spill]] %s22205_s11  ;;  %v19670_v20 = vld [vmem:[%s22253_s28 + $0x8] sm:$0xf]  ;;  %v19677_v22 = vld [vmem:[%s22253_s28 + $0xc] sm:$0xf]  ;;  %v582_v24 = vld [vmem:[%s22254_s30] sm:$0xff] }
   0xb   :  { %22246 = sst [smem:[#allocation13_spill]] %s22206_s9  ;;  %v583_v25 = vld [vmem:[%s22254_s30 + $0x8] sm:$0xff]  ;;  %v584_v26 = vld [vmem:[%s22254_s30 + $0x10] sm:$0xff]  ;;  %v585_v27 = vld [vmem:[%s22254_s30 + $0x18] sm:$0xff]  ;;  %s22258_s6 = sld [smem:[#allocation9_spill]] }
   0xc   :  { %22247 = sst [smem:[#allocation14_spill]] %s22218_s19  ;;  %v19702_v28 = vld [vmem:[%s22253_s28 + $0x10] sm:$0xf]  ;;  %v18975_v29 = vpack.c.bf16 %v583_v25, %v582_v24  ;;  %v19709_v30 = vld [vmem:[%s22253_s28 + $0x14] sm:$0xf]  ;;  %v18978_v31 = vpack.c.bf16 %v585_v27, %v584_v26  ;;  %v586_v32 = vld [vmem:[%s22254_s30 + $0x20] sm:$0xff] }
   0xd   :  { %22248 = sst [smem:[#allocation15_spill]] %s22219_s24  ;;  %v587_v33 = vld [vmem:[%s22254_s30 + $0x28] sm:$0xff]  ;;  %v588_v34 = vld [vmem:[%s22254_s30 + $0x30] sm:$0xff]  ;;  %v589_v35 = vld [vmem:[%s22254_s30 + $0x38] sm:$0xff]  ;;  %s22259_s1 = sld [smem:[#allocation10_spill]] }
   0xe   :  { %22249 = sst [smem:[#allocation16_spill]] %s22220_s23  ;;  %v89_v1 = vld [vmem:[%s22252_s7] sm:$0xff]  ;;  %v90_v2 = vld [vmem:[%s22252_s7 + $0x8] sm:$0xff]  ;;  %v91_v3 = vld [vmem:[%s22252_s7 + $0x10] sm:$0xff]  ;;  %v18981_v36 = vpack.c.bf16 %v587_v33, %v586_v32  ;;  %v18984_v37 = vpack.c.bf16 %v589_v35, %v588_v34  ;;  %s22260_s5 = sld [smem:[#allocation11_spill]] }
   0xf   :  { %22250 = sst [smem:[#allocation17_spill]] %s22221_s25  ;;  %v18957_v4 = vpack.c.bf16 %v90_v2, %v89_v1  ;;  %v92_v5 = vld [vmem:[%s22252_s7 + $0x18] sm:$0xff]  ;;  %v93_v8 = vld [vmem:[%s22252_s7 + $0x20] sm:$0xff]  ;;  %v94_v9 = vld [vmem:[%s22252_s7 + $0x28] sm:$0xff]  ;;  %s22261_s27 = sld [smem:[#allocation12_spill]] }
  0x10   :  { %22251 = sst [smem:[#allocation18_spill]] %s22222_s26  ;;  %v18960_v7 = vpack.c.bf16 %v92_v5, %v91_v3  ;;  %v95_v10 = vld [vmem:[%s22252_s7 + $0x30] sm:$0xff]  ;;  %v18963_v12 = vpack.c.bf16 %v94_v9, %v93_v8  ;;  %v96_v13 = vld [vmem:[%s22252_s7 + $0x38] sm:$0xff]  ;;  %v97_v16 = vld [vmem:[%s22252_s7 + $0x40] sm:$0xff]  ;;  %s22262_s4 = sld [smem:[#allocation13_spill]] }
  0x11   :  { %18958 = vmatpush3.bf16.msra.mxu0 %v18957_v4  ;;  %v18966_v15 = vpack.c.bf16 %v96_v13, %v95_v10  ;;  %v98_v17 = vld [vmem:[%s22252_s7 + $0x48] sm:$0xff]  ;;  %v99_v18 = vld [vmem:[%s22252_s7 + $0x50] sm:$0xff]  ;;  %v100_v19 = vld [vmem:[%s22252_s7 + $0x58] sm:$0xff]  ;;  %s22266_s19 = sld [smem:[#allocation17_spill]]  ;;  %s22267_s3 = sld [smem:[#allocation18_spill]] }
  0x12   :  { %18961 = vmatpush3.bf16.msra.mxu1 %v18960_v7  ;;  %18962 = vmatprep.subr.bf16.mxu0 %v19470_v0  ;;  %v18969_v21 = vpack.c.bf16 %v98_v17, %v97_v16  ;;  %v18972_v23 = vpack.c.bf16 %v100_v19, %v99_v18  ;;  %v590_v38 = vld [vmem:[%s22254_s30 + $0x40] sm:$0xff]  ;;  %v591_v39 = vld [vmem:[%s22254_s30 + $0x48] sm:$0xff]  ;;  %v592_v40 = vld [vmem:[%s22254_s30 + $0x50] sm:$0xff] }
  0x13   :  { %18965 = vmatprep.subr.bf16.mxu1 %v19470_v0  ;;  %v593_v41 = vld [vmem:[%s22254_s30 + $0x58] sm:$0xff]  ;;  %v18987_v42 = vpack.c.bf16 %v591_v39, %v590_v38  ;;  %v1056_v44 = vld [vmem:[%s22255_s0] sm:$0xff]  ;;  %v1057_v45 = vld [vmem:[%s22255_s0 + $0x8] sm:$0xff] }
  0x14   :  { %17763 = vmatmul.mubr.msk.f32.vlgmr.msra.gmra.mrb[0].mxu0 %vm143_vm1, %v19639_v11  ;;  %v18990_v43 = vpack.c.bf16 %v593_v41, %v592_v40  ;;  %v1058_v46 = vld [vmem:[%s22255_s0 + $0x10] sm:$0xff]  ;;  %v1059_v47 = vld [vmem:[%s22255_s0 + $0x18] sm:$0xff]  ;;  %v18993_v48 = vpack.c.bf16 %v1057_v45, %v1056_v44  ;;  %v1060_v50 = vld [vmem:[%s22255_s0 + $0x20] sm:$0xff] }
  0x15   :  { %17770 = vmatmul.mubr.msk.f32.vlgmr.msra.gmra.mrb[0].mxu1 %vm143_vm1, %v19647_v14  ;;  %18964 = vmatpush3.bf16.msra.mxu0 %v18963_v12  ;;  %v18996_v49 = vpack.c.bf16 %v1059_v47, %v1058_v46  ;;  %v1061_v51 = vld [vmem:[%s22255_s0 + $0x28] sm:$0xff]  ;;  %v1062_v52 = vld [vmem:[%s22255_s0 + $0x30] sm:$0xff]  ;;  %v1063_v54 = vld [vmem:[%s22255_s0 + $0x38] sm:$0xff] }
  0x16   :  { %18967 = vmatpush3.bf16.msra.mxu1 %v18966_v15  ;;  %17776 = vmatprep.mubr.msk.f32.mxu0 %vm19471_vm0, %v19472_v6  ;;  %v18999_v53 = vpack.c.bf16 %v1061_v51, %v1060_v50  ;;  %v19002_v55 = vpack.c.bf16 %v1063_v54, %v1062_v52  ;;  %v1064_v56 = vld [vmem:[%s22255_s0 + $0x40] sm:$0xff]  ;;  %v1065_v57 = vld [vmem:[%s22255_s0 + $0x48] sm:$0xff]  ;;  %v1066_v58 = vld [vmem:[%s22255_s0 + $0x50] sm:$0xff] }
  0x17   :  { %17783 = vmatprep.mubr.msk.f32.mxu1 %vm19471_vm0, %v19472_v6  ;;  %18968 = vmatprep.subr.bf16.mxu0 %v19470_v0  ;;  %v19005_v59 = vpack.c.bf16 %v1065_v57, %v1064_v56  ;;  %v1067_v60 = vld [vmem:[%s22255_s0 + $0x58] sm:$0xff]  ;;  %v16608_v13 = vld [vmem:[%s22256_s8] ss:$0 sm:$0xff]  ;;  %v16609_v15 = vld [vmem:[%s22256_s8 + $0x1] ss:$0 sm:$0xff] }
  0x18   :  { %17777 = vmatmul.mubr.msk.f32.vlgmr.msra.gmra.mrb[2].mxu0 %vm143_vm1, %v19670_v20  ;;  %18971 = vmatprep.subr.bf16.mxu1 %v19470_v0  ;;  %v19008_v61 = vpack.c.bf16 %v1067_v60, %v1066_v58  ;;  %v16596_v17 = vld [vmem:[%s22257_s2] ss:$0 sm:$0xff]  ;;  %v16610_v26 = vld [vmem:[%s22256_s8 + $0x2] ss:$0 sm:$0xff]  ;;  %v16611_v27 = vld [vmem:[%s22256_s8 + $0x3] ss:$0 sm:$0xff] }
  0x19   :  { %17784 = vmatmul.mubr.msk.f32.vlgmr.msra.gmra.mrb[2].mxu1 %vm143_vm1, %v19677_v22  ;;  %18970 = vmatpush3.bf16.msra.mxu0 %v18969_v21  ;;  %v16598_v33 = vld [vmem:[%s22257_s2 + $0x2] ss:$0 sm:$0xff]  ;;  %v16612_v40 = vld [vmem:[%s22256_s8 + $0x4] ss:$0 sm:$0xff]  ;;  %v16613_v41 = vld [vmem:[%s22256_s8 + $0x5] ss:$0 sm:$0xff] }
  0x1a   :  { %18973 = vmatpush3.bf16.msra.mxu1 %v18972_v23  ;;  %17790 = vmatprep.mubr.msk.f32.mxu0 %vm19471_vm0, %v19472_v6  ;;  %v16597_v23 = vld [vmem:[%s22257_s2 + $0x1] ss:$0 sm:$0xff]  ;;  %v16600_v45 = vld [vmem:[%s22257_s2 + $0x4] ss:$0 sm:$0xff]  ;;  %v16620_v52 = vld [vmem:[%s22258_s6] ss:$0 sm:$0xff] }
  0x1b   :  { %17797 = vmatprep.mubr.msk.f32.mxu1 %vm19471_vm0, %v19472_v6  ;;  %18974 = vmatprep.subr.bf16.mxu0 %v19470_v0 }
  0x1c   :  { %17791 = vmatmul.mubr.msk.f32.vlgmr.msra.gmra.mrb[4].mxu0 %vm143_vm1, %v19702_v28  ;;  %18977 = vmatprep.subr.bf16.mxu1 %v19470_v0 }
  0x1d   :  { %17798 = vmatmul.mubr.msk.f32.vlgmr.msra.gmra.mrb[4].mxu1 %vm143_vm1, %v19709_v30  ;;  %18976 = vmatpush3.bf16.msra.mxu0 %v18975_v29 }
  0x1e   :  { %18979 = vmatpush3.bf16.msra.mxu1 %v18978_v31  ;;  %17804 = vmatprep.mubr.msk.f32.mxu0 %vm19471_vm0, %v19472_v6 }
  0x1f   :  { %17811 = vmatprep.mubr.msk.f32.mxu1 %vm19471_vm0, %v19472_v6  ;;  %18980 = vmatprep.subr.bf16.mxu0 %v19470_v0 }
  0x20   :  { %17805 = vmatmul.mubr.msk.f32.vlgmr.msra.gmra.mrb[6].mxu0 %vm143_vm1, %v19639_v11  ;;  %18983 = vmatprep.subr.bf16.mxu1 %v19470_v0 }
  0x21   :  { %17812 = vmatmul.mubr.msk.f32.vlgmr.msra.gmra.mrb[6].mxu1 %vm143_vm1, %v19647_v14  ;;  %18982 = vmatpush3.bf16.msra.mxu0 %v18981_v36 }
  0x22   :  { %18985 = vmatpush3.bf16.msra.mxu1 %v18984_v37  ;;  %17818 = vmatprep.mubr.msk.f32.mxu0 %vm19471_vm0, %v19472_v6  ;;  %v16599_v37 = vld [vmem:[%s22257_s2 + $0x3] ss:$0 sm:$0xff] }
  0x23   :  { %17825 = vmatprep.mubr.msk.f32.mxu1 %vm19471_vm0, %v19472_v6  ;;  %18986 = vmatprep.subr.bf16.mxu0 %v19470_v0 }
  0x24   :  { %17819 = vmatmul.mubr.msk.f32.vlgmr.msra.gmra.mrb[8].mxu0 %vm143_vm1, %v19670_v20  ;;  %18989 = vmatprep.subr.bf16.mxu1 %v19470_v0 }
  0x25   :  { %17826 = vmatmul.mubr.msk.f32.vlgmr.msra.gmra.mrb[8].mxu1 %vm143_vm1, %v19677_v22  ;;  %18988 = vmatpush3.bf16.msra.mxu0 %v18987_v42 }
  0x26   :  { %18991 = vmatpush3.bf16.msra.mxu1 %v18990_v43  ;;  %17832 = vmatprep.mubr.msk.f32.mxu0 %vm19471_vm0, %v19472_v6 }
  0x27   :  { %17839 = vmatprep.mubr.msk.f32.mxu1 %vm19471_vm0, %v19472_v6  ;;  %18992 = vmatprep.subr.bf16.mxu0 %v19470_v0 }
  0x28   :  { %17833 = vmatmul.mubr.msk.f32.vlgmr.msra.gmra.mrb[10].mxu0 %vm143_vm1, %v19702_v28  ;;  %18995 = vmatprep.subr.bf16.mxu1 %v19470_v0 }
  0x29   :  { %17840 = vmatmul.mubr.msk.f32.vlgmr.msra.gmra.mrb[10].mxu1 %vm143_vm1, %v19709_v30  ;;  %18994 = vmatpush3.bf16.msra.mxu0 %v18993_v48 }
  0x2a   :  { %18997 = vmatpush3.bf16.msra.mxu1 %v18996_v49  ;;  %17846 = vmatprep.mubr.msk.f32.mxu0 %vm19471_vm0, %v19472_v6  ;;  %v16601_v49 = vld [vmem:[%s22257_s2 + $0x5] ss:$0 sm:$0xff] }
  0x2b   :  { %17853 = vmatprep.mubr.msk.f32.mxu1 %vm19471_vm0, %v19472_v6  ;;  %18998 = vmatprep.subr.bf16.mxu0 %v19470_v0 }
  0x2c   :  { %17847 = vmatmul.mubr.msk.f32.vlgmr.msra.gmra.mrb[12].mxu0 %vm143_vm1, %v19639_v11  ;;  %19001 = vmatprep.subr.bf16.mxu1 %v19470_v0 }
  0x2d   :  { %17854 = vmatmul.mubr.msk.f32.vlgmr.msra.gmra.mrb[12].mxu1 %vm143_vm1, %v19647_v14  ;;  %17860 = vmatprep.mubr.msk.f32.mxu0 %vm19471_vm0, %v19472_v6 }
  0x2e   :  { %17867 = vmatprep.mubr.msk.f32.mxu1 %vm19471_vm0, %v19472_v6  ;;  %19000 = vmatpush3.bf16.msra.mxu0 %v18999_v53  ;;  %v16621_v53 = vld [vmem:[%s22258_s6 + $0x1] ss:$0 sm:$0xff] }
  0x2f   :  { %19003 = vmatpush3.bf16.msra.mxu1 %v19002_v55  ;;  %19004 = vmatprep.subr.bf16.mxu0 %v19470_v0 }
  0x30   :  { %19007 = vmatprep.subr.bf16.mxu1 %v19470_v0 }
  0x31   :  { %17861 = vmatmul.mubr.msk.f32.vlgmr.msra.gmra.mrb[14].mxu0 %vm143_vm1, %v19670_v20 }
  0x32   :  { %17868 = vmatmul.mubr.msk.f32.vlgmr.msra.gmra.mrb[14].mxu1 %vm143_vm1, %v19677_v22  ;;  %19006 = vmatpush3.bf16.msra.mxu0 %v19005_v59 }
  0x33   :  { %19009 = vmatpush3.bf16.msra.mxu1 %v19008_v61  ;;  %17874 = vmatprep.mubr.msk.f32.mxu0 %vm19471_vm0, %v19472_v6 }
  0x34   :  { %17881 = vmatprep.mubr.msk.f32.mxu1 %vm19471_vm0, %v19472_v6  ;;  %17884 = vmatprep.subr.mxu0 %v19472_v6 }
  0x35   :  { %17875 = vmatmul.mubr.msk.f32.vlgmr.msra.gmra.mrb[16].mxu0 %vm143_vm1, %v19702_v28  ;;  %17889 = vmatprep.subr.mxu1 %v19472_v6 }
  0x36   :  { %17882 = vmatmul.mubr.msk.f32.vlgmr.msra.gmra.mrb[16].mxu1 %vm143_vm1, %v19709_v30  ;;  %17886 = vmatprep.mubr.msk.f32.mxu0 %vm19471_vm0, %v19472_v6 }
  0x37   :  { %17891 = vmatprep.mubr.msk.f32.mxu1 %vm19471_vm0, %v19472_v6 }
  0xe7   :  { %v213_v62 = vpop.f32.mrb[0].mxu0 }
  0xe8   :  { %v17764_v63 = vpop.f32.mrb[1].mxu0  ;;  %v286_v1 = vpop.f32.mrb[0].mxu1  ;;  %v214_v29 = vadd.f32 %v16596_v17, %v213_v62 }
  0xe9   :  { %v17771_v2 = vpop.f32.mrb[1].mxu1  ;;  %v287_v32 = vadd.f32 %v16597_v23, %v286_v1 }
  0xeb   :  { %v359_v3 = vpop.f32.mrb[2].mxu0 }
  0xec   :  { %v17778_v4 = vpop.f32.mrb[3].mxu0  ;;  %v432_v5 = vpop.f32.mrb[2].mxu1  ;;  %v360_v42 = vadd.f32 %v16598_v33, %v359_v3 }
  0xed   :  { %v17785_v7 = vpop.f32.mrb[3].mxu1  ;;  %v433_v44 = vadd.f32 %v16599_v37, %v432_v5 }
  0xef   :  { %v505_v8 = vpop.f32.mrb[4].mxu0 }
  0xf0   :  { %v17792_v9 = vpop.f32.mrb[5].mxu0  ;;  %v578_v10 = vpop.f32.mrb[4].mxu1  ;;  %v506_v54 = vadd.f32 %v16600_v45, %v505_v8 }
  0xf1   :  { %v17799_v12 = vpop.f32.mrb[5].mxu1  ;;  %v579_v56 = vadd.f32 %v16601_v49, %v578_v10 }
  0xf3   :  { %v702_v16 = vpop.f32.mrb[6].mxu0 }
  0xf4   :  { %v703_v18 = vadd.f32 %v16608_v13, %v702_v16  ;;  %v772_v19 = vpop.f32.mrb[6].mxu1  ;;  %v17806_v21 = vpop.f32.mrb[7].mxu0 }
  0xf5   :  { %v773_v24 = vadd.f32 %v16609_v15, %v772_v19  ;;  %v17813_v25 = vpop.f32.mrb[7].mxu1 }
  0xf6   :  { %17885 = vmatpush3.xpose.msk.msra.mxu0 %vm1530_vm2, %v703_v18 }
  0xf7   :  { %17890 = vmatpush3.xpose.msk.msra.mxu1 %vm1530_vm2, %v773_v24  ;;  %v842_v31 = vpop.f32.mrb[8].mxu0  ;;  %17894 = vmatprep.subr.mxu0 %v19472_v6 }
  0xf8   :  { %v843_v34 = vadd.f32 %v16610_v26, %v842_v31  ;;  %v912_v35 = vpop.f32.mrb[8].mxu1  ;;  %v17820_v36 = vpop.f32.mrb[9].mxu0  ;;  %17899 = vmatprep.subr.mxu1 %v19472_v6 }
  0xf9   :  { %v913_v38 = vadd.f32 %v16611_v27, %v912_v35  ;;  %17887 = vmatmul.mubr.msk.f32.vlgmr.msra.gmra.mrb[18].mxu0 %vm1530_vm2, %v214_v29  ;;  %v17827_v39 = vpop.f32.mrb[9].mxu1 }
  0xfa   :  { %17892 = vmatmul.mubr.msk.f32.vlgmr.msra.gmra.mrb[18].mxu1 %vm1530_vm2, %v287_v32  ;;  %17895 = vmatpush3.xpose.msk.msra.mxu0 %vm1530_vm2, %v843_v34 }
  0xfb   :  { %17900 = vmatpush3.xpose.msk.msra.mxu1 %vm1530_vm2, %v913_v38  ;;  %v982_v43 = vpop.f32.mrb[10].mxu0  ;;  %17896 = vmatprep.mubr.msk.f32.mxu0 %vm19471_vm0, %v19472_v6 }
  0xfc   :  { %v983_v46 = vadd.f32 %v16612_v40, %v982_v43  ;;  %v1052_v47 = vpop.f32.mrb[10].mxu1  ;;  %17901 = vmatprep.mubr.msk.f32.mxu1 %vm19471_vm0, %v19472_v6  ;;  %17904 = vmatprep.subr.mxu0 %v19472_v6  ;;  %v17834_v48 = vpop.f32.mrb[11].mxu0 }
  0xfd   :  { %v1053_v50 = vadd.f32 %v16613_v41, %v1052_v47  ;;  %17897 = vmatmul.mubr.msk.f32.vlgmr.msra.gmra.mrb[20].mxu0 %vm1530_vm2, %v360_v42  ;;  %17909 = vmatprep.subr.mxu1 %v19472_v6  ;;  %v17841_v51 = vpop.f32.mrb[11].mxu1 }
  0xfe   :  { %17902 = vmatmul.mubr.msk.f32.vlgmr.msra.gmra.mrb[20].mxu1 %vm1530_vm2, %v433_v44  ;;  %17905 = vmatpush3.xpose.msk.msra.mxu0 %vm1530_vm2, %v983_v46 }
  0xff   :  { %17910 = vmatpush3.xpose.msk.msra.mxu1 %vm1530_vm2, %v1053_v50  ;;  %17906 = vmatprep.mubr.msk.f32.mxu0 %vm19471_vm0, %v19472_v6  ;;  %v1176_v55 = vpop.f32.mrb[12].mxu0 }
 0x100   :  { %17911 = vmatprep.mubr.msk.f32.mxu1 %vm19471_vm0, %v19472_v6  ;;  %v1177_v57 = vadd.f32 %v16620_v52, %v1176_v55  ;;  %v17848_v58 = vpop.f32.mrb[13].mxu0  ;;  %17914 = vmatprep.subr.mxu0 %v19472_v6  ;;  %v1246_v59 = vpop.f32.mrb[12].mxu1 }
 0x101   :  { %17907 = vmatmul.mubr.msk.f32.vlgmr.msra.gmra.mrb[22].mxu0 %vm1530_vm2, %v506_v54  ;;  %v1247_v60 = vadd.f32 %v16621_v53, %v1246_v59  ;;  %v17855_v61 = vpop.f32.mrb[13].mxu1  ;;  %17919 = vmatprep.subr.mxu1 %v19472_v6 }
 0x102   :  { %17912 = vmatmul.mubr.msk.f32.vlgmr.msra.gmra.mrb[22].mxu1 %vm1530_vm2, %v579_v56  ;;  %17915 = vmatpush3.msk.msra.mxu0 %vm2064_vm3, %v1177_v57 }
 0x103   :  { %17920 = vmatpush3.msk.msra.mxu1 %vm2064_vm3, %v1247_v60  ;;  %17916 = vmatprep.mubr.msk.f32.mxu0 %vm19471_vm0, %v19472_v6 }
 0x104   :  { %17924 = vmatprep.subr.mxu0 %v19472_v6  ;;  %17921 = vmatprep.mubr.msk.f32.mxu1 %vm19471_vm0, %v19472_v6  ;;  %v19919_v62 = vpop.f32.mrb[14].mxu0 }
 0x105   :  { %17929 = vmatprep.subr.mxu1 %v19472_v6  ;;  %v17862_v63 = vpop.f32.mrb[15].mxu0  ;;  %v19921_v1 = vpop.f32.mrb[14].mxu1 }
 0x106   :  { %v17869_v2 = vpop.f32.mrb[15].mxu1 }
 0x108   :  { %v19923_v3 = vpop.f32.mrb[16].mxu0 }
 0x109   :  { %v17876_v4 = vpop.f32.mrb[17].mxu0  ;;  %v19925_v5 = vpop.f32.mrb[16].mxu1 }
 0x10a   :  { %v17883_v7 = vpop.f32.mrb[17].mxu1 }
 0x1cc   :  { %v1603_v8 = vpop.f32.mrb[18].mxu0 }
 0x1cd   :  { %v1987_v9 = vmul.f32 0.35355338, %v1603_v8  ;;  %v1679_v10 = vpop.f32.mrb[18].mxu1  ;;  %v17888_v12 = vpop.f32.mrb[19].mxu0 }
 0x1ce   :  { %v17893_v13 = vpop.f32.mrb[19].mxu1  ;;  %v1988_v15 = vmul.f32 0.35355338, %v1679_v10 }
 0x1cf   :  { %v1994_v16 = vsel %vm1993_vm4, %v1987_v9, -inf }
 0x1d0   :  { %1995 = vmax.xlane.f32.xlu0 %v1994_v16  ;;  %v1755_v17 = vpop.f32.mrb[20].mxu0  ;;  %v1997_v25 = vsel %vm1993_vm4, %v1988_v15, -inf }
 0x1d1   :  { %v1831_v18 = vpop.f32.mrb[20].mxu1  ;;  %v1989_v19 = vmul.f32 0.35355338, %v1755_v17  ;;  %v17898_v21 = vpop.f32.mrb[21].mxu0  ;;  %v16622_v17 = vld [vmem:[%s22258_s6 + $0x2] ss:$0 sm:$0xff] }
 0x1d2   :  { %v17903_v23 = vpop.f32.mrb[21].mxu1  ;;  %v1990_v24 = vmul.f32 0.35355338, %v1831_v18 }
 0x1d3   :  { %v2000_v26 = vsel %vm1993_vm4, %v1989_v19, -inf  ;;  %v1317_v23 = vadd.f32 %v16622_v17, %v19919_v62 }
 0x1d4   :  { %1998 = vmax.xlane.f32.xlu0 %v1997_v25  ;;  %2001 = vmax.xlane.f32.xlu1 %v2000_v26  ;;  %v1907_v27 = vpop.f32.mrb[22].mxu0  ;;  %v2003_v35 = vsel %vm1993_vm4, %v1990_v24, -inf  ;;  %v16624_v26 = vld [vmem:[%s22258_s6 + $0x4] ss:$0 sm:$0xff] }
 0x1d5   :  { %v1983_v29 = vpop.f32.mrb[22].mxu1  ;;  %v1991_v31 = vmul.f32 0.35355338, %v1907_v27  ;;  %v17908_v32 = vpop.f32.mrb[23].mxu0 }
 0x1d6   :  { %v17913_v33 = vpop.f32.mrb[23].mxu1  ;;  %v1992_v34 = vmul.f32 0.35355338, %v1983_v29  ;;  %v16656_v32 = vld [vmem:[%s22252_s7 + $0x60] sm:$0xff] }
 0x1d7   :  { %v2006_v36 = vsel %vm1993_vm4, %v1991_v31, -inf  ;;  %v16657_v33 = vld [vmem:[%s22252_s7 + $0x68] sm:$0xff] }
 0x1d8   :  { %2004 = vmax.xlane.f32.xlu1 %v2003_v35  ;;  %2007 = vmax.xlane.f32.xlu0 %v2006_v36  ;;  %v2009_v37 = vsel %vm1993_vm4, %v1992_v34, -inf  ;;  %v16625_v35 = vld [vmem:[%s22258_s6 + $0x5] ss:$0 sm:$0xff] }
 0x1dc   :  { %2010 = vmax.xlane.f32.xlu1 %v2009_v37 }
 0x25d   :  { %v1996_v38 = vpop.xlane.xlu0 %1995 }
 0x25e   :  { %v2012_v39 = vsub.f32 %v1987_v9, %v1996_v38  ;;  %v19011_v38 = vpack.c.bf16 %v16657_v33, %v16656_v32  ;;  %v16725_v33 = vld [vmem:[%s22255_s0 + $0xa8] sm:$0xff] }
 0x260   :  { %v2018_v40 = vmul.f32 1.442695, %v2012_v39  ;;  %v16659_v39 = vld [vmem:[%s22252_s7 + $0x78] sm:$0xff] }
 0x261   :  { %v1999_v41 = vpop.xlane.xlu0 %1998  ;;  %v2002_v42 = vpop.xlane.xlu1 %2001 }
 0x262   :  { %19304 = vpow2.f32 %v2018_v40  ;;  %v2013_v43 = vsub.f32 %v1988_v15, %v1999_v41  ;;  %v2014_v44 = vsub.f32 %v1989_v19, %v2002_v42  ;;  %v1527_v40 = vadd.f32 %v16625_v35, %v19925_v5  ;;  %v16660_v42 = vld [vmem:[%s22252_s7 + $0x80] sm:$0xff]  ;;  %v16726_v35 = vld [vmem:[%s22255_s0 + $0xb0] sm:$0xff] }
 0x264   :  { %v2020_v45 = vmul.f32 1.442695, %v2013_v43  ;;  %v2022_v46 = vmul.f32 1.442695, %v2014_v44  ;;  %v16661_v43 = vld [vmem:[%s22252_s7 + $0x88] sm:$0xff] }
 0x265   :  { %v2005_v47 = vpop.xlane.xlu1 %2004  ;;  %v2008_v48 = vpop.xlane.xlu0 %2007 }
 0x266   :  { %19306 = vpow2.f32 %v2020_v45  ;;  %v2015_v49 = vsub.f32 %v1990_v24, %v2005_v47  ;;  %v2016_v50 = vsub.f32 %v1991_v31, %v2008_v48  ;;  %v16623_v24 = vld [vmem:[%s22258_s6 + $0x3] ss:$0 sm:$0xff]  ;;  %v16662_v47 = vld [vmem:[%s22252_s7 + $0x90] sm:$0xff]  ;;  %v16663_v48 = vld [vmem:[%s22252_s7 + $0x98] sm:$0xff] }
 0x267   :  { %19308 = vpow2.f32 %v2022_v46  ;;  %v1387_v29 = vadd.f32 %v16623_v24, %v19921_v1  ;;  %v19017_v46 = vpack.c.bf16 %v16661_v43, %v16660_v42  ;;  %v16719_v24 = vld [vmem:[%s22255_s0 + $0x78] sm:$0xff] }
 0x268   :  { %v2024_v51 = vmul.f32 1.442695, %v2015_v49  ;;  %v2026_v52 = vmul.f32 1.442695, %v2016_v50  ;;  %v16664_v49 = vld [vmem:[%s22252_s7 + $0xa0] sm:$0xff]  ;;  %v16665_v50 = vld [vmem:[%s22252_s7 + $0xa8] sm:$0xff] }
 0x269   :  { %v2011_v53 = vpop.xlane.xlu1 %2010 }
 0x26a   :  { %19310 = vpow2.f32 %v2024_v51  ;;  %v2017_v54 = vsub.f32 %v1992_v34, %v2011_v53  ;;  %v1457_v34 = vadd.f32 %v16624_v26, %v19923_v3  ;;  %v16658_v3 = vld [vmem:[%s22252_s7 + $0x70] sm:$0xff]  ;;  %v19020_v51 = vpack.c.bf16 %v16663_v48, %v16662_v47 }
 0x26b   :  { %19312 = vpow2.f32 %v2026_v52  ;;  %v19014_v5 = vpack.c.bf16 %v16659_v39, %v16658_v3  ;;  %v19023_v52 = vpack.c.bf16 %v16665_v50, %v16664_v49  ;;  %v16666_v53 = vld [vmem:[%s22252_s7 + $0xb0] sm:$0xff] }
 0x26c   :  { %v19305_v55 = vpop.eup %19304  ;;  %v2028_v56 = vmul.f32 1.442695, %v2017_v54  ;;  %v16667_v54 = vld [vmem:[%s22252_s7 + $0xb8] sm:$0xff] }
 0x26d   :  { %v2030_v57 = vsel %vm1993_vm4, %v19305_v55, 0.0 }
 0x26e   :  { %19314 = vpow2.f32 %v2028_v56  ;;  %2031 = vadd.xlane.f32.xlu0 %v2030_v57  ;;  %v16687_v56 = vld [vmem:[%s22254_s30 + $0x68] sm:$0xff]  ;;  %v19026_v57 = vpack.c.bf16 %v16667_v54, %v16666_v53 }
 0x270   :  { %v19307_v58 = vpop.eup %19306 }
 0x271   :  { %v19309_v59 = vpop.eup %19308  ;;  %v2033_v60 = vsel %vm1993_vm4, %v19307_v58, 0.0 }
 0x272   :  { %2034 = vadd.xlane.f32.xlu1 %v2033_v60  ;;  %v2036_v61 = vsel %vm1993_vm4, %v19309_v59, 0.0  ;;  %v16689_v60 = vld [vmem:[%s22254_s30 + $0x78] sm:$0xff] }
 0x273   :  { %2037 = vadd.xlane.f32.xlu0 %v2036_v61  ;;  %v16690_v61 = vld [vmem:[%s22254_s30 + $0x80] sm:$0xff] }
 0x274   :  { %v19311_v63 = vpop.eup %19310 }
 0x275   :  { %v19313_v2 = vpop.eup %19312  ;;  %v2039_v4 = vsel %vm1993_vm4, %v19311_v63, 0.0 }
 0x276   :  { %2040 = vadd.xlane.f32.xlu1 %v2039_v4  ;;  %v2042_v7 = vsel %vm1993_vm4, %v19313_v2, 0.0 }
 0x277   :  { %2043 = vadd.xlane.f32.xlu0 %v2042_v7  ;;  %v16692_v7 = vld [vmem:[%s22254_s30 + $0x90] sm:$0xff] }
 0x278   :  { %v19315_v8 = vpop.eup %19314 }
 0x279   :  { %v2045_v9 = vsel %vm1993_vm4, %v19315_v8, 0.0 }
 0x27a   :  { %2046 = vadd.xlane.f32.xlu1 %v2045_v9  ;;  %v16694_v9 = vld [vmem:[%s22254_s30 + $0xa0] sm:$0xff] }
 0x2fb   :  { %v2032_v10 = vpop.xlane.xlu0 %2031 }
 0x2fc   :  { %19316 = vrcp.f32 %v2032_v10  ;;  %v16695_v10 = vld [vmem:[%s22254_s30 + $0xa8] sm:$0xff] }
 0x2ff   :  { %v2035_v12 = vpop.xlane.xlu1 %2034 }
 0x300   :  { %19318 = vrcp.f32 %v2035_v12  ;;  %v2038_v13 = vpop.xlane.xlu0 %2037 }
 0x301   :  { %19320 = vrcp.f32 %v2038_v13  ;;  %v19041_v13 = vpack.c.bf16 %v16695_v10, %v16694_v9  ;;  %v16676_v9 = vld [vmem:[%s22257_s2 + $0x8] ss:$0 sm:$0xff] }
 0x303   :  { %v2041_v15 = vpop.xlane.xlu1 %2040 }
 0x304   :  { %19322 = vrcp.f32 %v2041_v15  ;;  %v2044_v16 = vpop.xlane.xlu0 %2043  ;;  %v16696_v15 = vld [vmem:[%s22254_s30 + $0xb0] sm:$0xff] }
 0x305   :  { %19324 = vrcp.f32 %v2044_v16  ;;  %v16697_v16 = vld [vmem:[%s22254_s30 + $0xb8] sm:$0xff] }
 0x306   :  { %v19317_v18 = vpop.eup %19316  ;;  %v19044_v17 = vpack.c.bf16 %v16697_v16, %v16696_v15  ;;  %v16708_v15 = vld [vmem:[%s22256_s8 + $0xa] ss:$0 sm:$0xff] }
 0x307   :  { %v2047_v19 = vpop.xlane.xlu1 %2046  ;;  %v2054_v21 = vmul.f32 %v19317_v18, %v19305_v55  ;;  %v16686_v55 = vld [vmem:[%s22254_s30 + $0x60] sm:$0xff] }
 0x308   :  { %19326 = vrcp.f32 %v2047_v19  ;;  %v16716_v18 = vld [vmem:[%s22255_s0 + $0x60] sm:$0xff]  ;;  %v16717_v19 = vld [vmem:[%s22255_s0 + $0x68] sm:$0xff] }
 0x309   :  { %17917 = vmatmul.mubr.msk.f32.vlgmr.msra.gmra.mrb[24].mxu0 %vm2060_vm5, %v2054_v21  ;;  %v19047_v21 = vpack.c.bf16 %v16717_v19, %v16716_v18  ;;  %v16677_v19 = vld [vmem:[%s22257_s2 + $0x9] ss:$0 sm:$0xff] }
 0x30a   :  { %v19319_v25 = vpop.eup %19318  ;;  %17925 = vmatpush3.msk.msra.mxu0 %vm2064_vm3, %v1317_v23  ;;  %17926 = vmatprep.mubr.msk.f32.mxu0 %vm19471_vm0, %v19472_v6  ;;  %v16718_v23 = vld [vmem:[%s22255_s0 + $0x70] sm:$0xff] }
 0x30b   :  { %v19321_v27 = vpop.eup %19320  ;;  %17934 = vmatprep.subr.mxu0 %v19472_v6  ;;  %v2055_v62 = vmul.f32 %v19319_v25, %v19307_v58  ;;  %v19029_v58 = vpack.c.bf16 %v16687_v56, %v16686_v55  ;;  %v16720_v25 = vld [vmem:[%s22255_s0 + $0x80] sm:$0xff]  ;;  %v19050_v26 = vpack.c.bf16 %v16719_v24, %v16718_v23 }
 0x30c   :  { %v2056_v31 = vmul.f32 %v19321_v27, %v19309_v59  ;;  %v16688_v59 = vld [vmem:[%s22254_s30 + $0x70] sm:$0xff]  ;;  %v16721_v27 = vld [vmem:[%s22255_s0 + $0x88] sm:$0xff]  ;;  %v16674_v56 = vld [vmem:[%s22257_s2 + $0x6] ss:$0 sm:$0xff] }
 0x30d   :  { %17922 = vmatmul.mubr.msk.f32.vlgmr.msra.gmra.mrb[24].mxu1 %vm2060_vm5, %v2055_v62  ;;  %v19053_v62 = vpack.c.bf16 %v16721_v27, %v16720_v25  ;;  %v16678_v25 = vld [vmem:[%s22257_s2 + $0xa] ss:$0 sm:$0xff] }
 0x30e   :  { %v19323_v36 = vpop.eup %19322  ;;  %17927 = vmatmul.mubr.msk.f32.vlgmr.msra.gmra.mrb[26].mxu0 %vm2060_vm5, %v2056_v31  ;;  %17930 = vmatpush3.msk.msra.mxu1 %vm2064_vm3, %v1387_v29  ;;  %v16722_v29 = vld [vmem:[%s22255_s0 + $0x90] sm:$0xff]  ;;  %v16723_v31 = vld [vmem:[%s22255_s0 + $0x98] sm:$0xff] }
 0x30f   :  { %v19325_v1 = vpop.eup %19324  ;;  %17935 = vmatpush3.msk.msra.mxu0 %vm2064_vm3, %v1457_v34  ;;  %17931 = vmatprep.mubr.msk.f32.mxu1 %vm19471_vm0, %v19472_v6  ;;  %v2057_v37 = vmul.f32 %v19323_v36, %v19311_v63  ;;  %v16691_v63 = vld [vmem:[%s22254_s30 + $0x88] sm:$0xff]  ;;  %v19056_v32 = vpack.c.bf16 %v16723_v31, %v16722_v29  ;;  %v16727_v36 = vld [vmem:[%s22255_s0 + $0xb8] sm:$0xff] }
 0x310   :  { %17936 = vmatprep.mubr.msk.f32.mxu0 %vm19471_vm0, %v19472_v6  ;;  %17939 = vmatprep.subr.mxu1 %v19472_v6  ;;  %v2058_v41 = vmul.f32 %v19325_v1, %v19313_v2  ;;  %v19032_v2 = vpack.c.bf16 %v16689_v60, %v16688_v59  ;;  %v19035_v4 = vpack.c.bf16 %v16691_v63, %v16690_v61  ;;  %v16705_v59 = vld [vmem:[%s22256_s8 + $0x7] ss:$0 sm:$0xff]  ;;  %v16706_v60 = vld [vmem:[%s22256_s8 + $0x8] ss:$0 sm:$0xff] }
 0x311   :  { %17932 = vmatmul.mubr.msk.f32.vlgmr.msra.gmra.mrb[26].mxu1 %vm2060_vm5, %v2057_v37  ;;  %19010 = vmatprep.subr.bf16.mxu0 %v19470_v0 }
 0x312   :  { %v19327_v44 = vpop.eup %19326  ;;  %17937 = vmatmul.mubr.msk.f32.vlgmr.msra.gmra.mrb[28].mxu0 %vm2060_vm5, %v2058_v41  ;;  %17940 = vmatpush3.msk.msra.mxu1 %vm2064_vm3, %v1527_v40 }
 0x313   :  { %19012 = vmatpush3.bf16.msra.mxu0 %v19011_v38  ;;  %17941 = vmatprep.mubr.msk.f32.mxu1 %vm19471_vm0, %v19472_v6  ;;  %v2059_v45 = vmul.f32 %v19327_v44, %v19315_v8  ;;  %v16693_v8 = vld [vmem:[%s22254_s30 + $0x98] sm:$0xff] }
 0x314   :  { %17948 = vmatprep.mubr.msk.f32.mxu0 %vm19471_vm0, %v19472_v6  ;;  %19013 = vmatprep.subr.bf16.mxu1 %v19470_v0  ;;  %v19038_v12 = vpack.c.bf16 %v16693_v8, %v16692_v7 }
 0x315   :  { %17942 = vmatmul.mubr.msk.f32.vlgmr.msra.gmra.mrb[28].mxu1 %vm2060_vm5, %v2059_v45  ;;  %19016 = vmatprep.subr.bf16.mxu0 %v19470_v0 }
 0x316   :  { %17949 = vmatmul.mubr.msk.f32.vlgmr.msra.gmra.mrb[30].mxu0 %vm143_vm1, %v19639_v11  ;;  %19015 = vmatpush3.bf16.msra.mxu1 %v19014_v5 }
 0x317   :  { %19018 = vmatpush3.bf16.msra.mxu0 %v19017_v46  ;;  %17955 = vmatprep.mubr.msk.f32.mxu1 %vm19471_vm0, %v19472_v6 }
 0x318   :  { %17962 = vmatprep.mubr.msk.f32.mxu0 %vm19471_vm0, %v19472_v6  ;;  %19019 = vmatprep.subr.bf16.mxu1 %v19470_v0 }
 0x319   :  { %17956 = vmatmul.mubr.msk.f32.vlgmr.msra.gmra.mrb[30].mxu1 %vm143_vm1, %v19647_v14  ;;  %19022 = vmatprep.subr.bf16.mxu0 %v19470_v0 }
 0x31a   :  { %17963 = vmatmul.mubr.msk.f32.vlgmr.msra.gmra.mrb[32].mxu0 %vm143_vm1, %v19670_v20  ;;  %19021 = vmatpush3.bf16.msra.mxu1 %v19020_v51 }
 0x31b   :  { %19024 = vmatpush3.bf16.msra.mxu0 %v19023_v52  ;;  %17969 = vmatprep.mubr.msk.f32.mxu1 %vm19471_vm0, %v19472_v6  ;;  %v16704_v52 = vld [vmem:[%s22256_s8 + $0x6] ss:$0 sm:$0xff] }
 0x31c   :  { %17976 = vmatprep.mubr.msk.f32.mxu0 %vm19471_vm0, %v19472_v6  ;;  %19025 = vmatprep.subr.bf16.mxu1 %v19470_v0 }
 0x31d   :  { %17970 = vmatmul.mubr.msk.f32.vlgmr.msra.gmra.mrb[32].mxu1 %vm143_vm1, %v19677_v22  ;;  %19028 = vmatprep.subr.bf16.mxu0 %v19470_v0 }
 0x31e   :  { %17977 = vmatmul.mubr.msk.f32.vlgmr.msra.gmra.mrb[34].mxu0 %vm143_vm1, %v19702_v28  ;;  %19027 = vmatpush3.bf16.msra.mxu1 %v19026_v57 }
 0x31f   :  { %19030 = vmatpush3.bf16.msra.mxu0 %v19029_v58  ;;  %17983 = vmatprep.mubr.msk.f32.mxu1 %vm19471_vm0, %v19472_v6 }
 0x320   :  { %17990 = vmatprep.mubr.msk.f32.mxu0 %vm19471_vm0, %v19472_v6  ;;  %19031 = vmatprep.subr.bf16.mxu1 %v19470_v0 }
 0x321   :  { %17984 = vmatmul.mubr.msk.f32.vlgmr.msra.gmra.mrb[34].mxu1 %vm143_vm1, %v19709_v30  ;;  %19034 = vmatprep.subr.bf16.mxu0 %v19470_v0 }
 0x322   :  { %17991 = vmatmul.mubr.msk.f32.vlgmr.msra.gmra.mrb[36].mxu0 %vm143_vm1, %v19639_v11  ;;  %19033 = vmatpush3.bf16.msra.mxu1 %v19032_v2  ;;  %v16675_v2 = vld [vmem:[%s22257_s2 + $0x7] ss:$0 sm:$0xff] }
 0x323   :  { %19036 = vmatpush3.bf16.msra.mxu0 %v19035_v4  ;;  %17997 = vmatprep.mubr.msk.f32.mxu1 %vm19471_vm0, %v19472_v6 }
 0x324   :  { %18004 = vmatprep.mubr.msk.f32.mxu0 %vm19471_vm0, %v19472_v6  ;;  %19037 = vmatprep.subr.bf16.mxu1 %v19470_v0 }
 0x325   :  { %17998 = vmatmul.mubr.msk.f32.vlgmr.msra.gmra.mrb[36].mxu1 %vm143_vm1, %v19647_v14  ;;  %19040 = vmatprep.subr.bf16.mxu0 %v19470_v0 }
 0x326   :  { %18005 = vmatmul.mubr.msk.f32.vlgmr.msra.gmra.mrb[38].mxu0 %vm143_vm1, %v19670_v20  ;;  %19039 = vmatpush3.bf16.msra.mxu1 %v19038_v12 }
 0x327   :  { %19042 = vmatpush3.bf16.msra.mxu0 %v19041_v13  ;;  %18011 = vmatprep.mubr.msk.f32.mxu1 %vm19471_vm0, %v19472_v6  ;;  %v16707_v13 = vld [vmem:[%s22256_s8 + $0x9] ss:$0 sm:$0xff] }
 0x328   :  { %18018 = vmatprep.mubr.msk.f32.mxu0 %vm19471_vm0, %v19472_v6  ;;  %19043 = vmatprep.subr.bf16.mxu1 %v19470_v0 }
 0x329   :  { %18012 = vmatmul.mubr.msk.f32.vlgmr.msra.gmra.mrb[38].mxu1 %vm143_vm1, %v19677_v22  ;;  %19046 = vmatprep.subr.bf16.mxu0 %v19470_v0 }
 0x32a   :  { %18019 = vmatmul.mubr.msk.f32.vlgmr.msra.gmra.mrb[40].mxu0 %vm143_vm1, %v19702_v28  ;;  %19045 = vmatpush3.bf16.msra.mxu1 %v19044_v17 }
 0x32b   :  { %18025 = vmatprep.mubr.msk.f32.mxu1 %vm19471_vm0, %v19472_v6  ;;  %18032 = vmatprep.mubr.msk.f32.mxu0 %vm19471_vm0, %v19472_v6 }
 0x32c   :  { %19049 = vmatprep.subr.bf16.mxu1 %v19470_v0  ;;  %19048 = vmatpush3.bf16.msra.mxu0 %v19047_v21 }
 0x32d   :  { %18026 = vmatmul.mubr.msk.f32.vlgmr.msra.gmra.mrb[40].mxu1 %vm143_vm1, %v19709_v30  ;;  %19052 = vmatprep.subr.bf16.mxu0 %v19470_v0 }
 0x32e   :  { %18039 = vmatprep.mubr.msk.f32.mxu1 %vm19471_vm0, %v19472_v6  ;;  %19051 = vmatpush3.bf16.msra.mxu1 %v19050_v26 }
 0x32f   :  { %18033 = vmatmul.mubr.msk.f32.vlgmr.msra.gmra.mrb[42].mxu0 %vm143_vm1, %v19639_v11  ;;  %19055 = vmatprep.subr.bf16.mxu1 %v19470_v0  ;;  %v16724_v11 = vld [vmem:[%s22255_s0 + $0xa0] sm:$0xff] }
 0x330   :  { %18046 = vmatprep.mubr.msk.f32.mxu0 %vm19471_vm0, %v19472_v6  ;;  %19054 = vmatpush3.bf16.msra.mxu0 %v19053_v62  ;;  %v19059_v34 = vpack.c.bf16 %v16725_v33, %v16724_v11  ;;  %v16709_v62 = vld [vmem:[%s22256_s8 + $0xb] ss:$0 sm:$0xff] }
 0x331   :  { %19058 = vmatprep.subr.bf16.mxu0 %v19470_v0  ;;  %18040 = vmatmul.mubr.msk.f32.vlgmr.msra.gmra.mrb[42].mxu1 %vm143_vm1, %v19647_v14  ;;  %v19062_v14 = vpack.c.bf16 %v16727_v36, %v16726_v35  ;;  %v16734_v36 = vld [vmem:[%s22258_s6 + $0x6] ss:$0 sm:$0xff] }
 0x332   :  { %19057 = vmatpush3.bf16.msra.mxu1 %v19056_v32  ;;  %18053 = vmatprep.mubr.msk.f32.mxu1 %vm19471_vm0, %v19472_v6  ;;  %v16679_v32 = vld [vmem:[%s22257_s2 + $0xb] ss:$0 sm:$0xff] }
 0x333   :  { %18047 = vmatmul.mubr.msk.f32.vlgmr.msra.gmra.mrb[44].mxu0 %vm143_vm1, %v19670_v20  ;;  %19061 = vmatprep.subr.bf16.mxu1 %v19470_v0 }
 0x334   :  { %19060 = vmatpush3.bf16.msra.mxu0 %v19059_v34  ;;  %18060 = vmatprep.mubr.msk.f32.mxu0 %vm19471_vm0, %v19472_v6 }
 0x335   :  { %18054 = vmatmul.mubr.msk.f32.vlgmr.msra.gmra.mrb[44].mxu1 %vm143_vm1, %v19677_v22  ;;  %18070 = vmatprep.subr.mxu0 %v19472_v6 }
 0x336   :  { %19063 = vmatpush3.bf16.msra.mxu1 %v19062_v14  ;;  %18067 = vmatprep.mubr.msk.f32.mxu1 %vm19471_vm0, %v19472_v6 }
 0x337   :  { %18061 = vmatmul.mubr.msk.f32.vlgmr.msra.gmra.mrb[46].mxu0 %vm143_vm1, %v19702_v28  ;;  %18075 = vmatprep.subr.mxu1 %v19472_v6 }
 0x338   :  { %18072 = vmatprep.mubr.msk.f32.mxu0 %vm19471_vm0, %v19472_v6 }
 0x339   :  { %18068 = vmatmul.mubr.msk.f32.vlgmr.msra.gmra.mrb[46].mxu1 %vm143_vm1, %v19709_v30 }
 0x33a   :  { %18077 = vmatprep.mubr.msk.f32.mxu1 %vm19471_vm0, %v19472_v6 }
 0x3dc   :  { %v20179_v20 = vpop.f32.mrb[24].mxu0 }
 0x3dd   :  { %v17918_v22 = vpop.f32.mrb[25].mxu0 }
 0x3e0   :  { %v20181_v1 = vpop.f32.mrb[24].mxu1 }
 0x3e1   :  { %v20183_v28 = vpop.f32.mrb[26].mxu0  ;;  %v17923_v37 = vpop.f32.mrb[25].mxu1 }
 0x3e2   :  { %v17928_v38 = vpop.f32.mrb[27].mxu0 }
 0x3e3   :  { %v16735_v38 = vld [vmem:[%s22258_s6 + $0x7] ss:$0 sm:$0xff] }
 0x3e4   :  { %v20185_v3 = vpop.f32.mrb[26].mxu1 }
 0x3e5   :  { %v20187_v39 = vpop.f32.mrb[28].mxu0  ;;  %v17933_v40 = vpop.f32.mrb[27].mxu1 }
 0x3e6   :  { %v17938_v41 = vpop.f32.mrb[29].mxu0 }
 0x3e8   :  { %v20189_v42 = vpop.f32.mrb[28].mxu1 }
 0x3e9   :  { %v17943_v30 = vpop.f32.mrb[29].mxu1  ;;  %v2646_v43 = vpop.f32.mrb[30].mxu0 }
 0x3ea   :  { %v17950_v44 = vpop.f32.mrb[31].mxu0  ;;  %v2647_v63 = vadd.f32 %v16674_v56, %v2646_v43 }
 0x3ec   :  { %v2716_v5 = vpop.f32.mrb[30].mxu1 }
 0x3ed   :  { %v17957_v45 = vpop.f32.mrb[31].mxu1  ;;  %v2786_v46 = vpop.f32.mrb[32].mxu0  ;;  %v2717_v16 = vadd.f32 %v16675_v2, %v2716_v5 }
 0x3ee   :  { %v17964_v47 = vpop.f32.mrb[33].mxu0  ;;  %v2787_v18 = vadd.f32 %v16676_v9, %v2786_v46 }
 0x3f0   :  { %v2856_v48 = vpop.f32.mrb[32].mxu1 }
 0x3f1   :  { %v17971_v49 = vpop.f32.mrb[33].mxu1  ;;  %v2926_v50 = vpop.f32.mrb[34].mxu0  ;;  %v2857_v29 = vadd.f32 %v16677_v19, %v2856_v48 }
 0x3f2   :  { %v17978_v51 = vpop.f32.mrb[35].mxu0  ;;  %v2927_v11 = vadd.f32 %v16678_v25, %v2926_v50 }
 0x3f4   :  { %v2996_v53 = vpop.f32.mrb[34].mxu1 }
 0x3f5   :  { %v3122_v54 = vpop.f32.mrb[36].mxu0  ;;  %v17985_v55 = vpop.f32.mrb[35].mxu1  ;;  %v2997_v35 = vadd.f32 %v16679_v32, %v2996_v53 }
 0x3f6   :  { %v3123_v57 = vadd.f32 %v16704_v52, %v3122_v54  ;;  %v17992_v58 = vpop.f32.mrb[37].mxu0 }
 0x3f8   :  { %18071 = vmatpush3.xpose.msk.msra.mxu0 %vm1530_vm2, %v3123_v57  ;;  %v3192_v61 = vpop.f32.mrb[36].mxu1 }
 0x3f9   :  { %v3193_v4 = vadd.f32 %v16705_v59, %v3192_v61  ;;  %v3262_v7 = vpop.f32.mrb[38].mxu0  ;;  %v17999_v8 = vpop.f32.mrb[37].mxu1  ;;  %18080 = vmatprep.subr.mxu0 %v19472_v6 }
 0x3fa   :  { %v3263_v10 = vadd.f32 %v16706_v60, %v3262_v7  ;;  %v18006_v12 = vpop.f32.mrb[39].mxu0 }
 0x3fb   :  { %18073 = vmatmul.mubr.msk.f32.vlgmr.msra.gmra.mrb[48].mxu0 %vm1530_vm2, %v2647_v63  ;;  %18076 = vmatpush3.xpose.msk.msra.mxu1 %vm1530_vm2, %v3193_v4 }
 0x3fc   :  { %18081 = vmatpush3.xpose.msk.msra.mxu0 %vm1530_vm2, %v3263_v10  ;;  %v3332_v17 = vpop.f32.mrb[38].mxu1  ;;  %18082 = vmatprep.mubr.msk.f32.mxu0 %vm19471_vm0, %v19472_v6 }
 0x3fd   :  { %v3333_v21 = vadd.f32 %v16707_v13, %v3332_v17  ;;  %v3402_v23 = vpop.f32.mrb[40].mxu0  ;;  %v18013_v24 = vpop.f32.mrb[39].mxu1  ;;  %18085 = vmatprep.subr.mxu1 %v19472_v6  ;;  %18090 = vmatprep.subr.mxu0 %v19472_v6 }
 0x3fe   :  { %v3403_v26 = vadd.f32 %v16708_v15, %v3402_v23  ;;  %18078 = vmatmul.mubr.msk.f32.vlgmr.msra.gmra.mrb[48].mxu1 %vm1530_vm2, %v2717_v16  ;;  %v18020_v27 = vpop.f32.mrb[41].mxu0 }
 0x3ff   :  { %18083 = vmatmul.mubr.msk.f32.vlgmr.msra.gmra.mrb[50].mxu0 %vm1530_vm2, %v2787_v18  ;;  %18086 = vmatpush3.xpose.msk.msra.mxu1 %vm1530_vm2, %v3333_v21 }
 0x400   :  { %18091 = vmatpush3.xpose.msk.msra.mxu0 %vm1530_vm2, %v3403_v26  ;;  %v3472_v31 = vpop.f32.mrb[40].mxu1  ;;  %18087 = vmatprep.mubr.msk.f32.mxu1 %vm19471_vm0, %v19472_v6 }
 0x401   :  { %v3473_v33 = vadd.f32 %v16709_v62, %v3472_v31  ;;  %v18027_v34 = vpop.f32.mrb[41].mxu1  ;;  %18092 = vmatprep.mubr.msk.f32.mxu0 %vm19471_vm0, %v19472_v6  ;;  %18095 = vmatprep.subr.mxu1 %v19472_v6 }
 0x402   :  { %18088 = vmatmul.mubr.msk.f32.vlgmr.msra.gmra.mrb[50].mxu1 %vm1530_vm2, %v2857_v29  ;;  %18100 = vmatprep.subr.mxu0 %v19472_v6  ;;  %v3598_v14 = vpop.f32.mrb[42].mxu0 }
 0x403   :  { %18093 = vmatmul.mubr.msk.f32.vlgmr.msra.gmra.mrb[52].mxu0 %vm1530_vm2, %v2927_v11  ;;  %18096 = vmatpush3.xpose.msk.msra.mxu1 %vm1530_vm2, %v3473_v33  ;;  %v3599_v22 = vadd.f32 %v16734_v36, %v3598_v14  ;;  %v18034_v37 = vpop.f32.mrb[43].mxu0 }
 0x404   :  { %18097 = vmatprep.mubr.msk.f32.mxu1 %vm19471_vm0, %v19472_v6  ;;  %18105 = vmatprep.subr.mxu1 %v19472_v6  ;;  %v3668_v40 = vpop.f32.mrb[42].mxu1 }
 0x405   :  { %18102 = vmatprep.mubr.msk.f32.mxu0 %vm19471_vm0, %v19472_v6  ;;  %18101 = vmatpush3.msk.msra.mxu0 %vm2064_vm3, %v3599_v22  ;;  %v3669_v41 = vadd.f32 %v16735_v38, %v3668_v40  ;;  %v18041_v30 = vpop.f32.mrb[43].mxu1 }
 0x406   :  { %18098 = vmatmul.mubr.msk.f32.vlgmr.msra.gmra.mrb[52].mxu1 %vm1530_vm2, %v2997_v35  ;;  %18110 = vmatprep.subr.mxu0 %v19472_v6  ;;  %v20265_v43 = vpop.f32.mrb[44].mxu0 }
 0x407   :  { %18107 = vmatprep.mubr.msk.f32.mxu1 %vm19471_vm0, %v19472_v6  ;;  %v18048_v44 = vpop.f32.mrb[45].mxu0  ;;  %18106 = vmatpush3.msk.msra.mxu1 %vm2064_vm3, %v3669_v41 }
 0x408   :  { %v20268_v5 = vpop.f32.mrb[44].mxu1  ;;  %18115 = vmatprep.subr.mxu1 %v19472_v6 }
 0x409   :  { %v18055_v45 = vpop.f32.mrb[45].mxu1 }
 0x40a   :  { %v20271_v46 = vpop.f32.mrb[46].mxu0 }
 0x40b   :  { %v18062_v47 = vpop.f32.mrb[47].mxu0 }
 0x40c   :  { %v20273_v48 = vpop.f32.mrb[46].mxu1 }
 0x40d   :  { %v18069_v49 = vpop.f32.mrb[47].mxu1 }
 0x4ce   :  { %v4024_v50 = vpop.f32.mrb[48].mxu0 }
 0x4cf   :  { %v4408_v51 = vmul.f32 0.35355338, %v4024_v50  ;;  %v18074_v52 = vpop.f32.mrb[49].mxu0 }
 0x4d1   :  { %v4100_v53 = vpop.f32.mrb[48].mxu1  ;;  %v4414_v54 = vsel %vm1993_vm4, %v4408_v51, -inf }
 0x4d2   :  { %v4409_v55 = vmul.f32 0.35355338, %v4100_v53  ;;  %4415 = vmax.xlane.f32.xlu0 %v4414_v54  ;;  %v4176_v56 = vpop.f32.mrb[50].mxu0  ;;  %v18079_v57 = vpop.f32.mrb[49].mxu1 }
 0x4d3   :  { %v4410_v58 = vmul.f32 0.35355338, %v4176_v56  ;;  %v18084_v59 = vpop.f32.mrb[51].mxu0  ;;  %v16736_v57 = vld [vmem:[%s22258_s6 + $0x8] ss:$0 sm:$0xff] }
 0x4d4   :  { %v4417_v60 = vsel %vm1993_vm4, %v4409_v55, -inf }
 0x4d5   :  { %4418 = vmax.xlane.f32.xlu1 %v4417_v60  ;;  %v4252_v61 = vpop.f32.mrb[50].mxu1  ;;  %v4420_v63 = vsel %vm1993_vm4, %v4410_v58, -inf }
 0x4d6   :  { %v4411_v2 = vmul.f32 0.35355338, %v4252_v61  ;;  %4421 = vmax.xlane.f32.xlu0 %v4420_v63  ;;  %v4328_v4 = vpop.f32.mrb[52].mxu0  ;;  %v18089_v7 = vpop.f32.mrb[51].mxu1  ;;  %v3739_v61 = vadd.f32 %v16736_v57, %v20265_v43  ;;  %v16737_v63 = vld [vmem:[%s22258_s6 + $0x9] ss:$0 sm:$0xff] }
 0x4d7   :  { %v4412_v8 = vmul.f32 0.35355338, %v4328_v4  ;;  %v18094_v9 = vpop.f32.mrb[53].mxu0  ;;  %v16738_v4 = vld [vmem:[%s22258_s6 + $0xa] ss:$0 sm:$0xff]  ;;  %v3809_v43 = vadd.f32 %v16737_v63, %v20268_v5 }
 0x4d8   :  { %v4423_v10 = vsel %vm1993_vm4, %v4411_v2, -inf }
 0x4d9   :  { %4424 = vmax.xlane.f32.xlu1 %v4423_v10  ;;  %v4404_v12 = vpop.f32.mrb[52].mxu1  ;;  %v4426_v13 = vsel %vm1993_vm4, %v4412_v8, -inf  ;;  %v3879_v10 = vadd.f32 %v16738_v4, %v20271_v46 }
 0x4da   :  { %v4413_v15 = vmul.f32 0.35355338, %v4404_v12  ;;  %4427 = vmax.xlane.f32.xlu0 %v4426_v13  ;;  %v18099_v16 = vpop.f32.mrb[53].mxu1  ;;  %v16739_v12 = vld [vmem:[%s22258_s6 + $0xb] ss:$0 sm:$0xff] }
 0x4db   :  { %v3949_v5 = vadd.f32 %v16739_v12, %v20273_v48  ;;  %v16770_v48 = vld [vmem:[%s22259_s1 + $0x30] sm:$0xff]  ;;  %v16791_v12 = vld [vmem:[%s22260_s5 + $0x3] ss:$0 sm:$0xff] }
 0x4dc   :  { %v4429_v17 = vsel %vm1993_vm4, %v4413_v15, -inf }
 0x4dd   :  { %4430 = vmax.xlane.f32.xlu1 %v4429_v17 }
 0x55f   :  { %v4416_v18 = vpop.xlane.xlu0 %4415 }
 0x560   :  { %v4432_v19 = vsub.f32 %v4408_v51, %v4416_v18 }
 0x562   :  { %v4438_v21 = vmul.f32 1.442695, %v4432_v19  ;;  %v4419_v23 = vpop.xlane.xlu1 %4418  ;;  %v16771_v19 = vld [vmem:[%s22259_s1 + $0x38] sm:$0xff] }
 0x563   :  { %v4433_v24 = vsub.f32 %v4409_v55, %v4419_v23  ;;  %v4422_v25 = vpop.xlane.xlu0 %4421 }
 0x564   :  { %19328 = vpow2.f32 %v4438_v21  ;;  %v4434_v26 = vsub.f32 %v4410_v58, %v4422_v25  ;;  %v16772_v21 = vld [vmem:[%s22259_s1 + $0x40] sm:$0xff]  ;;  %v16773_v25 = vld [vmem:[%s22259_s1 + $0x48] sm:$0xff] }
 0x565   :  { %v4440_v27 = vmul.f32 1.442695, %v4433_v24 }
 0x566   :  { %v4442_v62 = vmul.f32 1.442695, %v4434_v26  ;;  %v4425_v29 = vpop.xlane.xlu1 %4424 }
 0x567   :  { %19330 = vpow2.f32 %v4440_v27  ;;  %v4435_v31 = vsub.f32 %v4411_v2, %v4425_v29  ;;  %v4428_v11 = vpop.xlane.xlu0 %4427  ;;  %v16774_v27 = vld [vmem:[%s22259_s1 + $0x50] sm:$0xff] }
 0x568   :  { %19332 = vpow2.f32 %v4442_v62  ;;  %v4436_v32 = vsub.f32 %v4412_v8, %v4428_v11  ;;  %v16775_v11 = vld [vmem:[%s22259_s1 + $0x58] sm:$0xff] }
 0x569   :  { %v4444_v33 = vmul.f32 1.442695, %v4435_v31 }
 0x56a   :  { %v4446_v34 = vmul.f32 1.442695, %v4436_v32  ;;  %v4431_v35 = vpop.xlane.xlu1 %4430 }
 0x56b   :  { %19334 = vpow2.f32 %v4444_v33  ;;  %v4437_v36 = vsub.f32 %v4413_v15, %v4431_v35  ;;  %v2518_v33 = vld [vmem:[%s22259_s1] sm:$0xff] }
 0x56c   :  { %19336 = vpow2.f32 %v4446_v34 }
 0x56d   :  { %v4448_v14 = vmul.f32 1.442695, %v4437_v36 }
 0x56e   :  { %v19329_v22 = vpop.eup %19328 }
 0x56f   :  { %19338 = vpow2.f32 %v4448_v14  ;;  %v4450_v37 = vsel %vm1993_vm4, %v19329_v22, 0.0  ;;  %v2519_v14 = vld [vmem:[%s22259_s1 + $0x8] sm:$0xff] }
 0x570   :  { %4451 = vadd.xlane.f32.xlu0 %v4450_v37  ;;  %v2520_v37 = vld [vmem:[%s22259_s1 + $0x10] sm:$0xff] }
 0x571   :  { %v19331_v38 = vpop.eup %19330 }
 0x572   :  { %v19333_v40 = vpop.eup %19332  ;;  %v4453_v41 = vsel %vm1993_vm4, %v19331_v38, 0.0 }
 0x573   :  { %4454 = vadd.xlane.f32.xlu1 %v4453_v41  ;;  %v4456_v30 = vsel %vm1993_vm4, %v19333_v40, 0.0  ;;  %v2522_v41 = vld [vmem:[%s22259_s1 + $0x20] sm:$0xff] }
 0x574   :  { %4457 = vadd.xlane.f32.xlu0 %v4456_v30 }
 0x575   :  { %v19335_v44 = vpop.eup %19334 }
 0x576   :  { %v19337_v45 = vpop.eup %19336  ;;  %v4459_v47 = vsel %vm1993_vm4, %v19335_v44, 0.0 }
 0x577   :  { %4460 = vadd.xlane.f32.xlu1 %v4459_v47  ;;  %v4462_v49 = vsel %vm1993_vm4, %v19337_v45, 0.0 }
 0x578   :  { %4463 = vadd.xlane.f32.xlu0 %v4462_v49 }
 0x579   :  { %v19339_v50 = vpop.eup %19338 }
 0x57a   :  { %v4465_v51 = vsel %vm1993_vm4, %v19339_v50, 0.0 }
 0x57b   :  { %4466 = vadd.xlane.f32.xlu1 %v4465_v51 }
 0x5fd   :  { %v4452_v52 = vpop.xlane.xlu0 %4451 }
 0x5fe   :  { %19340 = vrcp.f32 %v4452_v52 }
 0x600   :  { %v4455_v53 = vpop.xlane.xlu1 %4454 }
 0x601   :  { %19342 = vrcp.f32 %v4455_v53  ;;  %v4458_v54 = vpop.xlane.xlu0 %4457  ;;  %v16788_v53 = vld [vmem:[%s22260_s5] ss:$0 sm:$0xff] }
 0x602   :  { %19344 = vrcp.f32 %v4458_v54 }
 0x604   :  { %v4461_v55 = vpop.xlane.xlu1 %4460 }
 0x605   :  { %19346 = vrcp.f32 %v4461_v55  ;;  %v4464_v56 = vpop.xlane.xlu0 %4463 }
 0x606   :  { %19348 = vrcp.f32 %v4464_v56 }
 0x608   :  { %v19341_v58 = vpop.eup %19340  ;;  %v4467_v59 = vpop.xlane.xlu1 %4466 }
 0x609   :  { %v4474_v60 = vmul.f32 %v19341_v58, %v19329_v22  ;;  %19350 = vrcp.f32 %v4467_v59  ;;  %v16789_v58 = vld [vmem:[%s22260_s5 + $0x1] ss:$0 sm:$0xff] }
 0x60b   :  { %v19343_v2 = vpop.eup %19342  ;;  %18103 = vmatmul.mubr.msk.f32.vlgmr.msra.gmra.mrb[54].mxu0 %vm2060_vm5, %v4474_v60 }
 0x60c   :  { %v19345_v7 = vpop.eup %19344  ;;  %v4475_v8 = vmul.f32 %v19343_v2, %v19331_v38  ;;  %18111 = vmatpush3.msk.msra.mxu0 %vm2064_vm3, %v3739_v61  ;;  %18112 = vmatprep.mubr.msk.f32.mxu0 %vm19471_vm0, %v19472_v6  ;;  %v16790_v61 = vld [vmem:[%s22260_s5 + $0x2] ss:$0 sm:$0xff] }
 0x60d   :  { %v4476_v9 = vmul.f32 %v19345_v7, %v19333_v40  ;;  %18120 = vmatprep.subr.mxu0 %v19472_v6  ;;  %v2521_v40 = vld [vmem:[%s22259_s1 + $0x18] sm:$0xff]  ;;  %v19464_v7 = vld [vmem:[%s22253_s28] sm:$0xf] }
 0x60e   :  { %18108 = vmatmul.mubr.msk.f32.vlgmr.msra.gmra.mrb[54].mxu1 %vm2060_vm5, %v4475_v8 }
 0x60f   :  { %v19347_v13 = vpop.eup %19346  ;;  %18113 = vmatmul.mubr.msk.f32.vlgmr.msra.gmra.mrb[56].mxu0 %vm2060_vm5, %v4476_v9  ;;  %18116 = vmatpush3.msk.msra.mxu1 %vm2064_vm3, %v3809_v43 }
 0x610   :  { %v19349_v15 = vpop.eup %19348  ;;  %v4477_v16 = vmul.f32 %v19347_v13, %v19335_v44  ;;  %18121 = vmatpush3.msk.msra.mxu0 %vm2064_vm3, %v3879_v10  ;;  %18117 = vmatprep.mubr.msk.f32.mxu1 %vm19471_vm0, %v19472_v6 }
 0x611   :  { %v4478_v46 = vmul.f32 %v19349_v15, %v19337_v45  ;;  %18122 = vmatprep.mubr.msk.f32.mxu0 %vm19471_vm0, %v19472_v6  ;;  %18125 = vmatprep.subr.mxu1 %v19472_v6 }
 0x612   :  { %18118 = vmatmul.mubr.msk.f32.vlgmr.msra.gmra.mrb[56].mxu1 %vm2060_vm5, %v4477_v16  ;;  %18130 = vmatprep.subr.mxu0 %v19472_v6 }
 0x613   :  { %v19351_v17 = vpop.eup %19350  ;;  %18123 = vmatmul.mubr.msk.f32.vlgmr.msra.gmra.mrb[58].mxu0 %vm2060_vm5, %v4478_v46  ;;  %18126 = vmatpush3.msk.msra.mxu1 %vm2064_vm3, %v3949_v5  ;;  %v16792_v5 = vld [vmem:[%s22260_s5 + $0x4] ss:$0 sm:$0xff] }
 0x614   :  { %v4479_v18 = vmul.f32 %v19351_v17, %v19339_v50  ;;  %18127 = vmatprep.mubr.msk.f32.mxu1 %vm19471_vm0, %v19472_v6  ;;  %18132 = vmatprep.mubr.msk.f32.mxu0 %vm19471_vm0, %v19472_v6  ;;  %v19465_v17 = vld [vmem:[%s22253_s28 + $0x4] sm:$0xf] }
 0x615   :  { %18135 = vmatprep.subr.mxu1 %v19472_v6  ;;  %18131 = vmatpush3.msra.mxu0 %v16770_v48 }
 0x616   :  { %18128 = vmatmul.mubr.msk.f32.vlgmr.msra.gmra.mrb[58].mxu1 %vm2060_vm5, %v4479_v18  ;;  %18140 = vmatprep.subr.mxu0 %v19472_v6 }
 0x617   :  { %18137 = vmatprep.mubr.msk.f32.mxu1 %vm19471_vm0, %v19472_v6  ;;  %18136 = vmatpush3.msra.mxu1 %v16771_v19 }
 0x618   :  { %18145 = vmatprep.subr.mxu1 %v19472_v6 }
 0x6de   :  { %v4552_v23 = vpop.f32.mrb[54].mxu0 }
 0x6df   :  { %v18104_v24 = vpop.f32.mrb[55].mxu0  ;;  %18133 = vmatmul.mubr.msk.f32.vlgmr.msra.gmra.mrb[60].mxu0 %vm1530_vm2, %v4552_v23 }
 0x6e0   :  { %18141 = vmatpush3.msra.mxu0 %v16772_v21  ;;  %18142 = vmatprep.mubr.msk.f32.mxu0 %vm19471_vm0, %v19472_v6  ;;  %v19466_v21 = vld [vmem:[%s22253_s28 + $0x8] sm:$0xf] }
 0x6e1   :  { %v4628_v26 = vpop.f32.mrb[54].mxu1  ;;  %18150 = vmatprep.subr.mxu0 %v19472_v6 }
 0x6e2   :  { %v4704_v62 = vpop.f32.mrb[56].mxu0  ;;  %v18109_v29 = vpop.f32.mrb[55].mxu1  ;;  %18138 = vmatmul.mubr.msk.f32.vlgmr.msra.gmra.mrb[60].mxu1 %vm1530_vm2, %v4628_v26 }
 0x6e3   :  { %v18114_v31 = vpop.f32.mrb[57].mxu0  ;;  %18143 = vmatmul.mubr.msk.f32.vlgmr.msra.gmra.mrb[62].mxu0 %vm1530_vm2, %v4704_v62  ;;  %18146 = vmatpush3.msra.mxu1 %v16773_v25  ;;  %v16793_v62 = vld [vmem:[%s22260_s5 + $0x5] ss:$0 sm:$0xff] }
 0x6e4   :  { %18147 = vmatprep.mubr.msk.f32.mxu1 %vm19471_vm0, %v19472_v6  ;;  %18151 = vmatpush3.msra.mxu0 %v16774_v27 }
 0x6e5   :  { %v4780_v32 = vpop.f32.mrb[56].mxu1  ;;  %18152 = vmatprep.mubr.msk.f32.mxu0 %vm19471_vm0, %v19472_v6  ;;  %18155 = vmatprep.subr.mxu1 %v19472_v6 }
 0x6e6   :  { %v4856_v34 = vpop.f32.mrb[58].mxu0  ;;  %v18119_v35 = vpop.f32.mrb[57].mxu1  ;;  %18148 = vmatmul.mubr.msk.f32.vlgmr.msra.gmra.mrb[62].mxu1 %vm1530_vm2, %v4780_v32  ;;  %18160 = vmatprep.subr.mxu0 %v19472_v6  ;;  %v19467_v32 = vld [vmem:[%s22253_s28 + $0xc] sm:$0xf] }
 0x6e7   :  { %v18124_v36 = vpop.f32.mrb[59].mxu0  ;;  %18153 = vmatmul.mubr.msk.f32.vlgmr.msra.gmra.mrb[64].mxu0 %vm1530_vm2, %v4856_v34  ;;  %18156 = vmatpush3.msra.mxu1 %v16775_v11  ;;  %v19468_v34 = vld [vmem:[%s22253_s28 + $0x10] sm:$0xf] }
 0x6e8   :  { %18157 = vmatprep.mubr.msk.f32.mxu1 %vm19471_vm0, %v19472_v6  ;;  %18161 = vmatpush3.msra.mxu0 %v2518_v33 }
 0x6e9   :  { %v4932_v22 = vpop.f32.mrb[58].mxu1  ;;  %18162 = vmatprep.mubr.msk.f32.mxu0 %vm19471_vm0, %v19472_v6  ;;  %18165 = vmatprep.subr.mxu1 %v19472_v6 }
 0x6ea   :  { %v18129_v38 = vpop.f32.mrb[59].mxu1  ;;  %18158 = vmatmul.mubr.msk.f32.vlgmr.msra.gmra.mrb[64].mxu1 %vm1530_vm2, %v4932_v22  ;;  %18170 = vmatprep.subr.mxu0 %v19472_v6 }
 0x6eb   :  { %18163 = vmatmul.mubr.msk.f32.vlgmr.msra.gmra.mrb[66].mxu0 %vm1530_vm2, %v20179_v20  ;;  %18166 = vmatpush3.msra.mxu1 %v2519_v14  ;;  %v2523_v20 = vld [vmem:[%s22259_s1 + $0x28] sm:$0xff] }
 0x6ec   :  { %18167 = vmatprep.mubr.msk.f32.mxu1 %vm19471_vm0, %v19472_v6  ;;  %18171 = vmatpush3.msra.mxu0 %v2520_v37  ;;  %v19469_v37 = vld [vmem:[%s22253_s28 + $0x14] sm:$0xf] }
 0x6ed   :  { %18172 = vmatprep.mubr.msk.f32.mxu0 %vm19471_vm0, %v19472_v6  ;;  %18175 = vmatprep.subr.mxu1 %v19472_v6 }
 0x6ee   :  { %18168 = vmatmul.mubr.msk.f32.vlgmr.msra.gmra.mrb[66].mxu1 %vm1530_vm2, %v20181_v1  ;;  %18180 = vmatprep.subr.mxu0 %v19472_v6 }
 0x6ef   :  { %18173 = vmatmul.mubr.msk.f32.vlgmr.msra.gmra.mrb[68].mxu0 %vm1530_vm2, %v20183_v28  ;;  %18176 = vmatpush3.msra.mxu1 %v2521_v40 }
 0x6f0   :  { %18177 = vmatprep.mubr.msk.f32.mxu1 %vm19471_vm0, %v19472_v6  ;;  %18181 = vmatpush3.msra.mxu0 %v2522_v41 }
 0x6f1   :  { %18182 = vmatprep.mubr.msk.f32.mxu0 %vm19471_vm0, %v19472_v6  ;;  %18185 = vmatprep.subr.mxu1 %v19472_v6 }
 0x6f2   :  { %18178 = vmatmul.mubr.msk.f32.vlgmr.msra.gmra.mrb[68].mxu1 %vm1530_vm2, %v20185_v3  ;;  %19064 = vmatprep.subr.bf16.mxu0 %v19470_v0 }
 0x6f3   :  { %18183 = vmatmul.mubr.msk.f32.vlgmr.msra.gmra.mrb[70].mxu0 %vm1530_vm2, %v20187_v39  ;;  %18186 = vmatpush3.msra.mxu1 %v2523_v20 }
 0x6f4   :  { %18187 = vmatprep.mubr.msk.f32.mxu1 %vm19471_vm0, %v19472_v6  ;;  %18194 = vmatprep.mubr.msk.f32.mxu0 %vm19471_vm0, %v19472_v6 }
 0x6f5   :  { %19067 = vmatprep.subr.bf16.mxu1 %v19470_v0 }
 0x6f6   :  { %18188 = vmatmul.mubr.msk.f32.vlgmr.msra.gmra.mrb[70].mxu1 %vm1530_vm2, %v20189_v42 }
 0x6f7   :  { %18201 = vmatprep.mubr.msk.f32.mxu1 %vm19471_vm0, %v19472_v6 }
 0x7b2   :  { %v5012_v1 = vpop.f32.mrb[60].mxu0 }
 0x7b3   :  { %v18134_v28 = vpop.f32.mrb[61].mxu0 }
 0x7b5   :  { %v5085_v3 = vpop.f32.mrb[60].mxu1 }
 0x7b6   :  { %v5158_v30 = vpop.f32.mrb[62].mxu0  ;;  %v18139_v39 = vpop.f32.mrb[61].mxu1 }
 0x7b7   :  { %v18144_v44 = vpop.f32.mrb[63].mxu0 }
 0x7b9   :  { %v5231_v45 = vpop.f32.mrb[62].mxu1 }
 0x7ba   :  { %v5304_v47 = vpop.f32.mrb[64].mxu0  ;;  %v18149_v49 = vpop.f32.mrb[63].mxu1 }
 0x7bb   :  { %v18154_v50 = vpop.f32.mrb[65].mxu0 }
 0x7bd   :  { %v5377_v51 = vpop.f32.mrb[64].mxu1 }
 0x7be   :  { %v5450_v52 = vpop.f32.mrb[66].mxu0  ;;  %v18159_v42 = vpop.f32.mrb[65].mxu1 }
 0x7bf   :  { %v5451_v54 = vadd.f32 %v5450_v52, %v5012_v1  ;;  %v18164_v55 = vpop.f32.mrb[67].mxu0 }
 0x7c1   :  { %v5861_v56 = vadd.f32 %v16788_v53, %v5451_v54  ;;  %v5523_v57 = vpop.f32.mrb[66].mxu1 }
 0x7c2   :  { %v5524_v59 = vadd.f32 %v5523_v57, %v5085_v3  ;;  %v5596_v60 = vpop.f32.mrb[68].mxu0  ;;  %v18169_v63 = vpop.f32.mrb[67].mxu1 }
 0x7c3   :  { %v5597_v2 = vadd.f32 %v5596_v60, %v5158_v30  ;;  %v18174_v4 = vpop.f32.mrb[69].mxu0  ;;  %v5867_v8 = vadd.f32 %v19464_v7, %v5861_v56 }
 0x7c4   :  { %v5862_v43 = vadd.f32 %v16789_v58, %v5524_v59 }
 0x7c5   :  { %v5863_v9 = vadd.f32 %v16790_v61, %v5597_v2  ;;  %v5669_v10 = vpop.f32.mrb[68].mxu1  ;;  %v5886_v13 = vsel %vm5885_vm6, %v5867_v8, 0.0 }
 0x7c6   :  { %v5670_v15 = vadd.f32 %v5669_v10, %v5231_v45  ;;  %5887 = vadd.xlane.f32.xlu0 %v5886_v13  ;;  %v5742_v16 = vpop.f32.mrb[70].mxu0  ;;  %v18179_v46 = vpop.f32.mrb[69].mxu1  ;;  %v5868_v18 = vadd.f32 %v19465_v17, %v5862_v43  ;;  %v6050_v10 = vld [vmem:[%s22261_s27 + $0x8] sm:$0xff]  ;;  %v6051_v13 = vld [vmem:[%s22261_s27 + $0x10] sm:$0xff] }
 0x7c7   :  { %v5743_v48 = vadd.f32 %v5742_v16, %v5304_v47  ;;  %v18184_v19 = vpop.f32.mrb[71].mxu0  ;;  %v5869_v23 = vadd.f32 %v19466_v21, %v5863_v9  ;;  %v6049_v9 = vld [vmem:[%s22261_s27] sm:$0xff] }
 0x7c8   :  { %v5864_v24 = vadd.f32 %v16791_v12, %v5670_v15  ;;  %v5889_v25 = vsel %vm5885_vm6, %v5868_v18, 0.0  ;;  %v19065_v12 = vpack.c.bf16 %v6050_v10, %v6049_v9  ;;  %v6052_v15 = vld [vmem:[%s22261_s27 + $0x18] sm:$0xff]  ;;  %v16804_v10 = vld [vmem:[%s22207_s10 + $0x4] ss:$0 sm:$0xff] }
 0x7c9   :  { %v5865_v26 = vadd.f32 %v16792_v5, %v5743_v48  ;;  %5890 = vadd.xlane.f32.xlu1 %v5889_v25  ;;  %v5815_v27 = vpop.f32.mrb[70].mxu1  ;;  %v5892_v29 = vsel %vm5885_vm6, %v5869_v23, 0.0  ;;  %v19068_v16 = vpack.c.bf16 %v6052_v15, %v6051_v13  ;;  %v16799_v15 = vld [vmem:[%s22262_s4 + $0x5] ss:$0 sm:$0xff] }
 0x7ca   :  { %v5816_v31 = vadd.f32 %v5815_v27, %v5377_v51  ;;  %5893 = vadd.xlane.f32.xlu0 %v5892_v29  ;;  %v18189_v11 = vpop.f32.mrb[71].mxu1  ;;  %v5870_v33 = vadd.f32 %v19467_v32, %v5864_v24  ;;  %19066 = vmatpush3.bf16.msra.mxu0 %v19065_v12 }
 0x7cb   :  { %v5871_v35 = vadd.f32 %v19468_v34, %v5865_v26  ;;  %19070 = vmatprep.subr.bf16.mxu0 %v19470_v0  ;;  %19069 = vmatpush3.bf16.msra.mxu1 %v19068_v16 }
 0x7cc   :  { %v5866_v36 = vadd.f32 %v16793_v62, %v5816_v31  ;;  %v5895_v14 = vsel %vm5885_vm6, %v5870_v33, 0.0  ;;  %19073 = vmatprep.subr.bf16.mxu1 %v19470_v0 }
 0x7cd   :  { %5896 = vadd.xlane.f32.xlu1 %v5895_v14  ;;  %v5898_v22 = vsel %vm5885_vm6, %v5871_v35, 0.0  ;;  %v6053_v14 = vld [vmem:[%s22261_s27 + $0x20] sm:$0xff] }
 0x7ce   :  { %5899 = vadd.xlane.f32.xlu0 %v5898_v22  ;;  %v5872_v38 = vadd.f32 %v19469_v37, %v5866_v36  ;;  %v6054_v22 = vld [vmem:[%s22261_s27 + $0x28] sm:$0xff]  ;;  %v16800_v37 = vld [vmem:[%s22207_s10] ss:$0 sm:$0xff] }
 0x7d0   :  { %v5901_v40 = vsel %vm5885_vm6, %v5872_v38, 0.0 }
 0x7d1   :  { %5902 = vadd.xlane.f32.xlu1 %v5901_v40 }
 0x853   :  { %v5888_v41 = vpop.xlane.xlu0 %5887 }
 0x854   :  { %v5905_v20 = vmul.f32 0.0625, %v5888_v41  ;;  %v16795_v41 = vld [vmem:[%s22262_s4 + $0x1] ss:$0 sm:$0xff] }
 0x856   :  { %v20461_v1 = vsub.f32 %v5867_v8, %v5905_v20  ;;  %v5891_v28 = vpop.xlane.xlu1 %5890 }
 0x857   :  { %v5906_v3 = vmul.f32 0.0625, %v5891_v28  ;;  %v5894_v30 = vpop.xlane.xlu0 %5893  ;;  %v19071_v28 = vpack.c.bf16 %v6054_v22, %v6053_v14 }
 0x858   :  { %v5907_v39 = vmul.f32 0.0625, %v5894_v30  ;;  %v5917_v44 = vmul.f32 %v20461_v1, %v20461_v1  ;;  %v6055_v30 = vld [vmem:[%s22261_s27 + $0x30] sm:$0xff] }
 0x859   :  { %v20465_v45 = vsub.f32 %v5868_v18, %v5906_v3  ;;  %v16796_v3 = vld [vmem:[%s22262_s4 + $0x2] ss:$0 sm:$0xff] }
 0x85a   :  { %v20467_v47 = vsub.f32 %v5869_v23, %v5907_v39  ;;  %v5897_v49 = vpop.xlane.xlu1 %5896  ;;  %v5923_v50 = vsel %vm5885_vm6, %v5917_v44, 0.0  ;;  %v6056_v39 = vld [vmem:[%s22261_s27 + $0x38] sm:$0xff] }
 0x85b   :  { %v5908_v51 = vmul.f32 0.0625, %v5897_v49  ;;  %5924 = vadd.xlane.f32.xlu0 %v5923_v50  ;;  %v5900_v52 = vpop.xlane.xlu0 %5899  ;;  %v5918_v53 = vmul.f32 %v20465_v45, %v20465_v45  ;;  %v6057_v50 = vld [vmem:[%s22261_s27 + $0x40] sm:$0xff] }
 0x85c   :  { %v5909_v42 = vmul.f32 0.0625, %v5900_v52  ;;  %v5919_v54 = vmul.f32 %v20467_v47, %v20467_v47 }
 0x85d   :  { %v20474_v55 = vsub.f32 %v5870_v33, %v5908_v51  ;;  %v5926_v56 = vsel %vm5885_vm6, %v5918_v53, 0.0  ;;  %v6058_v51 = vld [vmem:[%s22261_s27 + $0x48] sm:$0xff]  ;;  %v16802_v53 = vld [vmem:[%s22207_s10 + $0x2] ss:$0 sm:$0xff] }
 0x85e   :  { %v20477_v57 = vsub.f32 %v5871_v35, %v5909_v42  ;;  %5927 = vadd.xlane.f32.xlu1 %v5926_v56  ;;  %v5903_v58 = vpop.xlane.xlu1 %5902  ;;  %v5929_v59 = vsel %vm5885_vm6, %v5919_v54, 0.0  ;;  %v16794_v35 = vld [vmem:[%s22262_s4] ss:$0 sm:$0xff]  ;;  %v19074_v54 = vpack.c.bf16 %v6056_v39, %v6055_v30  ;;  %v16797_v56 = vld [vmem:[%s22262_s4 + $0x3] ss:$0 sm:$0xff] }
 0x85f   :  { %v5910_v60 = vmul.f32 0.0625, %v5903_v58  ;;  %5930 = vadd.xlane.f32.xlu0 %v5929_v59  ;;  %v5920_v61 = vmul.f32 %v20474_v55, %v20474_v55 }
 0x860   :  { %v5921_v63 = vmul.f32 %v20477_v57, %v20477_v57 }
 0x861   :  { %v20484_v2 = vsub.f32 %v5872_v38, %v5910_v60  ;;  %v5932_v4 = vsel %vm5885_vm6, %v5920_v61, 0.0  ;;  %v19077_v61 = vpack.c.bf16 %v6058_v51, %v6057_v50  ;;  %v6557_v50 = vld [vmem:[%s22208_s13 + $0x50] sm:$0xff]  ;;  %v6558_v51 = vld [vmem:[%s22208_s13 + $0x58] sm:$0xff] }
 0x862   :  { %5933 = vadd.xlane.f32.xlu1 %v5932_v4  ;;  %v5935_v7 = vsel %vm5885_vm6, %v5921_v63, 0.0  ;;  %v16798_v63 = vld [vmem:[%s22262_s4 + $0x4] ss:$0 sm:$0xff]  ;;  %v6059_v4 = vld [vmem:[%s22261_s27 + $0x50] sm:$0xff] }
 0x863   :  { %5936 = vadd.xlane.f32.xlu0 %v5935_v7  ;;  %v5922_v8 = vmul.f32 %v20484_v2, %v20484_v2  ;;  %v6060_v7 = vld [vmem:[%s22261_s27 + $0x58] sm:$0xff] }
 0x864   :  { %v19080_v13 = vpack.c.bf16 %v6060_v7, %v6059_v4 }
 0x865   :  { %v5938_v43 = vsel %vm5885_vm6, %v5922_v8, 0.0 }
 0x866   :  { %5939 = vadd.xlane.f32.xlu1 %v5938_v43  ;;  %v16803_v43 = vld [vmem:[%s22207_s10 + $0x3] ss:$0 sm:$0xff] }
 0x8e8   :  { %v5925_v5 = vpop.xlane.xlu0 %5924 }
 0x8e9   :  { %v5941_v46 = vmul.f32 0.0625, %v5925_v5 }
 0x8eb   :  { %v5947_v17 = vadd.f32 1e-05, %v5941_v46  ;;  %v5928_v18 = vpop.xlane.xlu1 %5927 }
 0x8ec   :  { %v5942_v48 = vmul.f32 0.0625, %v5928_v18  ;;  %v5931_v19 = vpop.xlane.xlu0 %5930 }
 0x8ed   :  { %19352 = vrsqrt.f32 %v5947_v17  ;;  %v5943_v21 = vmul.f32 0.0625, %v5931_v19  ;;  %v16805_v17 = vld [vmem:[%s22207_s10 + $0x5] ss:$0 sm:$0xff]  ;;  %v6548_v19 = vld [vmem:[%s22208_s13 + $0x8] sm:$0xff] }
 0x8ee   :  { %v5948_v23 = vadd.f32 1e-05, %v5942_v48  ;;  %v6547_v48 = vld [vmem:[%s22208_s13] sm:$0xff] }
 0x8ef   :  { %v5949_v24 = vadd.f32 1e-05, %v5943_v21  ;;  %v5934_v25 = vpop.xlane.xlu1 %5933  ;;  %v19083_v21 = vpack.c.bf16 %v6548_v19, %v6547_v48 }
 0x8f0   :  { %19354 = vrsqrt.f32 %v5948_v23  ;;  %v5944_v26 = vmul.f32 0.0625, %v5934_v25  ;;  %v5937_v27 = vpop.xlane.xlu0 %5936  ;;  %v6549_v23 = vld [vmem:[%s22208_s13 + $0x10] sm:$0xff] }
 0x8f1   :  { %19356 = vrsqrt.f32 %v5949_v24  ;;  %v5945_v62 = vmul.f32 0.0625, %v5937_v27  ;;  %v6550_v24 = vld [vmem:[%s22208_s13 + $0x18] sm:$0xff]  ;;  %v6551_v27 = vld [vmem:[%s22208_s13 + $0x20] sm:$0xff] }
 0x8f2   :  { %v5950_v29 = vadd.f32 1e-05, %v5944_v26  ;;  %v19086_v25 = vpack.c.bf16 %v6550_v24, %v6549_v23  ;;  %v16806_v26 = vld [vmem:[%s22209_s12] ss:$0 sm:$0xff] }
 0x8f3   :  { %v5951_v31 = vadd.f32 1e-05, %v5945_v62  ;;  %v5940_v11 = vpop.xlane.xlu1 %5939  ;;  %v6552_v62 = vld [vmem:[%s22208_s13 + $0x28] sm:$0xff] }
 0x8f4   :  { %19358 = vrsqrt.f32 %v5950_v29  ;;  %v5946_v32 = vmul.f32 0.0625, %v5940_v11 }
 0x8f5   :  { %19360 = vrsqrt.f32 %v5951_v31 }
 0x8f6   :  { %v5952_v33 = vadd.f32 1e-05, %v5946_v32  ;;  %v16807_v32 = vld [vmem:[%s22209_s12 + $0x1] ss:$0 sm:$0xff] }
 0x8f7   :  { %v19353_v34 = vpop.eup %19352 }
 0x8f8   :  { %v5959_v36 = vmul.f32 %v19353_v34, %v20461_v1  ;;  %19362 = vrsqrt.f32 %v5952_v33  ;;  %v16808_v33 = vld [vmem:[%s22209_s12 + $0x2] ss:$0 sm:$0xff]  ;;  %v19089_v34 = vpack.c.bf16 %v6552_v62, %v6551_v27  ;;  %v16822_v27 = vld [vmem:[%s22210_s14 + $0x4] ss:$0 sm:$0xff] }
 0x8fa   :  { %v19355_v38 = vpop.eup %19354  ;;  %v6001_v40 = vmul.f32 %v16794_v35, %v5959_v36  ;;  %v6553_v35 = vld [vmem:[%s22208_s13 + $0x30] sm:$0xff]  ;;  %v6554_v36 = vld [vmem:[%s22208_s13 + $0x38] sm:$0xff] }
 0x8fb   :  { %v19357_v20 = vpop.eup %19356  ;;  %v5960_v1 = vmul.f32 %v19355_v38, %v20465_v45  ;;  %v16801_v45 = vld [vmem:[%s22207_s10 + $0x1] ss:$0 sm:$0xff]  ;;  %v6556_v38 = vld [vmem:[%s22208_s13 + $0x48] sm:$0xff]  ;;  %v19092_v30 = vpack.c.bf16 %v6554_v36, %v6553_v35 }
 0x8fc   :  { %v5961_v44 = vmul.f32 %v19357_v20, %v20467_v47  ;;  %v20532_v49 = vadd.f32 %v16800_v37, %v6001_v40  ;;  %v6555_v37 = vld [vmem:[%s22208_s13 + $0x40] sm:$0xff] }
 0x8fd   :  { %v6002_v52 = vmul.f32 %v16795_v41, %v5960_v1 }
 0x8fe   :  { %v19359_v47 = vpop.eup %19358  ;;  %18195 = vmatmul.mubr.msk.f32.vlgmr.msra.gmra.mrb[72].mxu0 %vm143_vm1, %v20532_v49  ;;  %v6003_v42 = vmul.f32 %v16796_v3, %v5961_v44  ;;  %v16809_v3 = vld [vmem:[%s22209_s12 + $0x3] ss:$0 sm:$0xff]  ;;  %v16810_v44 = vld [vmem:[%s22209_s12 + $0x4] ss:$0 sm:$0xff] }
 0x8ff   :  { %v19361_v58 = vpop.eup %19360  ;;  %v5962_v59 = vmul.f32 %v19359_v47, %v20474_v55  ;;  %19072 = vmatpush3.bf16.msra.mxu0 %v19071_v28  ;;  %18208 = vmatprep.mubr.msk.f32.mxu0 %vm19471_vm0, %v19472_v6  ;;  %v20554_v60 = vadd.f32 %v16801_v45, %v6002_v52  ;;  %v19095_v45 = vpack.c.bf16 %v6556_v38, %v6555_v37 }
 0x900   :  { %v5963_v55 = vmul.f32 %v19361_v58, %v20477_v57  ;;  %v20566_v8 = vadd.f32 %v16802_v53, %v6003_v42  ;;  %19076 = vmatprep.subr.bf16.mxu0 %v19470_v0 }
 0x901   :  { %18202 = vmatmul.mubr.msk.f32.vlgmr.msra.gmra.mrb[72].mxu1 %vm143_vm1, %v20554_v60  ;;  %v6004_v9 = vmul.f32 %v16797_v56, %v5962_v59  ;;  %v16811_v59 = vld [vmem:[%s22209_s12 + $0x5] ss:$0 sm:$0xff] }
 0x902   :  { %v19363_v12 = vpop.eup %19362  ;;  %18209 = vmatmul.mubr.msk.f32.vlgmr.msra.gmra.mrb[74].mxu0 %vm143_vm1, %v20566_v8  ;;  %19075 = vmatpush3.bf16.msra.mxu1 %v19074_v54  ;;  %v6005_v57 = vmul.f32 %v16798_v63, %v5963_v55 }
 0x903   :  { %v5964_v16 = vmul.f32 %v19363_v12, %v20484_v2  ;;  %19078 = vmatpush3.bf16.msra.mxu0 %v19077_v61  ;;  %18215 = vmatprep.mubr.msk.f32.mxu1 %vm19471_vm0, %v19472_v6  ;;  %v20585_v5 = vadd.f32 %v16803_v43, %v6004_v9  ;;  %v19098_v61 = vpack.c.bf16 %v6558_v51, %v6557_v50 }
 0x904   :  { %18222 = vmatprep.mubr.msk.f32.mxu0 %vm19471_vm0, %v19472_v6  ;;  %v20589_v46 = vadd.f32 %v16804_v10, %v6005_v57  ;;  %19079 = vmatprep.subr.bf16.mxu1 %v19470_v0  ;;  %v16818_v10 = vld [vmem:[%s22210_s14] ss:$0 sm:$0xff] }
 0x905   :  { %18216 = vmatmul.mubr.msk.f32.vlgmr.msra.gmra.mrb[74].mxu1 %vm143_vm1, %v20585_v5  ;;  %v6006_v2 = vmul.f32 %v16799_v15, %v5964_v16  ;;  %19082 = vmatprep.subr.bf16.mxu0 %v19470_v0  ;;  %v16819_v15 = vld [vmem:[%s22210_s14 + $0x1] ss:$0 sm:$0xff]  ;;  %v16820_v16 = vld [vmem:[%s22210_s14 + $0x2] ss:$0 sm:$0xff] }
 0x906   :  { %18223 = vmatmul.mubr.msk.f32.vlgmr.msra.gmra.mrb[76].mxu0 %vm143_vm1, %v20589_v46  ;;  %19081 = vmatpush3.bf16.msra.mxu1 %v19080_v13 }
 0x907   :  { %18229 = vmatprep.mubr.msk.f32.mxu1 %vm19471_vm0, %v19472_v6  ;;  %v20602_v18 = vadd.f32 %v16805_v17, %v6006_v2  ;;  %18236 = vmatprep.mubr.msk.f32.mxu0 %vm19471_vm0, %v19472_v6 }
 0x908   :  { %19085 = vmatprep.subr.bf16.mxu1 %v19470_v0  ;;  %19084 = vmatpush3.bf16.msra.mxu0 %v19083_v21 }
 0x909   :  { %18230 = vmatmul.mubr.msk.f32.vlgmr.msra.gmra.mrb[76].mxu1 %vm143_vm1, %v20602_v18  ;;  %19088 = vmatprep.subr.bf16.mxu0 %v19470_v0 }
 0x90a   :  { %18243 = vmatprep.mubr.msk.f32.mxu1 %vm19471_vm0, %v19472_v6  ;;  %19087 = vmatpush3.bf16.msra.mxu1 %v19086_v25 }
 0x90b   :  { %19091 = vmatprep.subr.bf16.mxu1 %v19470_v0 }
 0x9d1   :  { %v6172_v29 = vpop.f32.mrb[72].mxu0 }
 0x9d2   :  { %v6173_v31 = vadd.f32 %v16806_v26, %v6172_v29  ;;  %v18196_v11 = vpop.f32.mrb[73].mxu0  ;;  %v16821_v26 = vld [vmem:[%s22210_s14 + $0x3] ss:$0 sm:$0xff] }
 0x9d4   :  { %v6541_v14 = vmax.f32 %v6173_v31, 0.0  ;;  %v6245_v22 = vpop.f32.mrb[72].mxu1 }
 0x9d5   :  { %v6246_v40 = vadd.f32 %v16807_v32, %v6245_v22  ;;  %v6318_v41 = vpop.f32.mrb[74].mxu0  ;;  %v18203_v20 = vpop.f32.mrb[73].mxu1 }
 0x9d6   :  { %v6319_v1 = vadd.f32 %v16808_v33, %v6318_v41  ;;  %v18210_v28 = vpop.f32.mrb[75].mxu0  ;;  %18237 = vmatmul.mubr.msk.f32.vlgmr.msra.gmra.mrb[78].mxu0 %vm143_vm1, %v6541_v14  ;;  %v16823_v14 = vld [vmem:[%s22210_s14 + $0x5] ss:$0 sm:$0xff] }
 0x9d7   :  { %v6542_v39 = vmax.f32 %v6246_v40, 0.0  ;;  %19090 = vmatpush3.bf16.msra.mxu0 %v19089_v34  ;;  %18250 = vmatprep.mubr.msk.f32.mxu0 %vm19471_vm0, %v19472_v6 }
 0x9d8   :  { %v6543_v52 = vmax.f32 %v6319_v1, 0.0  ;;  %v6391_v53 = vpop.f32.mrb[74].mxu1  ;;  %19094 = vmatprep.subr.bf16.mxu0 %v19470_v0 }
 0x9d9   :  { %v6392_v47 = vadd.f32 %v16809_v3, %v6391_v53  ;;  %v6464_v42 = vpop.f32.mrb[76].mxu0  ;;  %v18217_v54 = vpop.f32.mrb[75].mxu1  ;;  %18244 = vmatmul.mubr.msk.f32.vlgmr.msra.gmra.mrb[78].mxu1 %vm143_vm1, %v6542_v39 }
 0x9da   :  { %v6465_v56 = vadd.f32 %v16810_v44, %v6464_v42  ;;  %v18224_v58 = vpop.f32.mrb[77].mxu0  ;;  %18251 = vmatmul.mubr.msk.f32.vlgmr.msra.gmra.mrb[80].mxu0 %vm143_vm1, %v6543_v52  ;;  %19093 = vmatpush3.bf16.msra.mxu1 %v19092_v30 }
 0x9db   :  { %v6544_v63 = vmax.f32 %v6392_v47, 0.0  ;;  %19096 = vmatpush3.bf16.msra.mxu0 %v19095_v45  ;;  %18257 = vmatprep.mubr.msk.f32.mxu1 %vm19471_vm0, %v19472_v6 }
 0x9dc   :  { %v6545_v4 = vmax.f32 %v6465_v56, 0.0  ;;  %v6537_v7 = vpop.f32.mrb[76].mxu1  ;;  %18264 = vmatprep.mubr.msk.f32.mxu0 %vm19471_vm0, %v19472_v6  ;;  %19097 = vmatprep.subr.bf16.mxu1 %v19470_v0 }
 0x9dd   :  { %v6538_v55 = vadd.f32 %v16811_v59, %v6537_v7  ;;  %v18231_v43 = vpop.f32.mrb[77].mxu1  ;;  %18258 = vmatmul.mubr.msk.f32.vlgmr.msra.gmra.mrb[80].mxu1 %vm143_vm1, %v6544_v63  ;;  %19100 = vmatprep.subr.bf16.mxu0 %v19470_v0 }
 0x9de   :  { %18265 = vmatmul.mubr.msk.f32.vlgmr.msra.gmra.mrb[82].mxu0 %vm143_vm1, %v6545_v4  ;;  %19099 = vmatpush3.bf16.msra.mxu1 %v19098_v61 }
 0x9df   :  { %v6546_v9 = vmax.f32 %v6538_v55, 0.0  ;;  %18271 = vmatprep.mubr.msk.f32.mxu1 %vm19471_vm0, %v19472_v6  ;;  %18278 = vmatprep.mubr.msk.f32.mxu0 %vm19471_vm0, %v19472_v6 }
 0x9e0   :  { %19103 = vmatprep.subr.bf16.mxu1 %v19470_v0 }
 0x9e1   :  { %18272 = vmatmul.mubr.msk.f32.vlgmr.msra.gmra.mrb[82].mxu1 %vm143_vm1, %v6546_v9 }
 0x9e2   :  { %18285 = vmatprep.mubr.msk.f32.mxu1 %vm19471_vm0, %v19472_v6 }
 0xaa9   :  { %v6670_v12 = vpop.f32.mrb[78].mxu0 }
 0xaaa   :  { %v6671_v57 = vadd.f32 %v16818_v10, %v6670_v12  ;;  %v18238_v13 = vpop.f32.mrb[79].mxu0 }
 0xaac   :  { %v6743_v17 = vpop.f32.mrb[78].mxu1  ;;  %v7039_v2 = vadd.f32 %v6671_v57, %v20532_v49 }
 0xaad   :  { %v6744_v48 = vadd.f32 %v16819_v15, %v6743_v17  ;;  %v6816_v19 = vpop.f32.mrb[80].mxu0  ;;  %v18245_v21 = vpop.f32.mrb[79].mxu1  ;;  %v16842_v15 = vld [vmem:[%s22252_s7 + $0xc0] sm:$0xff] }
 0xaae   :  { %v6817_v23 = vadd.f32 %v16820_v16, %v6816_v19  ;;  %v18252_v24 = vpop.f32.mrb[81].mxu0  ;;  %v7057_v25 = vsel %vm5885_vm6, %v7039_v2, 0.0  ;;  %v16843_v16 = vld [vmem:[%s22252_s7 + $0xc8] sm:$0xff] }
 0xaaf   :  { %7058 = vadd.xlane.f32.xlu0 %v7057_v25  ;;  %v7040_v62 = vadd.f32 %v6744_v48, %v20554_v60  ;;  %v19101_v17 = vpack.c.bf16 %v16843_v16, %v16842_v15  ;;  %v16845_v48 = vld [vmem:[%s22252_s7 + $0xd8] sm:$0xff]  ;;  %v16872_v15 = vld [vmem:[%s22254_s30 + $0xc0] sm:$0xff]  ;;  %v16873_v16 = vld [vmem:[%s22254_s30 + $0xc8] sm:$0xff] }
 0xab0   :  { %v6889_v29 = vpop.f32.mrb[80].mxu1  ;;  %v7041_v49 = vadd.f32 %v6817_v23, %v20566_v8 }
 0xab1   :  { %v6890_v31 = vadd.f32 %v16821_v26, %v6889_v29  ;;  %v6962_v11 = vpop.f32.mrb[82].mxu0  ;;  %v18259_v32 = vpop.f32.mrb[81].mxu1  ;;  %v7060_v33 = vsel %vm5885_vm6, %v7040_v62, 0.0  ;;  %19102 = vmatpush3.bf16.msra.mxu0 %v19101_v17 }
 0xab2   :  { %v6963_v34 = vadd.f32 %v16822_v27, %v6962_v11  ;;  %v18266_v35 = vpop.f32.mrb[83].mxu0  ;;  %7061 = vadd.xlane.f32.xlu1 %v7060_v33  ;;  %v7063_v36 = vsel %vm5885_vm6, %v7041_v49, 0.0  ;;  %19106 = vmatprep.subr.bf16.mxu0 %v19470_v0 }
 0xab3   :  { %7064 = vadd.xlane.f32.xlu0 %v7063_v36  ;;  %v7042_v60 = vadd.f32 %v6890_v31, %v20585_v5 }
 0xab4   :  { %v7035_v22 = vpop.f32.mrb[82].mxu1  ;;  %v7043_v8 = vadd.f32 %v6963_v34, %v20589_v46 }
 0xab5   :  { %v7036_v37 = vadd.f32 %v16823_v14, %v7035_v22  ;;  %v18273_v38 = vpop.f32.mrb[83].mxu1  ;;  %v7066_v40 = vsel %vm5885_vm6, %v7042_v60, 0.0 }
 0xab6   :  { %7067 = vadd.xlane.f32.xlu1 %v7066_v40  ;;  %v7069_v41 = vsel %vm5885_vm6, %v7043_v8, 0.0  ;;  %v16846_v38 = vld [vmem:[%s22252_s7 + $0xe0] sm:$0xff]  ;;  %v16847_v40 = vld [vmem:[%s22252_s7 + $0xe8] sm:$0xff] }
 0xab7   :  { %7070 = vadd.xlane.f32.xlu0 %v7069_v41  ;;  %v7044_v20 = vadd.f32 %v7036_v37, %v20602_v18  ;;  %v16836_v41 = vld [vmem:[%s22212_s16] ss:$0 sm:$0xff] }
 0xab9   :  { %v7072_v1 = vsel %vm5885_vm6, %v7044_v20, 0.0 }
 0xaba   :  { %7073 = vadd.xlane.f32.xlu1 %v7072_v1 }
 0xb3c   :  { %v7059_v28 = vpop.xlane.xlu0 %7058 }
 0xb3d   :  { %v7075_v3 = vmul.f32 0.0625, %v7059_v28  ;;  %v16831_v28 = vld [vmem:[%s22211_s15 + $0x1] ss:$0 sm:$0xff] }
 0xb3f   :  { %v20719_v30 = vsub.f32 %v7039_v2, %v7075_v3  ;;  %v7062_v5 = vpop.xlane.xlu1 %7061  ;;  %v16844_v2 = vld [vmem:[%s22252_s7 + $0xd0] sm:$0xff] }
 0xb40   :  { %v7076_v39 = vmul.f32 0.0625, %v7062_v5  ;;  %v7065_v46 = vpop.xlane.xlu0 %7064  ;;  %v19104_v19 = vpack.c.bf16 %v16845_v48, %v16844_v2  ;;  %v16832_v5 = vld [vmem:[%s22211_s15 + $0x2] ss:$0 sm:$0xff]  ;;  %v16840_v2 = vld [vmem:[%s22212_s16 + $0x4] ss:$0 sm:$0xff] }
 0xb41   :  { %v7077_v44 = vmul.f32 0.0625, %v7065_v46  ;;  %v7087_v45 = vmul.f32 %v20719_v30, %v20719_v30  ;;  %v16848_v46 = vld [vmem:[%s22252_s7 + $0xf0] sm:$0xff] }
 0xb42   :  { %v20723_v50 = vsub.f32 %v7040_v62, %v7076_v39  ;;  %19105 = vmatpush3.bf16.msra.mxu1 %v19104_v19  ;;  %v19107_v39 = vpack.c.bf16 %v16847_v40, %v16846_v38  ;;  %v16835_v19 = vld [vmem:[%s22211_s15 + $0x5] ss:$0 sm:$0xff]  ;;  %v16903_v40 = vld [vmem:[%s22255_s0 + $0xc8] sm:$0xff] }
 0xb43   :  { %v20725_v51 = vsub.f32 %v7041_v49, %v7077_v44  ;;  %v7068_v52 = vpop.xlane.xlu1 %7067  ;;  %v7093_v18 = vsel %vm5885_vm6, %v7087_v45, 0.0  ;;  %19109 = vmatprep.subr.bf16.mxu1 %v19470_v0  ;;  %v16849_v44 = vld [vmem:[%s22252_s7 + $0xf8] sm:$0xff]  ;;  %v16902_v38 = vld [vmem:[%s22255_s0 + $0xc0] sm:$0xff] }
 0xb44   :  { %v7078_v53 = vmul.f32 0.0625, %v7068_v52  ;;  %7094 = vadd.xlane.f32.xlu0 %v7093_v18  ;;  %v7071_v47 = vpop.xlane.xlu0 %7070  ;;  %v7088_v42 = vmul.f32 %v20723_v50, %v20723_v50  ;;  %v16837_v52 = vld [vmem:[%s22212_s16 + $0x1] ss:$0 sm:$0xff] }
 0xb45   :  { %v7079_v54 = vmul.f32 0.0625, %v7071_v47  ;;  %v7089_v56 = vmul.f32 %v20725_v51, %v20725_v51  ;;  %v16850_v18 = vld [vmem:[%s22252_s7 + $0x100] sm:$0xff] }
 0xb46   :  { %v20732_v58 = vsub.f32 %v7042_v60, %v7078_v53  ;;  %v7096_v59 = vsel %vm5885_vm6, %v7088_v42, 0.0  ;;  %v16851_v53 = vld [vmem:[%s22252_s7 + $0x108] sm:$0xff]  ;;  %v16838_v42 = vld [vmem:[%s22212_s16 + $0x2] ss:$0 sm:$0xff] }
 0xb47   :  { %v20735_v61 = vsub.f32 %v7043_v8, %v7079_v54  ;;  %7097 = vadd.xlane.f32.xlu1 %v7096_v59  ;;  %v7074_v63 = vpop.xlane.xlu1 %7073  ;;  %v7099_v4 = vsel %vm5885_vm6, %v7089_v56, 0.0  ;;  %v16830_v8 = vld [vmem:[%s22211_s15] ss:$0 sm:$0xff]  ;;  %v16833_v59 = vld [vmem:[%s22211_s15 + $0x3] ss:$0 sm:$0xff] }
 0xb48   :  { %v7080_v7 = vmul.f32 0.0625, %v7074_v63  ;;  %7100 = vadd.xlane.f32.xlu0 %v7099_v4  ;;  %v7090_v55 = vmul.f32 %v20732_v58, %v20732_v58 }
 0xb49   :  { %v7091_v43 = vmul.f32 %v20735_v61, %v20735_v61 }
 0xb4a   :  { %v20742_v9 = vsub.f32 %v7044_v20, %v7080_v7  ;;  %v7102_v10 = vsel %vm5885_vm6, %v7090_v55, 0.0  ;;  %v16834_v55 = vld [vmem:[%s22211_s15 + $0x4] ss:$0 sm:$0xff] }
 0xb4b   :  { %7103 = vadd.xlane.f32.xlu1 %v7102_v10  ;;  %v7105_v12 = vsel %vm5885_vm6, %v7091_v43, 0.0  ;;  %v19113_v43 = vpack.c.bf16 %v16851_v53, %v16850_v18  ;;  %v16852_v10 = vld [vmem:[%s22252_s7 + $0x110] sm:$0xff] }
 0xb4c   :  { %7106 = vadd.xlane.f32.xlu0 %v7105_v12  ;;  %v7092_v57 = vmul.f32 %v20742_v9, %v20742_v9  ;;  %v16853_v12 = vld [vmem:[%s22252_s7 + $0x118] sm:$0xff] }
 0xb4e   :  { %v7108_v13 = vsel %vm5885_vm6, %v7092_v57, 0.0 }
 0xb4f   :  { %7109 = vadd.xlane.f32.xlu1 %v7108_v13 }
 0xbd1   :  { %v7095_v21 = vpop.xlane.xlu0 %7094 }
 0xbd2   :  { %v7111_v23 = vmul.f32 0.0625, %v7095_v21  ;;  %v19116_v21 = vpack.c.bf16 %v16853_v12, %v16852_v10 }
 0xbd4   :  { %v7117_v24 = vadd.f32 1e-05, %v7111_v23  ;;  %v7098_v25 = vpop.xlane.xlu1 %7097 }
 0xbd5   :  { %v7112_v26 = vmul.f32 0.0625, %v7098_v25  ;;  %v7101_v27 = vpop.xlane.xlu0 %7100  ;;  %v19119_v25 = vpack.c.bf16 %v16873_v16, %v16872_v15 }
 0xbd6   :  { %19364 = vrsqrt.f32 %v7117_v24  ;;  %v7113_v62 = vmul.f32 0.0625, %v7101_v27  ;;  %v16875_v27 = vld [vmem:[%s22254_s30 + $0xd8] sm:$0xff] }
 0xbd7   :  { %v7118_v29 = vadd.f32 1e-05, %v7112_v26  ;;  %v16874_v26 = vld [vmem:[%s22254_s30 + $0xd0] sm:$0xff] }
 0xbd8   :  { %v7119_v49 = vadd.f32 1e-05, %v7113_v62  ;;  %v7104_v31 = vpop.xlane.xlu1 %7103 }
 0xbd9   :  { %19366 = vrsqrt.f32 %v7118_v29  ;;  %v7114_v11 = vmul.f32 0.0625, %v7104_v31  ;;  %v7107_v32 = vpop.xlane.xlu0 %7106  ;;  %v16841_v29 = vld [vmem:[%s22212_s16 + $0x5] ss:$0 sm:$0xff] }
 0xbda   :  { %19368 = vrsqrt.f32 %v7119_v49  ;;  %v7115_v33 = vmul.f32 0.0625, %v7107_v32  ;;  %v16877_v49 = vld [vmem:[%s22254_s30 + $0xe8] sm:$0xff] }
 0xbdb   :  { %v7120_v34 = vadd.f32 1e-05, %v7114_v11  ;;  %v19122_v11 = vpack.c.bf16 %v16875_v27, %v16874_v26  ;;  %v16861_v26 = vld [vmem:[%s22257_s2 + $0xd] ss:$0 sm:$0xff] }
 0xbdc   :  { %v7121_v35 = vadd.f32 1e-05, %v7115_v33  ;;  %v7110_v36 = vpop.xlane.xlu1 %7109 }
 0xbdd   :  { %19370 = vrsqrt.f32 %v7120_v34  ;;  %v7116_v14 = vmul.f32 0.0625, %v7110_v36  ;;  %v16878_v34 = vld [vmem:[%s22254_s30 + $0xf0] sm:$0xff]  ;;  %v16880_v36 = vld [vmem:[%s22254_s30 + $0x100] sm:$0xff] }
 0xbde   :  { %19372 = vrsqrt.f32 %v7121_v35  ;;  %v16879_v35 = vld [vmem:[%s22254_s30 + $0xf8] sm:$0xff] }
 0xbdf   :  { %v7122_v60 = vadd.f32 1e-05, %v7116_v14  ;;  %v16881_v14 = vld [vmem:[%s22254_s30 + $0x108] sm:$0xff] }
 0xbe0   :  { %v19365_v22 = vpop.eup %19364 }
 0xbe1   :  { %v7129_v37 = vmul.f32 %v19365_v22, %v20719_v30  ;;  %19374 = vrsqrt.f32 %v7122_v60  ;;  %v19128_v60 = vpack.c.bf16 %v16879_v35, %v16878_v34  ;;  %v19131_v22 = vpack.c.bf16 %v16881_v14, %v16880_v36  ;;  %v16894_v34 = vld [vmem:[%s22256_s8 + $0x10] ss:$0 sm:$0xff] }
 0xbe3   :  { %v19367_v20 = vpop.eup %19366  ;;  %v7171_v1 = vmul.f32 %v16830_v8, %v7129_v37  ;;  %v16882_v8 = vld [vmem:[%s22254_s30 + $0x110] sm:$0xff]  ;;  %v16883_v37 = vld [vmem:[%s22254_s30 + $0x118] sm:$0xff] }
 0xbe4   :  { %v19369_v3 = vpop.eup %19368  ;;  %v7130_v30 = vmul.f32 %v19367_v20, %v20723_v50  ;;  %v19137_v20 = vpack.c.bf16 %v16903_v40, %v16902_v38  ;;  %v16864_v38 = vld [vmem:[%s22257_s2 + $0x10] ss:$0 sm:$0xff] }
 0xbe5   :  { %v20789_v45 = vadd.f32 %v16836_v41, %v7171_v1  ;;  %v7131_v50 = vmul.f32 %v19369_v3, %v20725_v51  ;;  %v19110_v51 = vpack.c.bf16 %v16849_v44, %v16848_v46  ;;  %v19134_v41 = vpack.c.bf16 %v16883_v37, %v16882_v8  ;;  %v16904_v1 = vld [vmem:[%s22255_s0 + $0xd0] sm:$0xff]  ;;  %v16906_v3 = vld [vmem:[%s22255_s0 + $0xe0] sm:$0xff]  ;;  %v16909_v44 = vld [vmem:[%s22255_s0 + $0xf8] sm:$0xff] }
 0xbe6   :  { %v7172_v47 = vmul.f32 %v16831_v28, %v7130_v30  ;;  %v16905_v28 = vld [vmem:[%s22255_s0 + $0xd8] sm:$0xff]  ;;  %v16907_v30 = vld [vmem:[%s22255_s0 + $0xe8] sm:$0xff]  ;;  %v16908_v46 = vld [vmem:[%s22255_s0 + $0xf0] sm:$0xff] }
 0xbe7   :  { %v19371_v54 = vpop.eup %19370  ;;  %v7173_v56 = vmul.f32 %v16832_v5, %v7131_v50  ;;  %18279 = vmatmul.mubr.msk.f32.vlgmr.msra.gmra.mrb[84].mxu0 %vm143_vm1, %v20789_v45  ;;  %v19140_v5 = vpack.c.bf16 %v16905_v28, %v16904_v1  ;;  %v16911_v50 = vld [vmem:[%s22255_s0 + $0x108] sm:$0xff]  ;;  %v19146_v18 = vpack.c.bf16 %v16909_v44, %v16908_v46 }
 0xbe8   :  { %v19373_v63 = vpop.eup %19372  ;;  %v20809_v4 = vadd.f32 %v16837_v52, %v7172_v47  ;;  %v7132_v7 = vmul.f32 %v19371_v54, %v20732_v58  ;;  %19108 = vmatpush3.bf16.msra.mxu0 %v19107_v39  ;;  %18292 = vmatprep.mubr.msk.f32.mxu0 %vm19471_vm0, %v19472_v6  ;;  %v16839_v58 = vld [vmem:[%s22212_s16 + $0x3] ss:$0 sm:$0xff]  ;;  %v19143_v39 = vpack.c.bf16 %v16907_v30, %v16906_v3  ;;  %v16912_v47 = vld [vmem:[%s22255_s0 + $0x110] sm:$0xff]  ;;  %v16920_v1 = vld [vmem:[%s22258_s6 + $0xc] ss:$0 sm:$0xff] }
 0xbe9   :  { %v20823_v57 = vadd.f32 %v16838_v42, %v7173_v56  ;;  %v7133_v13 = vmul.f32 %v19373_v63, %v20735_v61  ;;  %19112 = vmatprep.subr.bf16.mxu0 %v19470_v0  ;;  %v16910_v52 = vld [vmem:[%s22255_s0 + $0x100] sm:$0xff]  ;;  %v16913_v42 = vld [vmem:[%s22255_s0 + $0x118] sm:$0xff] }
 0xbea   :  { %v7174_v17 = vmul.f32 %v16833_v59, %v7132_v7  ;;  %18286 = vmatmul.mubr.msk.f32.vlgmr.msra.gmra.mrb[84].mxu1 %vm143_vm1, %v20809_v4  ;;  %v19149_v53 = vpack.c.bf16 %v16911_v50, %v16910_v52  ;;  %v19152_v54 = vpack.c.bf16 %v16913_v42, %v16912_v47 }
 0xbeb   :  { %v19375_v48 = vpop.eup %19374  ;;  %v7175_v61 = vmul.f32 %v16834_v55, %v7133_v13  ;;  %18293 = vmatmul.mubr.msk.f32.vlgmr.msra.gmra.mrb[86].mxu0 %vm143_vm1, %v20823_v57  ;;  %19111 = vmatpush3.bf16.msra.mxu1 %v19110_v51  ;;  %v16890_v13 = vld [vmem:[%s22256_s8 + $0xc] ss:$0 sm:$0xff] }
 0xbec   :  { %v20846_v23 = vadd.f32 %v16839_v58, %v7174_v17  ;;  %v7134_v24 = vmul.f32 %v19375_v48, %v20742_v9  ;;  %19114 = vmatpush3.bf16.msra.mxu0 %v19113_v43  ;;  %18299 = vmatprep.mubr.msk.f32.mxu1 %vm19471_vm0, %v19472_v6  ;;  %v16876_v9 = vld [vmem:[%s22254_s30 + $0xe0] sm:$0xff] }
 0xbed   :  { %v20857_v62 = vadd.f32 %v16840_v2, %v7175_v61  ;;  %18306 = vmatprep.mubr.msk.f32.mxu0 %vm19471_vm0, %v19472_v6  ;;  %19115 = vmatprep.subr.bf16.mxu1 %v19470_v0  ;;  %v19125_v33 = vpack.c.bf16 %v16877_v49, %v16876_v9  ;;  %v16860_v2 = vld [vmem:[%s22257_s2 + $0xc] ss:$0 sm:$0xff]  ;;  %v16862_v49 = vld [vmem:[%s22257_s2 + $0xe] ss:$0 sm:$0xff] }
 0xbee   :  { %v7176_v31 = vmul.f32 %v16835_v19, %v7134_v24  ;;  %18300 = vmatmul.mubr.msk.f32.vlgmr.msra.gmra.mrb[86].mxu1 %vm143_vm1, %v20846_v23  ;;  %19118 = vmatprep.subr.bf16.mxu0 %v19470_v0  ;;  %v16891_v19 = vld [vmem:[%s22256_s8 + $0xd] ss:$0 sm:$0xff] }
 0xbef   :  { %18307 = vmatmul.mubr.msk.f32.vlgmr.msra.gmra.mrb[88].mxu0 %vm143_vm1, %v20857_v62  ;;  %19117 = vmatpush3.bf16.msra.mxu1 %v19116_v21  ;;  %v16892_v21 = vld [vmem:[%s22256_s8 + $0xe] ss:$0 sm:$0xff] }
 0xbf0   :  { %v20876_v32 = vadd.f32 %v16841_v29, %v7176_v31  ;;  %19120 = vmatpush3.bf16.msra.mxu0 %v19119_v25  ;;  %18313 = vmatprep.mubr.msk.f32.mxu1 %vm19471_vm0, %v19472_v6 }
 0xbf1   :  { %18320 = vmatprep.mubr.msk.f32.mxu0 %vm19471_vm0, %v19472_v6  ;;  %19121 = vmatprep.subr.bf16.mxu1 %v19470_v0 }
 0xbf2   :  { %18314 = vmatmul.mubr.msk.f32.vlgmr.msra.gmra.mrb[88].mxu1 %vm143_vm1, %v20876_v32  ;;  %19124 = vmatprep.subr.bf16.mxu0 %v19470_v0 }
 0xbf3   :  { %18321 = vmatmul.mubr.msk.f32.vlgmr.msra.gmra.mrb[90].mxu0 %vm143_vm1, %v20789_v45  ;;  %19123 = vmatpush3.bf16.msra.mxu1 %v19122_v11 }
 0xbf4   :  { %19126 = vmatpush3.bf16.msra.mxu0 %v19125_v33  ;;  %18327 = vmatprep.mubr.msk.f32.mxu1 %vm19471_vm0, %v19472_v6  ;;  %v16893_v33 = vld [vmem:[%s22256_s8 + $0xf] ss:$0 sm:$0xff] }
 0xbf5   :  { %18334 = vmatprep.mubr.msk.f32.mxu0 %vm19471_vm0, %v19472_v6  ;;  %19127 = vmatprep.subr.bf16.mxu1 %v19470_v0 }
 0xbf6   :  { %18328 = vmatmul.mubr.msk.f32.vlgmr.msra.gmra.mrb[90].mxu1 %vm143_vm1, %v20809_v4  ;;  %19130 = vmatprep.subr.bf16.mxu0 %v19470_v0 }
 0xbf7   :  { %18335 = vmatmul.mubr.msk.f32.vlgmr.msra.gmra.mrb[92].mxu0 %vm143_vm1, %v20823_v57  ;;  %19129 = vmatpush3.bf16.msra.mxu1 %v19128_v60  ;;  %v16863_v60 = vld [vmem:[%s22257_s2 + $0xf] ss:$0 sm:$0xff] }
 0xbf8   :  { %19132 = vmatpush3.bf16.msra.mxu0 %v19131_v22  ;;  %18341 = vmatprep.mubr.msk.f32.mxu1 %vm19471_vm0, %v19472_v6 }
 0xbf9   :  { %18348 = vmatprep.mubr.msk.f32.mxu0 %vm19471_vm0, %v19472_v6  ;;  %19133 = vmatprep.subr.bf16.mxu1 %v19470_v0 }
 0xbfa   :  { %18342 = vmatmul.mubr.msk.f32.vlgmr.msra.gmra.mrb[92].mxu1 %vm143_vm1, %v20846_v23  ;;  %19136 = vmatprep.subr.bf16.mxu0 %v19470_v0 }
 0xbfb   :  { %18349 = vmatmul.mubr.msk.f32.vlgmr.msra.gmra.mrb[94].mxu0 %vm143_vm1, %v20857_v62  ;;  %19135 = vmatpush3.bf16.msra.mxu1 %v19134_v41 }
 0xbfc   :  { %19138 = vmatpush3.bf16.msra.mxu0 %v19137_v20  ;;  %18355 = vmatprep.mubr.msk.f32.mxu1 %vm19471_vm0, %v19472_v6  ;;  %v16895_v20 = vld [vmem:[%s22256_s8 + $0x11] ss:$0 sm:$0xff] }
 0xbfd   :  { %18362 = vmatprep.mubr.msk.f32.mxu0 %vm19471_vm0, %v19472_v6  ;;  %19139 = vmatprep.subr.bf16.mxu1 %v19470_v0 }
 0xbfe   :  { %18356 = vmatmul.mubr.msk.f32.vlgmr.msra.gmra.mrb[94].mxu1 %vm143_vm1, %v20876_v32  ;;  %19142 = vmatprep.subr.bf16.mxu0 %v19470_v0 }
 0xbff   :  { %18363 = vmatmul.mubr.msk.f32.vlgmr.msra.gmra.mrb[96].mxu0 %vm143_vm1, %v20789_v45  ;;  %19141 = vmatpush3.bf16.msra.mxu1 %v19140_v5  ;;  %v16865_v5 = vld [vmem:[%s22257_s2 + $0x11] ss:$0 sm:$0xff] }
 0xc00   :  { %19144 = vmatpush3.bf16.msra.mxu0 %v19143_v39  ;;  %18369 = vmatprep.mubr.msk.f32.mxu1 %vm19471_vm0, %v19472_v6 }
 0xc01   :  { %18376 = vmatprep.mubr.msk.f32.mxu0 %vm19471_vm0, %v19472_v6  ;;  %19145 = vmatprep.subr.bf16.mxu1 %v19470_v0 }
 0xc02   :  { %18370 = vmatmul.mubr.msk.f32.vlgmr.msra.gmra.mrb[96].mxu1 %vm143_vm1, %v20809_v4  ;;  %19148 = vmatprep.subr.bf16.mxu0 %v19470_v0 }
 0xc03   :  { %18377 = vmatmul.mubr.msk.f32.vlgmr.msra.gmra.mrb[98].mxu0 %vm143_vm1, %v20823_v57  ;;  %19147 = vmatpush3.bf16.msra.mxu1 %v19146_v18  ;;  %v16921_v18 = vld [vmem:[%s22258_s6 + $0xd] ss:$0 sm:$0xff] }
 0xc04   :  { %19150 = vmatpush3.bf16.msra.mxu0 %v19149_v53  ;;  %18383 = vmatprep.mubr.msk.f32.mxu1 %vm19471_vm0, %v19472_v6 }
 0xc05   :  { %18390 = vmatprep.mubr.msk.f32.mxu0 %vm19471_vm0, %v19472_v6  ;;  %19151 = vmatprep.subr.bf16.mxu1 %v19470_v0 }
 0xc06   :  { %18384 = vmatmul.mubr.msk.f32.vlgmr.msra.gmra.mrb[98].mxu1 %vm143_vm1, %v20846_v23  ;;  %18400 = vmatprep.subr.mxu0 %v19472_v6 }
 0xc07   :  { %18391 = vmatmul.mubr.msk.f32.vlgmr.msra.gmra.mrb[100].mxu0 %vm143_vm1, %v20857_v62  ;;  %19153 = vmatpush3.bf16.msra.mxu1 %v19152_v54 }
 0xc08   :  { %18397 = vmatprep.mubr.msk.f32.mxu1 %vm19471_vm0, %v19472_v6  ;;  %18402 = vmatprep.mubr.msk.f32.mxu0 %vm19471_vm0, %v19472_v6 }
 0xc09   :  { %18405 = vmatprep.subr.mxu1 %v19472_v6 }
 0xc0a   :  { %18398 = vmatmul.mubr.msk.f32.vlgmr.msra.gmra.mrb[100].mxu1 %vm143_vm1, %v20876_v32 }
 0xc0b   :  { %18407 = vmatprep.mubr.msk.f32.mxu1 %vm19471_vm0, %v19472_v6 }
 0xcba   :  { %v7344_v56 = vpop.f32.mrb[84].mxu0 }
 0xcbb   :  { %v18280_v59 = vpop.f32.mrb[85].mxu0  ;;  %v7345_v25 = vadd.f32 %v16860_v2, %v7344_v56 }
 0xcbd   :  { %v7417_v51 = vpop.f32.mrb[84].mxu1 }
 0xcbe   :  { %v7490_v63 = vpop.f32.mrb[86].mxu0  ;;  %v18287_v7 = vpop.f32.mrb[85].mxu1  ;;  %v7418_v35 = vadd.f32 %v16861_v26, %v7417_v51 }
 0xcbf   :  { %v18294_v55 = vpop.f32.mrb[87].mxu0  ;;  %v7491_v14 = vadd.f32 %v16862_v49, %v7490_v63 }
 0xcc1   :  { %v7563_v43 = vpop.f32.mrb[86].mxu1 }
 0xcc2   :  { %v7636_v10 = vpop.f32.mrb[88].mxu0  ;;  %v18301_v12 = vpop.f32.mrb[87].mxu1  ;;  %v7564_v28 = vadd.f32 %v16863_v60, %v7563_v43 }
 0xcc3   :  { %v18308_v58 = vpop.f32.mrb[89].mxu0  ;;  %v7637_v30 = vadd.f32 %v16864_v38, %v7636_v10 }
 0xcc5   :  { %v7709_v15 = vpop.f32.mrb[88].mxu1 }
 0xcc6   :  { %v7835_v16 = vpop.f32.mrb[90].mxu0  ;;  %v18315_v17 = vpop.f32.mrb[89].mxu1  ;;  %v7710_v53 = vadd.f32 %v16865_v5, %v7709_v15 }
 0xcc7   :  { %v7836_v48 = vadd.f32 %v16890_v13, %v7835_v16  ;;  %v18322_v61 = vpop.f32.mrb[91].mxu0 }
 0xcc9   :  { %18401 = vmatpush3.xpose.msk.msra.mxu0 %vm1530_vm2, %v7836_v48  ;;  %v7905_v24 = vpop.f32.mrb[90].mxu1 }
 0xcca   :  { %v7906_v27 = vadd.f32 %v16891_v19, %v7905_v24  ;;  %v7975_v29 = vpop.f32.mrb[92].mxu0  ;;  %v18329_v9 = vpop.f32.mrb[91].mxu1  ;;  %18410 = vmatprep.subr.mxu0 %v19472_v6 }
 0xccb   :  { %v7976_v31 = vadd.f32 %v16892_v21, %v7975_v29  ;;  %v18336_v11 = vpop.f32.mrb[93].mxu0 }
 0xccc   :  { %18403 = vmatmul.mubr.msk.f32.vlgmr.msra.gmra.mrb[102].mxu0 %vm1530_vm2, %v7345_v25  ;;  %18406 = vmatpush3.xpose.msk.msra.mxu1 %vm1530_vm2, %v7906_v27 }
 0xccd   :  { %18411 = vmatpush3.xpose.msk.msra.mxu0 %vm1530_vm2, %v7976_v31  ;;  %v8045_v36 = vpop.f32.mrb[92].mxu1  ;;  %18412 = vmatprep.mubr.msk.f32.mxu0 %vm19471_vm0, %v19472_v6 }
 0xcce   :  { %v8046_v22 = vadd.f32 %v16893_v33, %v8045_v36  ;;  %v8115_v8 = vpop.f32.mrb[94].mxu0  ;;  %v18343_v37 = vpop.f32.mrb[93].mxu1  ;;  %18415 = vmatprep.subr.mxu1 %v19472_v6  ;;  %18420 = vmatprep.subr.mxu0 %v19472_v6 }
 0xccf   :  { %v8116_v40 = vadd.f32 %v16894_v34, %v8115_v8  ;;  %v18350_v41 = vpop.f32.mrb[95].mxu0  ;;  %18408 = vmatmul.mubr.msk.f32.vlgmr.msra.gmra.mrb[102].mxu1 %vm1530_vm2, %v7418_v35 }
 0xcd0   :  { %18413 = vmatmul.mubr.msk.f32.vlgmr.msra.gmra.mrb[104].mxu0 %vm1530_vm2, %v7491_v14  ;;  %18416 = vmatpush3.xpose.msk.msra.mxu1 %vm1530_vm2, %v8046_v22 }
 0xcd1   :  { %18421 = vmatpush3.xpose.msk.msra.mxu0 %vm1530_vm2, %v8116_v40  ;;  %v8185_v3 = vpop.f32.mrb[94].mxu1  ;;  %18417 = vmatprep.mubr.msk.f32.mxu1 %vm19471_vm0, %v19472_v6 }
 0xcd2   :  { %v8186_v39 = vadd.f32 %v16895_v20, %v8185_v3  ;;  %v8311_v46 = vpop.f32.mrb[96].mxu0  ;;  %v18357_v44 = vpop.f32.mrb[95].mxu1  ;;  %18422 = vmatprep.mubr.msk.f32.mxu0 %vm19471_vm0, %v19472_v6  ;;  %18425 = vmatprep.subr.mxu1 %v19472_v6 }
 0xcd3   :  { %v8312_v52 = vadd.f32 %v16920_v1, %v8311_v46  ;;  %v18364_v50 = vpop.f32.mrb[97].mxu0  ;;  %18418 = vmatmul.mubr.msk.f32.vlgmr.msra.gmra.mrb[104].mxu1 %vm1530_vm2, %v7564_v28  ;;  %18430 = vmatprep.subr.mxu0 %v19472_v6 }
 0xcd4   :  { %18423 = vmatmul.mubr.msk.f32.vlgmr.msra.gmra.mrb[106].mxu0 %vm1530_vm2, %v7637_v30  ;;  %18426 = vmatpush3.xpose.msk.msra.mxu1 %vm1530_vm2, %v8186_v39 }
 0xcd5   :  { %18431 = vmatpush3.msk.msra.mxu0 %vm2064_vm3, %v8312_v52  ;;  %v8381_v47 = vpop.f32.mrb[96].mxu1  ;;  %18427 = vmatprep.mubr.msk.f32.mxu1 %vm19471_vm0, %v19472_v6 }
 0xcd6   :  { %v8382_v42 = vadd.f32 %v16921_v18, %v8381_v47  ;;  %v21068_v54 = vpop.f32.mrb[98].mxu0  ;;  %v18371_v56 = vpop.f32.mrb[97].mxu1  ;;  %18435 = vmatprep.subr.mxu1 %v19472_v6  ;;  %18432 = vmatprep.mubr.msk.f32.mxu0 %vm19471_vm0, %v19472_v6 }
 0xcd7   :  { %v18378_v59 = vpop.f32.mrb[99].mxu0  ;;  %18428 = vmatmul.mubr.msk.f32.vlgmr.msra.gmra.mrb[106].mxu1 %vm1530_vm2, %v7710_v53  ;;  %18440 = vmatprep.subr.mxu0 %v19472_v6 }
 0xcd8   :  { %18436 = vmatpush3.msk.msra.mxu1 %vm2064_vm3, %v8382_v42  ;;  %18437 = vmatprep.mubr.msk.f32.mxu1 %vm19471_vm0, %v19472_v6 }
 0xcd9   :  { %v21078_v51 = vpop.f32.mrb[98].mxu1  ;;  %18445 = vmatprep.subr.mxu1 %v19472_v6 }
 0xcda   :  { %v21081_v63 = vpop.f32.mrb[100].mxu0  ;;  %v18385_v7 = vpop.f32.mrb[99].mxu1 }
 0xcdb   :  { %v18392_v55 = vpop.f32.mrb[101].mxu0 }
 0xcdd   :  { %v21083_v43 = vpop.f32.mrb[100].mxu1 }
 0xcde   :  { %v18399_v10 = vpop.f32.mrb[101].mxu1 }
 0xd9f   :  { %v8737_v12 = vpop.f32.mrb[102].mxu0 }
 0xda0   :  { %v9121_v58 = vmul.f32 0.35355338, %v8737_v12  ;;  %v18404_v13 = vpop.f32.mrb[103].mxu0 }
 0xda2   :  { %v8813_v15 = vpop.f32.mrb[102].mxu1  ;;  %v9127_v16 = vsel %vm1993_vm4, %v9121_v58, -inf }
 0xda3   :  { %v9122_v17 = vmul.f32 0.35355338, %v8813_v15  ;;  %9128 = vmax.xlane.f32.xlu0 %v9127_v16  ;;  %v8889_v2 = vpop.f32.mrb[104].mxu0  ;;  %v18409_v48 = vpop.f32.mrb[103].mxu1 }
 0xda4   :  { %v9123_v61 = vmul.f32 0.35355338, %v8889_v2  ;;  %v18414_v19 = vpop.f32.mrb[105].mxu0  ;;  %v16922_v48 = vld [vmem:[%s22258_s6 + $0xe] ss:$0 sm:$0xff] }
 0xda5   :  { %v9130_v21 = vsel %vm1993_vm4, %v9122_v17, -inf }
 0xda6   :  { %9131 = vmax.xlane.f32.xlu1 %v9130_v21  ;;  %v8965_v24 = vpop.f32.mrb[104].mxu1  ;;  %v9133_v25 = vsel %vm1993_vm4, %v9123_v61, -inf }
 0xda7   :  { %v9124_v26 = vmul.f32 0.35355338, %v8965_v24  ;;  %9134 = vmax.xlane.f32.xlu0 %v9133_v25  ;;  %v9041_v27 = vpop.f32.mrb[106].mxu0  ;;  %v18419_v29 = vpop.f32.mrb[105].mxu1  ;;  %v8452_v24 = vadd.f32 %v16922_v48, %v21068_v54  ;;  %v16923_v25 = vld [vmem:[%s22258_s6 + $0xf] ss:$0 sm:$0xff] }
 0xda8   :  { %v9125_v9 = vmul.f32 0.35355338, %v9041_v27  ;;  %v18424_v49 = vpop.f32.mrb[107].mxu0  ;;  %v16924_v27 = vld [vmem:[%s22258_s6 + $0x10] ss:$0 sm:$0xff]  ;;  %v8522_v54 = vadd.f32 %v16923_v25, %v21078_v51  ;;  %v17022_v48 = vld [vmem:[%s22255_s0 + $0x120] sm:$0xff] }
 0xda9   :  { %v9136_v31 = vsel %vm1993_vm4, %v9124_v26, -inf  ;;  %v17025_v25 = vld [vmem:[%s22255_s0 + $0x138] sm:$0xff] }
 0xdaa   :  { %9137 = vmax.xlane.f32.xlu1 %v9136_v31  ;;  %v9117_v11 = vpop.f32.mrb[106].mxu1  ;;  %v9139_v33 = vsel %vm1993_vm4, %v9125_v9, -inf  ;;  %v16962_v31 = vld [vmem:[%s22252_s7 + $0x120] sm:$0xff] }
 0xdab   :  { %v9126_v34 = vmul.f32 0.35355338, %v9117_v11  ;;  %9140 = vmax.xlane.f32.xlu0 %v9139_v33  ;;  %v18429_v35 = vpop.f32.mrb[107].mxu1  ;;  %v16963_v11 = vld [vmem:[%s22252_s7 + $0x128] sm:$0xff]  ;;  %v8592_v33 = vadd.f32 %v16924_v27, %v21081_v63  ;;  %v16964_v63 = vld [vmem:[%s22252_s7 + $0x130] sm:$0xff] }
 0xdac   :  { %v17027_v27 = vld [vmem:[%s22255_s0 + $0x148] sm:$0xff] }
 0xdad   :  { %v9142_v36 = vsel %vm1993_vm4, %v9126_v34, -inf }
 0xdae   :  { %9143 = vmax.xlane.f32.xlu1 %v9142_v36 }
 0xe30   :  { %v9129_v14 = vpop.xlane.xlu0 %9128 }
 0xe31   :  { %v9145_v60 = vsub.f32 %v9121_v58, %v9129_v14  ;;  %v19155_v14 = vpack.c.bf16 %v16963_v11, %v16962_v31  ;;  %v17030_v31 = vld [vmem:[%s22255_s0 + $0x160] sm:$0xff]  ;;  %v17031_v11 = vld [vmem:[%s22255_s0 + $0x168] sm:$0xff] }
 0xe33   :  { %v9151_v22 = vmul.f32 1.442695, %v9145_v60  ;;  %v9132_v8 = vpop.xlane.xlu1 %9131  ;;  %v16965_v60 = vld [vmem:[%s22252_s7 + $0x138] sm:$0xff] }
 0xe34   :  { %v9146_v37 = vsub.f32 %v9122_v17, %v9132_v8  ;;  %v9135_v38 = vpop.xlane.xlu0 %9134 }
 0xe35   :  { %19376 = vpow2.f32 %v9151_v22  ;;  %v9147_v40 = vsub.f32 %v9123_v61, %v9135_v38  ;;  %v16967_v38 = vld [vmem:[%s22252_s7 + $0x148] sm:$0xff] }
 0xe36   :  { %v9153_v41 = vmul.f32 1.442695, %v9146_v37  ;;  %v16966_v37 = vld [vmem:[%s22252_s7 + $0x140] sm:$0xff] }
 0xe37   :  { %v9155_v20 = vmul.f32 1.442695, %v9147_v40  ;;  %v9138_v1 = vpop.xlane.xlu1 %9137 }
 0xe38   :  { %19378 = vpow2.f32 %v9153_v41  ;;  %v9148_v28 = vsub.f32 %v9124_v26, %v9138_v1  ;;  %v9141_v3 = vpop.xlane.xlu0 %9140  ;;  %v16968_v1 = vld [vmem:[%s22252_s7 + $0x150] sm:$0xff] }
 0xe39   :  { %19380 = vpow2.f32 %v9155_v20  ;;  %v9149_v30 = vsub.f32 %v9125_v9, %v9141_v3  ;;  %v19161_v20 = vpack.c.bf16 %v16967_v38, %v16966_v37  ;;  %v16970_v3 = vld [vmem:[%s22252_s7 + $0x160] sm:$0xff] }
 0xe3a   :  { %v9157_v5 = vmul.f32 1.442695, %v9148_v28  ;;  %v16969_v28 = vld [vmem:[%s22252_s7 + $0x158] sm:$0xff] }
 0xe3b   :  { %v9159_v39 = vmul.f32 1.442695, %v9149_v30  ;;  %v9144_v46 = vpop.xlane.xlu1 %9143  ;;  %v16971_v30 = vld [vmem:[%s22252_s7 + $0x168] sm:$0xff] }
 0xe3c   :  { %19382 = vpow2.f32 %v9157_v5  ;;  %v9150_v44 = vsub.f32 %v9126_v34, %v9144_v46  ;;  %v16925_v34 = vld [vmem:[%s22258_s6 + $0x11] ss:$0 sm:$0xff]  ;;  %v19164_v5 = vpack.c.bf16 %v16969_v28, %v16968_v1 }
 0xe3d   :  { %19384 = vpow2.f32 %v9159_v39  ;;  %v8662_v22 = vadd.f32 %v16925_v34, %v21083_v43  ;;  %v19158_v43 = vpack.c.bf16 %v16965_v60, %v16964_v63  ;;  %v19167_v39 = vpack.c.bf16 %v16971_v30, %v16970_v3  ;;  %v16972_v46 = vld [vmem:[%s22252_s7 + $0x170] sm:$0xff] }
 0xe3e   :  { %v9161_v52 = vmul.f32 1.442695, %v9150_v44  ;;  %v16973_v44 = vld [vmem:[%s22252_s7 + $0x178] sm:$0xff]  ;;  %v19203_v34 = vpack.c.bf16 %v17031_v11, %v17030_v31  ;;  %v16984_v31 = vld [vmem:[%s22257_s2 + $0x16] ss:$0 sm:$0xff] }
 0xe3f   :  { %v19377_v50 = vpop.eup %19376 }
 0xe40   :  { %19386 = vpow2.f32 %v9161_v52  ;;  %v9163_v18 = vsel %vm1993_vm4, %v19377_v50, 0.0  ;;  %v16992_v52 = vld [vmem:[%s22254_s30 + $0x120] sm:$0xff] }
 0xe41   :  { %9164 = vadd.xlane.f32.xlu0 %v9163_v18  ;;  %v19170_v18 = vpack.c.bf16 %v16973_v44, %v16972_v46 }
 0xe42   :  { %v19379_v53 = vpop.eup %19378 }
 0xe43   :  { %v19381_v47 = vpop.eup %19380  ;;  %v9166_v42 = vsel %vm1993_vm4, %v19379_v53, 0.0 }
 0xe44   :  { %9167 = vadd.xlane.f32.xlu1 %v9166_v42  ;;  %v9169_v56 = vsel %vm1993_vm4, %v19381_v47, 0.0  ;;  %v16995_v42 = vld [vmem:[%s22254_s30 + $0x138] sm:$0xff] }
 0xe45   :  { %9170 = vadd.xlane.f32.xlu0 %v9169_v56  ;;  %v16996_v56 = vld [vmem:[%s22254_s30 + $0x140] sm:$0xff] }
 0xe46   :  { %v19383_v59 = vpop.eup %19382 }
 0xe47   :  { %v19385_v7 = vpop.eup %19384  ;;  %v9172_v55 = vsel %vm1993_vm4, %v19383_v59, 0.0 }
 0xe48   :  { %9173 = vadd.xlane.f32.xlu1 %v9172_v55  ;;  %v9175_v10 = vsel %vm1993_vm4, %v19385_v7, 0.0 }
 0xe49   :  { %9176 = vadd.xlane.f32.xlu0 %v9175_v10  ;;  %v16998_v10 = vld [vmem:[%s22254_s30 + $0x150] sm:$0xff] }
 0xe4a   :  { %v19387_v12 = vpop.eup %19386 }
 0xe4b   :  { %v9178_v58 = vsel %vm1993_vm4, %v19387_v12, 0.0 }
 0xe4c   :  { %9179 = vadd.xlane.f32.xlu1 %v9178_v58  ;;  %v17000_v58 = vld [vmem:[%s22254_s30 + $0x160] sm:$0xff] }
 0xece   :  { %v9165_v13 = vpop.xlane.xlu0 %9164 }
 0xecf   :  { %19388 = vrcp.f32 %v9165_v13  ;;  %v17001_v13 = vld [vmem:[%s22254_s30 + $0x168] sm:$0xff] }
 0xed1   :  { %v9168_v15 = vpop.xlane.xlu1 %9167 }
 0xed2   :  { %19390 = vrcp.f32 %v9168_v15  ;;  %v9171_v16 = vpop.xlane.xlu0 %9170 }
 0xed3   :  { %19392 = vrcp.f32 %v9171_v16  ;;  %v19185_v16 = vpack.c.bf16 %v17001_v13, %v17000_v58 }
 0xed5   :  { %v9174_v17 = vpop.xlane.xlu1 %9173 }
 0xed6   :  { %19394 = vrcp.f32 %v9174_v17  ;;  %v9177_v2 = vpop.xlane.xlu0 %9176  ;;  %v17002_v17 = vld [vmem:[%s22254_s30 + $0x170] sm:$0xff] }
 0xed7   :  { %19396 = vrcp.f32 %v9177_v2  ;;  %v17003_v2 = vld [vmem:[%s22254_s30 + $0x178] sm:$0xff] }
 0xed9   :  { %v19389_v61 = vpop.eup %19388  ;;  %v9180_v19 = vpop.xlane.xlu1 %9179 }
 0xeda   :  { %v9187_v21 = vmul.f32 %v19389_v61, %v19377_v50  ;;  %19398 = vrcp.f32 %v9180_v19  ;;  %v16993_v50 = vld [vmem:[%s22254_s30 + $0x128] sm:$0xff]  ;;  %v19188_v19 = vpack.c.bf16 %v17003_v2, %v17002_v17 }
 0xedb   :  { %v17023_v61 = vld [vmem:[%s22255_s0 + $0x128] sm:$0xff] }
 0xedc   :  { %v19391_v26 = vpop.eup %19390  ;;  %18433 = vmatmul.mubr.msk.f32.vlgmr.msra.gmra.mrb[108].mxu0 %vm2060_vm5, %v9187_v21  ;;  %v19191_v21 = vpack.c.bf16 %v17023_v61, %v17022_v48  ;;  %v16982_v48 = vld [vmem:[%s22257_s2 + $0x14] ss:$0 sm:$0xff] }
 0xedd   :  { %v19393_v29 = vpop.eup %19392  ;;  %v9188_v9 = vmul.f32 %v19391_v26, %v19379_v53  ;;  %18441 = vmatpush3.msk.msra.mxu0 %vm2064_vm3, %v8452_v24  ;;  %18442 = vmatprep.mubr.msk.f32.mxu0 %vm19471_vm0, %v19472_v6  ;;  %v19173_v53 = vpack.c.bf16 %v16993_v50, %v16992_v52  ;;  %v17024_v24 = vld [vmem:[%s22255_s0 + $0x130] sm:$0xff]  ;;  %v17026_v26 = vld [vmem:[%s22255_s0 + $0x140] sm:$0xff] }
 0xede   :  { %v9189_v49 = vmul.f32 %v19393_v29, %v19381_v47  ;;  %18450 = vmatprep.subr.mxu0 %v19472_v6  ;;  %v16994_v47 = vld [vmem:[%s22254_s30 + $0x130] sm:$0xff]  ;;  %v19194_v29 = vpack.c.bf16 %v17025_v25, %v17024_v24 }
 0xedf   :  { %18438 = vmatmul.mubr.msk.f32.vlgmr.msra.gmra.mrb[108].mxu1 %vm2060_vm5, %v9188_v9  ;;  %v19197_v9 = vpack.c.bf16 %v17027_v27, %v17026_v26  ;;  %v17014_v24 = vld [vmem:[%s22256_s8 + $0x16] ss:$0 sm:$0xff] }
 0xee0   :  { %v19395_v51 = vpop.eup %19394  ;;  %18443 = vmatmul.mubr.msk.f32.vlgmr.msra.gmra.mrb[110].mxu0 %vm2060_vm5, %v9189_v49  ;;  %18446 = vmatpush3.msk.msra.mxu1 %vm2064_vm3, %v8522_v54  ;;  %v17028_v54 = vld [vmem:[%s22255_s0 + $0x150] sm:$0xff]  ;;  %v17029_v49 = vld [vmem:[%s22255_s0 + $0x158] sm:$0xff] }
 0xee1   :  { %v19397_v35 = vpop.eup %19396  ;;  %v9190_v36 = vmul.f32 %v19395_v51, %v19383_v59  ;;  %18451 = vmatpush3.msk.msra.mxu0 %vm2064_vm3, %v8592_v33  ;;  %18447 = vmatprep.mubr.msk.f32.mxu1 %vm19471_vm0, %v19472_v6  ;;  %v16997_v59 = vld [vmem:[%s22254_s30 + $0x148] sm:$0xff]  ;;  %v19200_v33 = vpack.c.bf16 %v17029_v49, %v17028_v54  ;;  %v17032_v51 = vld [vmem:[%s22255_s0 + $0x170] sm:$0xff] }
 0xee2   :  { %v9191_v8 = vmul.f32 %v19397_v35, %v19385_v7  ;;  %18452 = vmatprep.mubr.msk.f32.mxu0 %vm19471_vm0, %v19472_v6  ;;  %18455 = vmatprep.subr.mxu1 %v19472_v6  ;;  %v19176_v7 = vpack.c.bf16 %v16995_v42, %v16994_v47  ;;  %v19179_v55 = vpack.c.bf16 %v16997_v59, %v16996_v56  ;;  %v17033_v35 = vld [vmem:[%s22255_s0 + $0x178] sm:$0xff]  ;;  %v16980_v59 = vld [vmem:[%s22257_s2 + $0x12] ss:$0 sm:$0xff] }
 0xee3   :  { %18448 = vmatmul.mubr.msk.f32.vlgmr.msra.gmra.mrb[110].mxu1 %vm2060_vm5, %v9190_v36  ;;  %19154 = vmatprep.subr.bf16.mxu0 %v19470_v0  ;;  %v19206_v36 = vpack.c.bf16 %v17033_v35, %v17032_v51  ;;  %v17040_v51 = vld [vmem:[%s22258_s6 + $0x12] ss:$0 sm:$0xff] }
 0xee4   :  { %v19399_v40 = vpop.eup %19398  ;;  %18453 = vmatmul.mubr.msk.f32.vlgmr.msra.gmra.mrb[112].mxu0 %vm2060_vm5, %v9191_v8  ;;  %18456 = vmatpush3.msk.msra.mxu1 %vm2064_vm3, %v8662_v22 }
 0xee5   :  { %v9192_v41 = vmul.f32 %v19399_v40, %v19387_v12  ;;  %19156 = vmatpush3.bf16.msra.mxu0 %v19155_v14  ;;  %18457 = vmatprep.mubr.msk.f32.mxu1 %vm19471_vm0, %v19472_v6  ;;  %v16999_v12 = vld [vmem:[%s22254_s30 + $0x158] sm:$0xff] }
 0xee6   :  { %18464 = vmatprep.mubr.msk.f32.mxu0 %vm19471_vm0, %v19472_v6  ;;  %19157 = vmatprep.subr.bf16.mxu1 %v19470_v0  ;;  %v19182_v15 = vpack.c.bf16 %v16999_v12, %v16998_v10  ;;  %v17011_v10 = vld [vmem:[%s22256_s8 + $0x13] ss:$0 sm:$0xff]  ;;  %v17012_v12 = vld [vmem:[%s22256_s8 + $0x14] ss:$0 sm:$0xff] }
 0xee7   :  { %18458 = vmatmul.mubr.msk.f32.vlgmr.msra.gmra.mrb[112].mxu1 %vm2060_vm5, %v9192_v41  ;;  %19160 = vmatprep.subr.bf16.mxu0 %v19470_v0 }
 0xee8   :  { %18465 = vmatmul.mubr.msk.f32.vlgmr.msra.gmra.mrb[114].mxu0 %vm143_vm1, %v20789_v45  ;;  %19159 = vmatpush3.bf16.msra.mxu1 %v19158_v43 }
 0xee9   :  { %19162 = vmatpush3.bf16.msra.mxu0 %v19161_v20  ;;  %18471 = vmatprep.mubr.msk.f32.mxu1 %vm19471_vm0, %v19472_v6 }
 0xeea   :  { %18478 = vmatprep.mubr.msk.f32.mxu0 %vm19471_vm0, %v19472_v6  ;;  %19163 = vmatprep.subr.bf16.mxu1 %v19470_v0 }
 0xeeb   :  { %18472 = vmatmul.mubr.msk.f32.vlgmr.msra.gmra.mrb[114].mxu1 %vm143_vm1, %v20809_v4  ;;  %19166 = vmatprep.subr.bf16.mxu0 %v19470_v0 }
 0xeec   :  { %18479 = vmatmul.mubr.msk.f32.vlgmr.msra.gmra.mrb[116].mxu0 %vm143_vm1, %v20823_v57  ;;  %19165 = vmatpush3.bf16.msra.mxu1 %v19164_v5 }
 0xeed   :  { %19168 = vmatpush3.bf16.msra.mxu0 %v19167_v39  ;;  %18485 = vmatprep.mubr.msk.f32.mxu1 %vm19471_vm0, %v19472_v6 }
 0xeee   :  { %18492 = vmatprep.mubr.msk.f32.mxu0 %vm19471_vm0, %v19472_v6  ;;  %19169 = vmatprep.subr.bf16.mxu1 %v19470_v0 }
 0xeef   :  { %18486 = vmatmul.mubr.msk.f32.vlgmr.msra.gmra.mrb[116].mxu1 %vm143_vm1, %v20846_v23  ;;  %19172 = vmatprep.subr.bf16.mxu0 %v19470_v0 }
 0xef0   :  { %18493 = vmatmul.mubr.msk.f32.vlgmr.msra.gmra.mrb[118].mxu0 %vm143_vm1, %v20857_v62  ;;  %19171 = vmatpush3.bf16.msra.mxu1 %v19170_v18 }
 0xef1   :  { %19174 = vmatpush3.bf16.msra.mxu0 %v19173_v53  ;;  %18499 = vmatprep.mubr.msk.f32.mxu1 %vm19471_vm0, %v19472_v6  ;;  %v17010_v53 = vld [vmem:[%s22256_s8 + $0x12] ss:$0 sm:$0xff] }
 0xef2   :  { %18506 = vmatprep.mubr.msk.f32.mxu0 %vm19471_vm0, %v19472_v6  ;;  %19175 = vmatprep.subr.bf16.mxu1 %v19470_v0 }
 0xef3   :  { %18500 = vmatmul.mubr.msk.f32.vlgmr.msra.gmra.mrb[118].mxu1 %vm143_vm1, %v20876_v32  ;;  %19178 = vmatprep.subr.bf16.mxu0 %v19470_v0 }
 0xef4   :  { %18507 = vmatmul.mubr.msk.f32.vlgmr.msra.gmra.mrb[120].mxu0 %vm143_vm1, %v20789_v45  ;;  %19177 = vmatpush3.bf16.msra.mxu1 %v19176_v7 }
 0xef5   :  { %19180 = vmatpush3.bf16.msra.mxu0 %v19179_v55  ;;  %18513 = vmatprep.mubr.msk.f32.mxu1 %vm19471_vm0, %v19472_v6 }
 0xef6   :  { %18520 = vmatprep.mubr.msk.f32.mxu0 %vm19471_vm0, %v19472_v6  ;;  %19181 = vmatprep.subr.bf16.mxu1 %v19470_v0 }
 0xef7   :  { %18514 = vmatmul.mubr.msk.f32.vlgmr.msra.gmra.mrb[120].mxu1 %vm143_vm1, %v20809_v4  ;;  %19184 = vmatprep.subr.bf16.mxu0 %v19470_v0 }
 0xef8   :  { %18521 = vmatmul.mubr.msk.f32.vlgmr.msra.gmra.mrb[122].mxu0 %vm143_vm1, %v20823_v57  ;;  %19183 = vmatpush3.bf16.msra.mxu1 %v19182_v15  ;;  %v16981_v15 = vld [vmem:[%s22257_s2 + $0x13] ss:$0 sm:$0xff] }
 0xef9   :  { %19186 = vmatpush3.bf16.msra.mxu0 %v19185_v16  ;;  %18527 = vmatprep.mubr.msk.f32.mxu1 %vm19471_vm0, %v19472_v6 }
 0xefa   :  { %18534 = vmatprep.mubr.msk.f32.mxu0 %vm19471_vm0, %v19472_v6  ;;  %19187 = vmatprep.subr.bf16.mxu1 %v19470_v0 }
 0xefb   :  { %18528 = vmatmul.mubr.msk.f32.vlgmr.msra.gmra.mrb[122].mxu1 %vm143_vm1, %v20846_v23  ;;  %19190 = vmatprep.subr.bf16.mxu0 %v19470_v0 }
 0xefc   :  { %18535 = vmatmul.mubr.msk.f32.vlgmr.msra.gmra.mrb[124].mxu0 %vm143_vm1, %v20857_v62  ;;  %19189 = vmatpush3.bf16.msra.mxu1 %v19188_v19 }
 0xefd   :  { %19192 = vmatpush3.bf16.msra.mxu0 %v19191_v21  ;;  %18541 = vmatprep.mubr.msk.f32.mxu1 %vm19471_vm0, %v19472_v6  ;;  %v17013_v21 = vld [vmem:[%s22256_s8 + $0x15] ss:$0 sm:$0xff] }
 0xefe   :  { %18548 = vmatprep.mubr.msk.f32.mxu0 %vm19471_vm0, %v19472_v6  ;;  %19193 = vmatprep.subr.bf16.mxu1 %v19470_v0 }
 0xeff   :  { %18542 = vmatmul.mubr.msk.f32.vlgmr.msra.gmra.mrb[124].mxu1 %vm143_vm1, %v20876_v32  ;;  %19196 = vmatprep.subr.bf16.mxu0 %v19470_v0 }
 0xf00   :  { %18549 = vmatmul.mubr.msk.f32.vlgmr.msra.gmra.mrb[126].mxu0 %vm143_vm1, %v20789_v45  ;;  %19195 = vmatpush3.bf16.msra.mxu1 %v19194_v29  ;;  %v16983_v29 = vld [vmem:[%s22257_s2 + $0x15] ss:$0 sm:$0xff] }
 0xf01   :  { %19198 = vmatpush3.bf16.msra.mxu0 %v19197_v9  ;;  %18555 = vmatprep.mubr.msk.f32.mxu1 %vm19471_vm0, %v19472_v6 }
 0xf02   :  { %18562 = vmatprep.mubr.msk.f32.mxu0 %vm19471_vm0, %v19472_v6  ;;  %19199 = vmatprep.subr.bf16.mxu1 %v19470_v0 }
 0xf03   :  { %18556 = vmatmul.mubr.msk.f32.vlgmr.msra.gmra.mrb[126].mxu1 %vm143_vm1, %v20809_v4  ;;  %19202 = vmatprep.subr.bf16.mxu0 %v19470_v0 }
 0xf04   :  { %18563 = vmatmul.mubr.msk.f32.vlgmr.msra.gmra.mrb[128].mxu0 %vm143_vm1, %v20823_v57  ;;  %19201 = vmatpush3.bf16.msra.mxu1 %v19200_v33 }
 0xf05   :  { %19204 = vmatpush3.bf16.msra.mxu0 %v19203_v34  ;;  %18569 = vmatprep.mubr.msk.f32.mxu1 %vm19471_vm0, %v19472_v6  ;;  %v17015_v34 = vld [vmem:[%s22256_s8 + $0x17] ss:$0 sm:$0xff]  ;;  %s22264_s8 = sld [smem:[#allocation15_spill]] }
 0xf06   :  { %18576 = vmatprep.mubr.msk.f32.mxu0 %vm19471_vm0, %v19472_v6  ;;  %19205 = vmatprep.subr.bf16.mxu1 %v19470_v0 }
 0xf07   :  { %18570 = vmatmul.mubr.msk.f32.vlgmr.msra.gmra.mrb[128].mxu1 %vm143_vm1, %v20846_v23  ;;  %18586 = vmatprep.subr.mxu0 %v19472_v6 }
 0xf08   :  { %18577 = vmatmul.mubr.msk.f32.vlgmr.msra.gmra.mrb[130].mxu0 %vm143_vm1, %v20857_v62  ;;  %19207 = vmatpush3.bf16.msra.mxu1 %v19206_v36 }
 0xf09   :  { %18583 = vmatprep.mubr.msk.f32.mxu1 %vm19471_vm0, %v19472_v6  ;;  %18588 = vmatprep.mubr.msk.f32.mxu0 %vm19471_vm0, %v19472_v6 }
 0xf0a   :  { %18591 = vmatprep.subr.mxu1 %v19472_v6 }
 0xf0b   :  { %18584 = vmatmul.mubr.msk.f32.vlgmr.msra.gmra.mrb[130].mxu1 %vm143_vm1, %v20876_v32 }
 0xf0c   :  { %18593 = vmatprep.mubr.msk.f32.mxu1 %vm19471_vm0, %v19472_v6 }
 0xfaf   :  { %v21337_v14 = vpop.f32.mrb[108].mxu0 }
 0xfb0   :  { %v18434_v63 = vpop.f32.mrb[109].mxu0 }
 0xfb2   :  { %v21339_v60 = vpop.f32.mrb[108].mxu1 }
 0xfb3   :  { %v21341_v22 = vpop.f32.mrb[110].mxu0  ;;  %v18439_v8 = vpop.f32.mrb[109].mxu1 }
 0xfb4   :  { %v18444_v37 = vpop.f32.mrb[111].mxu0  ;;  %v16985_v8 = vld [vmem:[%s22257_s2 + $0x17] ss:$0 sm:$0xff] }
 0xfb6   :  { %v21343_v38 = vpop.f32.mrb[110].mxu1 }
 0xfb7   :  { %v21345_v40 = vpop.f32.mrb[112].mxu0  ;;  %v18449_v43 = vpop.f32.mrb[111].mxu1 }
 0xfb8   :  { %v18454_v41 = vpop.f32.mrb[113].mxu0 }
 0xfba   :  { %v21347_v20 = vpop.f32.mrb[112].mxu1 }
 0xfbb   :  { %v9778_v1 = vpop.f32.mrb[114].mxu0  ;;  %v18459_v28 = vpop.f32.mrb[113].mxu1 }
 0xfbc   :  { %v18466_v3 = vpop.f32.mrb[115].mxu0  ;;  %v9779_v13 = vadd.f32 %v16980_v59, %v9778_v1 }
 0xfbd   :  { %v17041_v3 = vld [vmem:[%s22258_s6 + $0x13] ss:$0 sm:$0xff] }
 0xfbe   :  { %v9848_v30 = vpop.f32.mrb[114].mxu1 }
 0xfbf   :  { %v9918_v5 = vpop.f32.mrb[116].mxu0  ;;  %v18473_v39 = vpop.f32.mrb[115].mxu1  ;;  %v9849_v25 = vadd.f32 %v16981_v15, %v9848_v30 }
 0xfc0   :  { %v18480_v46 = vpop.f32.mrb[117].mxu0  ;;  %v9919_v27 = vadd.f32 %v16982_v48, %v9918_v5 }
 0xfc2   :  { %v9988_v44 = vpop.f32.mrb[116].mxu1 }
 0xfc3   :  { %v10058_v52 = vpop.f32.mrb[118].mxu0  ;;  %v18487_v50 = vpop.f32.mrb[117].mxu1  ;;  %v9989_v35 = vadd.f32 %v16983_v29, %v9988_v44 }
 0xfc4   :  { %v18494_v18 = vpop.f32.mrb[119].mxu0  ;;  %v10059_v63 = vadd.f32 %v16984_v31, %v10058_v52 }
 0xfc6   :  { %v10128_v47 = vpop.f32.mrb[118].mxu1 }
 0xfc7   :  { %v10254_v42 = vpop.f32.mrb[120].mxu0  ;;  %v18501_v56 = vpop.f32.mrb[119].mxu1  ;;  %v10129_v30 = vadd.f32 %v16985_v8, %v10128_v47 }
 0xfc8   :  { %v10255_v7 = vadd.f32 %v17010_v53, %v10254_v42  ;;  %v18508_v55 = vpop.f32.mrb[121].mxu0 }
 0xfca   :  { %18587 = vmatpush3.xpose.msk.msra.mxu0 %vm1530_vm2, %v10255_v7  ;;  %v10324_v58 = vpop.f32.mrb[120].mxu1 }
 0xfcb   :  { %v10325_v16 = vadd.f32 %v17011_v10, %v10324_v58  ;;  %v10394_v17 = vpop.f32.mrb[122].mxu0  ;;  %v18515_v2 = vpop.f32.mrb[121].mxu1  ;;  %18596 = vmatprep.subr.mxu0 %v19472_v6 }
 0xfcc   :  { %v10395_v61 = vadd.f32 %v17012_v12, %v10394_v17  ;;  %v18522_v19 = vpop.f32.mrb[123].mxu0 }
 0xfcd   :  { %18589 = vmatmul.mubr.msk.f32.vlgmr.msra.gmra.mrb[132].mxu0 %vm1530_vm2, %v9779_v13  ;;  %18592 = vmatpush3.xpose.msk.msra.mxu1 %vm1530_vm2, %v10325_v16 }
 0xfce   :  { %18597 = vmatpush3.xpose.msk.msra.mxu0 %vm1530_vm2, %v10395_v61  ;;  %v10464_v26 = vpop.f32.mrb[122].mxu1  ;;  %18598 = vmatprep.mubr.msk.f32.mxu0 %vm19471_vm0, %v19472_v6 }
 0xfcf   :  { %v10465_v9 = vadd.f32 %v17013_v21, %v10464_v26  ;;  %v10534_v54 = vpop.f32.mrb[124].mxu0  ;;  %v18529_v49 = vpop.f32.mrb[123].mxu1  ;;  %18601 = vmatprep.subr.mxu1 %v19472_v6  ;;  %18606 = vmatprep.subr.mxu0 %v19472_v6 }
 0xfd0   :  { %v10535_v11 = vadd.f32 %v17014_v24, %v10534_v54  ;;  %v18536_v33 = vpop.f32.mrb[125].mxu0  ;;  %18594 = vmatmul.mubr.msk.f32.vlgmr.msra.gmra.mrb[132].mxu1 %vm1530_vm2, %v9849_v25 }
 0xfd1   :  { %18599 = vmatmul.mubr.msk.f32.vlgmr.msra.gmra.mrb[134].mxu0 %vm1530_vm2, %v9919_v27  ;;  %18602 = vmatpush3.xpose.msk.msra.mxu1 %vm1530_vm2, %v10465_v9 }
 0xfd2   :  { %18607 = vmatpush3.xpose.msk.msra.mxu0 %vm1530_vm2, %v10535_v11  ;;  %v10604_v36 = vpop.f32.mrb[124].mxu1  ;;  %18603 = vmatprep.mubr.msk.f32.mxu1 %vm19471_vm0, %v19472_v6 }
 0xfd3   :  { %v10605_v37 = vadd.f32 %v17015_v34, %v10604_v36  ;;  %v10730_v43 = vpop.f32.mrb[126].mxu0  ;;  %v18543_v41 = vpop.f32.mrb[125].mxu1  ;;  %18608 = vmatprep.mubr.msk.f32.mxu0 %vm19471_vm0, %v19472_v6  ;;  %18611 = vmatprep.subr.mxu1 %v19472_v6 }
 0xfd4   :  { %v10731_v1 = vadd.f32 %v17040_v51, %v10730_v43  ;;  %v18550_v28 = vpop.f32.mrb[127].mxu0  ;;  %18604 = vmatmul.mubr.msk.f32.vlgmr.msra.gmra.mrb[134].mxu1 %vm1530_vm2, %v9989_v35  ;;  %18616 = vmatprep.subr.mxu0 %v19472_v6 }
 0xfd5   :  { %18609 = vmatmul.mubr.msk.f32.vlgmr.msra.gmra.mrb[136].mxu0 %vm1530_vm2, %v10059_v63  ;;  %18612 = vmatpush3.xpose.msk.msra.mxu1 %vm1530_vm2, %v10605_v37 }
 0xfd6   :  { %18617 = vmatpush3.msk.msra.mxu0 %vm2064_vm3, %v10731_v1  ;;  %v10800_v5 = vpop.f32.mrb[126].mxu1  ;;  %18613 = vmatprep.mubr.msk.f32.mxu1 %vm19471_vm0, %v19472_v6 }
 0xfd7   :  { %v10801_v39 = vadd.f32 %v17041_v3, %v10800_v5  ;;  %v21416_v46 = vpop.f32.mrb[128].mxu0  ;;  %v18557_v44 = vpop.f32.mrb[127].mxu1  ;;  %18621 = vmatprep.subr.mxu1 %v19472_v6  ;;  %18618 = vmatprep.mubr.msk.f32.mxu0 %vm19471_vm0, %v19472_v6 }
 0xfd8   :  { %v18564_v52 = vpop.f32.mrb[129].mxu0  ;;  %18614 = vmatmul.mubr.msk.f32.vlgmr.msra.gmra.mrb[136].mxu1 %vm1530_vm2, %v10129_v30  ;;  %18626 = vmatprep.subr.mxu0 %v19472_v6 }
 0xfd9   :  { %18622 = vmatpush3.msk.msra.mxu1 %vm2064_vm3, %v10801_v39  ;;  %18623 = vmatprep.mubr.msk.f32.mxu1 %vm19471_vm0, %v19472_v6 }
 0xfda   :  { %v21426_v50 = vpop.f32.mrb[128].mxu1  ;;  %18631 = vmatprep.subr.mxu1 %v19472_v6 }
 0xfdb   :  { %v21429_v18 = vpop.f32.mrb[130].mxu0  ;;  %v18571_v53 = vpop.f32.mrb[129].mxu1 }
 0xfdc   :  { %v18578_v47 = vpop.f32.mrb[131].mxu0 }
 0xfde   :  { %v21431_v42 = vpop.f32.mrb[130].mxu1 }
 0xfdf   :  { %v18585_v56 = vpop.f32.mrb[131].mxu1 }
0x10a0   :  { %v11156_v59 = vpop.f32.mrb[132].mxu0 }
0x10a1   :  { %v11540_v7 = vmul.f32 0.35355338, %v11156_v59  ;;  %v18590_v55 = vpop.f32.mrb[133].mxu0 }
0x10a3   :  { %v11232_v10 = vpop.f32.mrb[132].mxu1  ;;  %v11546_v12 = vsel %vm1993_vm4, %v11540_v7, -inf }
0x10a4   :  { %v11541_v58 = vmul.f32 0.35355338, %v11232_v10  ;;  %11547 = vmax.xlane.f32.xlu0 %v11546_v12  ;;  %v11308_v13 = vpop.f32.mrb[134].mxu0  ;;  %v18595_v15 = vpop.f32.mrb[133].mxu1 }
0x10a5   :  { %v11542_v16 = vmul.f32 0.35355338, %v11308_v13  ;;  %v18600_v17 = vpop.f32.mrb[135].mxu0 }
0x10a6   :  { %v11549_v2 = vsel %vm1993_vm4, %v11541_v58, -inf }
0x10a7   :  { %11550 = vmax.xlane.f32.xlu1 %v11549_v2  ;;  %v11384_v48 = vpop.f32.mrb[134].mxu1  ;;  %v11552_v61 = vsel %vm1993_vm4, %v11542_v16, -inf }
0x10a8   :  { %v11543_v19 = vmul.f32 0.35355338, %v11384_v48  ;;  %11553 = vmax.xlane.f32.xlu0 %v11552_v61  ;;  %v11460_v21 = vpop.f32.mrb[136].mxu0  ;;  %v18605_v24 = vpop.f32.mrb[135].mxu1 }
0x10a9   :  { %v11544_v25 = vmul.f32 0.35355338, %v11460_v21  ;;  %v18610_v26 = vpop.f32.mrb[137].mxu0 }
0x10aa   :  { %v11555_v27 = vsel %vm1993_vm4, %v11543_v19, -inf }
0x10ab   :  { %11556 = vmax.xlane.f32.xlu1 %v11555_v27  ;;  %v11536_v29 = vpop.f32.mrb[136].mxu1  ;;  %v11558_v9 = vsel %vm1993_vm4, %v11544_v25, -inf  ;;  %v17043_v27 = vld [vmem:[%s22258_s6 + $0x15] ss:$0 sm:$0xff] }
0x10ac   :  { %v11545_v54 = vmul.f32 0.35355338, %v11536_v29  ;;  %11559 = vmax.xlane.f32.xlu0 %v11558_v9  ;;  %v18615_v49 = vpop.f32.mrb[137].mxu1  ;;  %v17044_v9 = vld [vmem:[%s22258_s6 + $0x16] ss:$0 sm:$0xff] }
0x10ae   :  { %v11561_v31 = vsel %vm1993_vm4, %v11545_v54, -inf }
0x10af   :  { %11562 = vmax.xlane.f32.xlu1 %v11561_v31 }
0x1131   :  { %v11548_v11 = vpop.xlane.xlu0 %11547 }
0x1132   :  { %v11564_v33 = vsub.f32 %v11540_v7, %v11548_v11  ;;  %v11011_v11 = vadd.f32 %v17044_v9, %v21429_v18  ;;  %v17101_v9 = vld [vmem:[%s22260_s5 + $0x7] ss:$0 sm:$0xff] }
0x1134   :  { %v11570_v34 = vmul.f32 1.442695, %v11564_v33  ;;  %v11551_v51 = vpop.xlane.xlu1 %11550  ;;  %v17045_v33 = vld [vmem:[%s22258_s6 + $0x17] ss:$0 sm:$0xff] }
0x1135   :  { %v11565_v35 = vsub.f32 %v11541_v58, %v11551_v51  ;;  %v11554_v36 = vpop.xlane.xlu0 %11553 }
0x1136   :  { %19400 = vpow2.f32 %v11570_v34  ;;  %v11566_v63 = vsub.f32 %v11542_v16, %v11554_v36 }
0x1137   :  { %v11572_v8 = vmul.f32 1.442695, %v11565_v35 }
0x1138   :  { %v11574_v37 = vmul.f32 1.442695, %v11566_v63  ;;  %v11557_v43 = vpop.xlane.xlu1 %11556 }
0x1139   :  { %19402 = vpow2.f32 %v11572_v8  ;;  %v11567_v41 = vsub.f32 %v11543_v19, %v11557_v43  ;;  %v11560_v1 = vpop.xlane.xlu0 %11559  ;;  %v17042_v19 = vld [vmem:[%s22258_s6 + $0x14] ss:$0 sm:$0xff]  ;;  %v17077_v8 = vld [vmem:[%s22259_s1 + $0x98] sm:$0xff] }
0x113a   :  { %19404 = vpow2.f32 %v11574_v37  ;;  %v11568_v28 = vsub.f32 %v11544_v25, %v11560_v1  ;;  %v10871_v26 = vadd.f32 %v17042_v19, %v21416_v46  ;;  %v10941_v46 = vadd.f32 %v17043_v27, %v21426_v50  ;;  %v17078_v37 = vld [vmem:[%s22259_s1 + $0xa0] sm:$0xff]  ;;  %v17079_v1 = vld [vmem:[%s22259_s1 + $0xa8] sm:$0xff] }
0x113b   :  { %v11576_v3 = vmul.f32 1.442695, %v11567_v41  ;;  %v11081_v50 = vadd.f32 %v17045_v33, %v21431_v42  ;;  %v17076_v42 = vld [vmem:[%s22259_s1 + $0x90] sm:$0xff] }
0x113c   :  { %v11578_v30 = vmul.f32 1.442695, %v11568_v28  ;;  %v11563_v5 = vpop.xlane.xlu1 %11562 }
0x113d   :  { %19406 = vpow2.f32 %v11576_v3  ;;  %v11569_v39 = vsub.f32 %v11545_v54, %v11563_v5  ;;  %v17080_v3 = vld [vmem:[%s22259_s1 + $0xb0] sm:$0xff] }
0x113e   :  { %19408 = vpow2.f32 %v11578_v30 }
0x113f   :  { %v11580_v44 = vmul.f32 1.442695, %v11569_v39 }
0x1140   :  { %v19401_v52 = vpop.eup %19400 }
0x1141   :  { %19410 = vpow2.f32 %v11580_v44  ;;  %v11582_v53 = vsel %vm1993_vm4, %v19401_v52, 0.0  ;;  %v17081_v44 = vld [vmem:[%s22259_s1 + $0xb8] sm:$0xff] }
0x1142   :  { %11583 = vadd.xlane.f32.xlu0 %v11582_v53  ;;  %v16956_v53 = vld [vmem:[%s22259_s1 + $0x60] sm:$0xff] }
0x1143   :  { %v19403_v47 = vpop.eup %19402 }
0x1144   :  { %v19405_v56 = vpop.eup %19404  ;;  %v11585_v59 = vsel %vm1993_vm4, %v19403_v47, 0.0 }
0x1145   :  { %11586 = vadd.xlane.f32.xlu1 %v11585_v59  ;;  %v11588_v7 = vsel %vm1993_vm4, %v19405_v56, 0.0 }
0x1146   :  { %11589 = vadd.xlane.f32.xlu0 %v11588_v7  ;;  %v16957_v7 = vld [vmem:[%s22259_s1 + $0x68] sm:$0xff] }
0x1147   :  { %v19407_v55 = vpop.eup %19406 }
0x1148   :  { %v19409_v10 = vpop.eup %19408  ;;  %v11591_v12 = vsel %vm1993_vm4, %v19407_v55, 0.0 }
0x1149   :  { %11592 = vadd.xlane.f32.xlu1 %v11591_v12  ;;  %v11594_v58 = vsel %vm1993_vm4, %v19409_v10, 0.0 }
0x114a   :  { %11595 = vadd.xlane.f32.xlu0 %v11594_v58  ;;  %v16959_v58 = vld [vmem:[%s22259_s1 + $0x78] sm:$0xff] }
0x114b   :  { %v19411_v13 = vpop.eup %19410 }
0x114c   :  { %v11597_v15 = vsel %vm1993_vm4, %v19411_v13, 0.0 }
0x114d   :  { %11598 = vadd.xlane.f32.xlu1 %v11597_v15 }
0x11cf   :  { %v11584_v16 = vpop.xlane.xlu0 %11583 }
0x11d0   :  { %19412 = vrcp.f32 %v11584_v16 }
0x11d2   :  { %v11587_v17 = vpop.xlane.xlu1 %11586 }
0x11d3   :  { %19414 = vrcp.f32 %v11587_v17  ;;  %v11590_v2 = vpop.xlane.xlu0 %11589 }
0x11d4   :  { %19416 = vrcp.f32 %v11590_v2 }
0x11d6   :  { %v11593_v48 = vpop.xlane.xlu1 %11592 }
0x11d7   :  { %19418 = vrcp.f32 %v11593_v48  ;;  %v11596_v61 = vpop.xlane.xlu0 %11595 }
0x11d8   :  { %19420 = vrcp.f32 %v11596_v61 }
0x11da   :  { %v19413_v21 = vpop.eup %19412  ;;  %v11599_v24 = vpop.xlane.xlu1 %11598 }
0x11db   :  { %v11606_v25 = vmul.f32 %v19413_v21, %v19401_v52  ;;  %19422 = vrcp.f32 %v11599_v24  ;;  %v17100_v24 = vld [vmem:[%s22260_s5 + $0x6] ss:$0 sm:$0xff] }
0x11dd   :  { %v19415_v29 = vpop.eup %19414  ;;  %18619 = vmatmul.mubr.msk.f32.vlgmr.msra.gmra.mrb[138].mxu0 %vm2060_vm5, %v11606_v25 }
0x11de   :  { %v19417_v54 = vpop.eup %19416  ;;  %v11607_v49 = vmul.f32 %v19415_v29, %v19403_v47  ;;  %18627 = vmatpush3.msk.msra.mxu0 %vm2064_vm3, %v10871_v26  ;;  %18628 = vmatprep.mubr.msk.f32.mxu0 %vm19471_vm0, %v19472_v6 }
0x11df   :  { %v11608_v31 = vmul.f32 %v19417_v54, %v19405_v56  ;;  %18636 = vmatprep.subr.mxu0 %v19472_v6 }
0x11e0   :  { %18624 = vmatmul.mubr.msk.f32.vlgmr.msra.gmra.mrb[138].mxu1 %vm2060_vm5, %v11607_v49 }
0x11e1   :  { %v19419_v34 = vpop.eup %19418  ;;  %18629 = vmatmul.mubr.msk.f32.vlgmr.msra.gmra.mrb[140].mxu0 %vm2060_vm5, %v11608_v31  ;;  %18632 = vmatpush3.msk.msra.mxu1 %vm2064_vm3, %v10941_v46 }
0x11e2   :  { %v19421_v51 = vpop.eup %19420  ;;  %v11609_v35 = vmul.f32 %v19419_v34, %v19407_v55  ;;  %18637 = vmatpush3.msk.msra.mxu0 %vm2064_vm3, %v11011_v11  ;;  %18633 = vmatprep.mubr.msk.f32.mxu1 %vm19471_vm0, %v19472_v6 }
0x11e3   :  { %v11610_v18 = vmul.f32 %v19421_v51, %v19409_v10  ;;  %18638 = vmatprep.mubr.msk.f32.mxu0 %vm19471_vm0, %v19472_v6  ;;  %18641 = vmatprep.subr.mxu1 %v19472_v6  ;;  %v16958_v10 = vld [vmem:[%s22259_s1 + $0x70] sm:$0xff] }
0x11e4   :  { %18634 = vmatmul.mubr.msk.f32.vlgmr.msra.gmra.mrb[140].mxu1 %vm2060_vm5, %v11609_v35  ;;  %18646 = vmatprep.subr.mxu0 %v19472_v6 }
0x11e5   :  { %v19423_v36 = vpop.eup %19422  ;;  %18639 = vmatmul.mubr.msk.f32.vlgmr.msra.gmra.mrb[142].mxu0 %vm2060_vm5, %v11610_v18  ;;  %18642 = vmatpush3.msk.msra.mxu1 %vm2064_vm3, %v11081_v50 }
0x11e6   :  { %v11611_v63 = vmul.f32 %v19423_v36, %v19411_v13  ;;  %18643 = vmatprep.mubr.msk.f32.mxu1 %vm19471_vm0, %v19472_v6  ;;  %18648 = vmatprep.mubr.msk.f32.mxu0 %vm19471_vm0, %v19472_v6  ;;  %v16960_v13 = vld [vmem:[%s22259_s1 + $0x80] sm:$0xff] }
0x11e7   :  { %18651 = vmatprep.subr.mxu1 %v19472_v6  ;;  %18647 = vmatpush3.msra.mxu0 %v17076_v42 }
0x11e8   :  { %18644 = vmatmul.mubr.msk.f32.vlgmr.msra.gmra.mrb[142].mxu1 %vm2060_vm5, %v11611_v63  ;;  %18656 = vmatprep.subr.mxu0 %v19472_v6 }
0x11e9   :  { %18653 = vmatprep.mubr.msk.f32.mxu1 %vm19471_vm0, %v19472_v6  ;;  %18652 = vmatpush3.msra.mxu1 %v17077_v8 }
0x11ea   :  { %18661 = vmatprep.subr.mxu1 %v19472_v6 }
0x12b0   :  { %v11684_v43 = vpop.f32.mrb[138].mxu0 }
0x12b1   :  { %v18620_v41 = vpop.f32.mrb[139].mxu0  ;;  %18649 = vmatmul.mubr.msk.f32.vlgmr.msra.gmra.mrb[144].mxu0 %vm1530_vm2, %v11684_v43 }
0x12b2   :  { %18657 = vmatpush3.msra.mxu0 %v17078_v37  ;;  %18658 = vmatprep.mubr.msk.f32.mxu0 %vm19471_vm0, %v19472_v6 }
0x12b3   :  { %v11760_v28 = vpop.f32.mrb[138].mxu1  ;;  %18666 = vmatprep.subr.mxu0 %v19472_v6 }
0x12b4   :  { %v11836_v30 = vpop.f32.mrb[140].mxu0  ;;  %v18625_v5 = vpop.f32.mrb[139].mxu1  ;;  %18654 = vmatmul.mubr.msk.f32.vlgmr.msra.gmra.mrb[144].mxu1 %vm1530_vm2, %v11760_v28 }
0x12b5   :  { %v18630_v39 = vpop.f32.mrb[141].mxu0  ;;  %18659 = vmatmul.mubr.msk.f32.vlgmr.msra.gmra.mrb[146].mxu0 %vm1530_vm2, %v11836_v30  ;;  %18662 = vmatpush3.msra.mxu1 %v17079_v1  ;;  %v17103_v5 = vld [vmem:[%s22260_s5 + $0x9] ss:$0 sm:$0xff] }
0x12b6   :  { %18663 = vmatprep.mubr.msk.f32.mxu1 %vm19471_vm0, %v19472_v6  ;;  %18667 = vmatpush3.msra.mxu0 %v17080_v3 }
0x12b7   :  { %v11912_v52 = vpop.f32.mrb[140].mxu1  ;;  %18668 = vmatprep.mubr.msk.f32.mxu0 %vm19471_vm0, %v19472_v6  ;;  %18671 = vmatprep.subr.mxu1 %v19472_v6 }
0x12b8   :  { %v11988_v47 = vpop.f32.mrb[142].mxu0  ;;  %v18635_v56 = vpop.f32.mrb[141].mxu1  ;;  %18664 = vmatmul.mubr.msk.f32.vlgmr.msra.gmra.mrb[146].mxu1 %vm1530_vm2, %v11912_v52  ;;  %18676 = vmatprep.subr.mxu0 %v19472_v6 }
0x12b9   :  { %v18640_v59 = vpop.f32.mrb[143].mxu0  ;;  %18669 = vmatmul.mubr.msk.f32.vlgmr.msra.gmra.mrb[148].mxu0 %vm1530_vm2, %v11988_v47  ;;  %18672 = vmatpush3.msra.mxu1 %v17081_v44  ;;  %v17104_v44 = vld [vmem:[%s22260_s5 + $0xa] ss:$0 sm:$0xff] }
0x12ba   :  { %18673 = vmatprep.mubr.msk.f32.mxu1 %vm19471_vm0, %v19472_v6  ;;  %18677 = vmatpush3.msra.mxu0 %v16956_v53 }
0x12bb   :  { %v12064_v55 = vpop.f32.mrb[142].mxu1  ;;  %18678 = vmatprep.mubr.msk.f32.mxu0 %vm19471_vm0, %v19472_v6  ;;  %18681 = vmatprep.subr.mxu1 %v19472_v6 }
0x12bc   :  { %v18645_v12 = vpop.f32.mrb[143].mxu1  ;;  %18674 = vmatmul.mubr.msk.f32.vlgmr.msra.gmra.mrb[148].mxu1 %vm1530_vm2, %v12064_v55  ;;  %18686 = vmatprep.subr.mxu0 %v19472_v6 }
0x12bd   :  { %18679 = vmatmul.mubr.msk.f32.vlgmr.msra.gmra.mrb[150].mxu0 %vm1530_vm2, %v21337_v14  ;;  %18682 = vmatpush3.msra.mxu1 %v16957_v7  ;;  %v16961_v14 = vld [vmem:[%s22259_s1 + $0x88] sm:$0xff]  ;;  %s22265_s1 = sld [smem:[#allocation16_spill]] }
0x12be   :  { %18683 = vmatprep.mubr.msk.f32.mxu1 %vm19471_vm0, %v19472_v6  ;;  %18687 = vmatpush3.msra.mxu0 %v16958_v10  ;;  %v17105_v7 = vld [vmem:[%s22260_s5 + $0xb] ss:$0 sm:$0xff] }
0x12bf   :  { %18688 = vmatprep.mubr.msk.f32.mxu0 %vm19471_vm0, %v19472_v6  ;;  %18691 = vmatprep.subr.mxu1 %v19472_v6 }
0x12c0   :  { %18684 = vmatmul.mubr.msk.f32.vlgmr.msra.gmra.mrb[150].mxu1 %vm1530_vm2, %v21339_v60  ;;  %18696 = vmatprep.subr.mxu0 %v19472_v6 }
0x12c1   :  { %18689 = vmatmul.mubr.msk.f32.vlgmr.msra.gmra.mrb[152].mxu0 %vm1530_vm2, %v21341_v22  ;;  %18692 = vmatpush3.msra.mxu1 %v16959_v58 }
0x12c2   :  { %18693 = vmatprep.mubr.msk.f32.mxu1 %vm19471_vm0, %v19472_v6  ;;  %18697 = vmatpush3.msra.mxu0 %v16960_v13 }
0x12c3   :  { %18698 = vmatprep.mubr.msk.f32.mxu0 %vm19471_vm0, %v19472_v6  ;;  %18701 = vmatprep.subr.mxu1 %v19472_v6 }
0x12c4   :  { %18694 = vmatmul.mubr.msk.f32.vlgmr.msra.gmra.mrb[152].mxu1 %vm1530_vm2, %v21343_v38  ;;  %19208 = vmatprep.subr.bf16.mxu0 %v19470_v0 }
0x12c5   :  { %18699 = vmatmul.mubr.msk.f32.vlgmr.msra.gmra.mrb[154].mxu0 %vm1530_vm2, %v21345_v40  ;;  %18702 = vmatpush3.msra.mxu1 %v16961_v14 }
0x12c6   :  { %18703 = vmatprep.mubr.msk.f32.mxu1 %vm19471_vm0, %v19472_v6  ;;  %18710 = vmatprep.mubr.msk.f32.mxu0 %vm19471_vm0, %v19472_v6 }
0x12c7   :  { %19211 = vmatprep.subr.bf16.mxu1 %v19470_v0 }
0x12c8   :  { %18704 = vmatmul.mubr.msk.f32.vlgmr.msra.gmra.mrb[154].mxu1 %vm1530_vm2, %v21347_v20 }
0x12c9   :  { %18717 = vmatprep.mubr.msk.f32.mxu1 %vm19471_vm0, %v19472_v6 }
0x1384   :  { %v12144_v60 = vpop.f32.mrb[144].mxu0 }
0x1385   :  { %v18650_v22 = vpop.f32.mrb[145].mxu0 }
0x1387   :  { %v12217_v38 = vpop.f32.mrb[144].mxu1 }
0x1388   :  { %v12290_v15 = vpop.f32.mrb[146].mxu0  ;;  %v18655_v40 = vpop.f32.mrb[145].mxu1 }
0x1389   :  { %v18660_v16 = vpop.f32.mrb[147].mxu0 }
0x138b   :  { %v12363_v17 = vpop.f32.mrb[146].mxu1 }
0x138c   :  { %v12436_v2 = vpop.f32.mrb[148].mxu0  ;;  %v18665_v48 = vpop.f32.mrb[147].mxu1 }
0x138d   :  { %v18670_v61 = vpop.f32.mrb[149].mxu0 }
0x138f   :  { %v12509_v19 = vpop.f32.mrb[148].mxu1 }
0x1390   :  { %v12582_v21 = vpop.f32.mrb[150].mxu0  ;;  %v18675_v20 = vpop.f32.mrb[149].mxu1 }
0x1391   :  { %v12583_v25 = vadd.f32 %v12582_v21, %v12144_v60  ;;  %v18680_v26 = vpop.f32.mrb[151].mxu0 }
0x1393   :  { %v12994_v27 = vadd.f32 %v17100_v24, %v12583_v25  ;;  %v12655_v29 = vpop.f32.mrb[150].mxu1 }
0x1394   :  { %v12656_v54 = vadd.f32 %v12655_v29, %v12217_v38  ;;  %v12728_v49 = vpop.f32.mrb[152].mxu0  ;;  %v18685_v46 = vpop.f32.mrb[151].mxu1 }
0x1395   :  { %v12729_v31 = vadd.f32 %v12728_v49, %v12290_v15  ;;  %v18690_v11 = vpop.f32.mrb[153].mxu0  ;;  %v13000_v33 = vadd.f32 %v12994_v27, %v20789_v45  ;;  %v17102_v45 = vld [vmem:[%s22260_s5 + $0x8] ss:$0 sm:$0xff] }
0x1396   :  { %v12995_v34 = vadd.f32 %v17101_v9, %v12656_v54 }
0x1397   :  { %v12801_v51 = vpop.f32.mrb[152].mxu1  ;;  %v13020_v35 = vsel %vm5885_vm6, %v13000_v33, 0.0  ;;  %v12996_v30 = vadd.f32 %v17102_v45, %v12729_v31 }
0x1398   :  { %v12802_v50 = vadd.f32 %v12801_v51, %v12363_v17  ;;  %13021 = vadd.xlane.f32.xlu0 %v13020_v35  ;;  %v12874_v18 = vpop.f32.mrb[154].mxu0  ;;  %v18695_v36 = vpop.f32.mrb[153].mxu1  ;;  %v13001_v63 = vadd.f32 %v12995_v34, %v20809_v4  ;;  %v17133_v17 = vld [vmem:[%s22261_s27 + $0x78] sm:$0xff] }
0x1399   :  { %v12875_v42 = vadd.f32 %v12874_v18, %v12436_v2  ;;  %v18700_v8 = vpop.f32.mrb[155].mxu0  ;;  %v13002_v10 = vadd.f32 %v12996_v30, %v20823_v57 }
0x139a   :  { %v13023_v37 = vsel %vm5885_vm6, %v13001_v63, 0.0  ;;  %v12997_v47 = vadd.f32 %v17103_v5, %v12802_v50  ;;  %v17118_v8 = vld [vmem:[%s22262_s4 + $0x6] ss:$0 sm:$0xff] }
0x139b   :  { %13024 = vadd.xlane.f32.xlu1 %v13023_v37  ;;  %v12947_v43 = vpop.f32.mrb[154].mxu1  ;;  %v12998_v59 = vadd.f32 %v17104_v44, %v12875_v42  ;;  %v13026_v60 = vsel %vm5885_vm6, %v13002_v10, 0.0 }
0x139c   :  { %v12948_v41 = vadd.f32 %v12947_v43, %v12509_v19  ;;  %v18705_v1 = vpop.f32.mrb[155].mxu1  ;;  %v13003_v14 = vadd.f32 %v12997_v47, %v20846_v23  ;;  %v17130_v23 = vld [vmem:[%s22261_s27 + $0x60] sm:$0xff] }
0x139d   :  { %v13004_v22 = vadd.f32 %v12998_v59, %v20857_v62  ;;  %v17131_v62 = vld [vmem:[%s22261_s27 + $0x68] sm:$0xff]  ;;  %v17137_v59 = vld [vmem:[%s22261_s27 + $0x98] sm:$0xff] }
0x139e   :  { %v12999_v58 = vadd.f32 %v17105_v7, %v12948_v41  ;;  %v13029_v38 = vsel %vm5885_vm6, %v13003_v14, 0.0  ;;  %v19209_v16 = vpack.c.bf16 %v17131_v62, %v17130_v23  ;;  %v17124_v41 = vld [vmem:[%s22207_s10 + $0x6] ss:$0 sm:$0xff]  ;;  %v17120_v62 = vld [vmem:[%s22262_s4 + $0x8] ss:$0 sm:$0xff] }
0x139f   :  { %v13032_v57 = vsel %vm5885_vm6, %v13004_v22, 0.0 }
0x13a0   :  { %v13005_v15 = vadd.f32 %v12999_v58, %v20876_v32  ;;  %19210 = vmatpush3.bf16.msra.mxu0 %v19209_v16  ;;  %v17132_v32 = vld [vmem:[%s22261_s27 + $0x70] sm:$0xff] }
0x13a1   :  { %19214 = vmatprep.subr.bf16.mxu0 %v19470_v0  ;;  %v19212_v2 = vpack.c.bf16 %v17133_v17, %v17132_v32  ;;  %v17138_v32 = vld [vmem:[%s22261_s27 + $0xa0] sm:$0xff]  ;;  %v17139_v17 = vld [vmem:[%s22261_s27 + $0xa8] sm:$0xff] }
0x13a2   :  { %v13035_v40 = vsel %vm5885_vm6, %v13005_v15, 0.0 }
0x13a3   :  { %19213 = vmatpush3.bf16.msra.mxu1 %v19212_v2  ;;  %v17126_v2 = vld [vmem:[%s22207_s10 + $0x8] ss:$0 sm:$0xff] }
0x13a4   :  { %19217 = vmatprep.subr.bf16.mxu1 %v19470_v0 }
0x1425   :  { %v13022_v28 = vpop.xlane.xlu0 %13021 }
0x1426   :  { %v13038_v3 = vmul.f32 0.0625, %v13022_v28 }
0x1428   :  { %v21593_v4 = vsub.f32 %v13000_v33, %v13038_v3  ;;  %v13025_v39 = vpop.xlane.xlu1 %13024  ;;  %v17119_v3 = vld [vmem:[%s22262_s4 + $0x7] ss:$0 sm:$0xff] }
0x1429   :  { %v13039_v52 = vmul.f32 0.0625, %v13025_v39 }
0x142a   :  { %v13050_v53 = vmul.f32 %v21593_v4, %v21593_v4 }
0x142b   :  { %v21600_v56 = vsub.f32 %v13001_v63, %v13039_v52  ;;  %v17134_v52 = vld [vmem:[%s22261_s27 + $0x80] sm:$0xff] }
0x142c   :  { %v13056_v55 = vsel %vm5885_vm6, %v13050_v53, 0.0  ;;  %v17135_v53 = vld [vmem:[%s22261_s27 + $0x88] sm:$0xff] }
0x142d   :  { %13057 = vadd.xlane.f32.xlu0 %v13056_v55  ;;  %v13051_v12 = vmul.f32 %v21600_v56, %v21600_v56  ;;  %v19215_v47 = vpack.c.bf16 %v17135_v53, %v17134_v52 }
0x142f   :  { %v13059_v13 = vsel %vm5885_vm6, %v13051_v12, 0.0 }
0x1430   :  { %13060 = vadd.xlane.f32.xlu1 %v13059_v13 }
0x1431   :  { %13027 = vadd.xlane.f32.xlu0 %v13026_v60 }
0x1434   :  { %13030 = vadd.xlane.f32.xlu1 %v13029_v38 }
0x1435   :  { %13033 = vadd.xlane.f32.xlu0 %v13032_v57 }
0x1438   :  { %13036 = vadd.xlane.f32.xlu1 %v13035_v40 }
0x14ba   :  { %v13058_v48 = vpop.xlane.xlu0 %13057 }
0x14bb   :  { %v13074_v61 = vmul.f32 0.0625, %v13058_v48 }
0x14bd   :  { %v13080_v19 = vadd.f32 1e-05, %v13074_v61  ;;  %v13061_v21 = vpop.xlane.xlu1 %13060 }
0x14be   :  { %v13075_v24 = vmul.f32 0.0625, %v13061_v21  ;;  %v13028_v20 = vpop.xlane.xlu0 %13027 }
0x14bf   :  { %19424 = vrsqrt.f32 %v13080_v19  ;;  %v13040_v25 = vmul.f32 0.0625, %v13028_v20  ;;  %v17121_v19 = vld [vmem:[%s22262_s4 + $0x9] ss:$0 sm:$0xff]  ;;  %v19221_v20 = vpack.c.bf16 %v17139_v17, %v17138_v32 }
0x14c0   :  { %v13081_v26 = vadd.f32 1e-05, %v13075_v24 }
0x14c1   :  { %v21631_v27 = vsub.f32 %v13002_v10, %v13040_v25  ;;  %v13031_v29 = vpop.xlane.xlu1 %13030  ;;  %v17122_v25 = vld [vmem:[%s22262_s4 + $0xa] ss:$0 sm:$0xff] }
0x14c2   :  { %19426 = vrsqrt.f32 %v13081_v26  ;;  %v13041_v9 = vmul.f32 0.0625, %v13031_v29  ;;  %v13034_v54 = vpop.xlane.xlu0 %13033  ;;  %v17140_v26 = vld [vmem:[%s22261_s27 + $0xb0] sm:$0xff] }
0x14c3   :  { %v13042_v49 = vmul.f32 0.0625, %v13034_v54  ;;  %v13052_v46 = vmul.f32 %v21631_v27, %v21631_v27  ;;  %v17127_v54 = vld [vmem:[%s22207_s10 + $0x9] ss:$0 sm:$0xff] }
0x14c4   :  { %v21635_v31 = vsub.f32 %v13003_v14, %v13041_v9 }
0x14c5   :  { %v21637_v11 = vsub.f32 %v13004_v22, %v13042_v49  ;;  %v13037_v33 = vpop.xlane.xlu1 %13036  ;;  %v13062_v34 = vsel %vm5885_vm6, %v13052_v46, 0.0  ;;  %v17160_v49 = vld [vmem:[%s22208_s13 + $0x60] sm:$0xff]  ;;  %v17161_v46 = vld [vmem:[%s22208_s13 + $0x68] sm:$0xff] }
0x14c6   :  { %v13043_v51 = vmul.f32 0.0625, %v13037_v33  ;;  %13063 = vadd.xlane.f32.xlu0 %v13062_v34  ;;  %v13053_v35 = vmul.f32 %v21635_v31, %v21635_v31  ;;  %v17128_v33 = vld [vmem:[%s22207_s10 + $0xa] ss:$0 sm:$0xff] }
0x14c7   :  { %v13054_v50 = vmul.f32 %v21637_v11, %v21637_v11 }
0x14c8   :  { %v21644_v18 = vsub.f32 %v13005_v15, %v13043_v51  ;;  %v13065_v36 = vsel %vm5885_vm6, %v13053_v35, 0.0  ;;  %v17123_v35 = vld [vmem:[%s22262_s4 + $0xb] ss:$0 sm:$0xff] }
0x14c9   :  { %v19425_v63 = vpop.eup %19424  ;;  %13066 = vadd.xlane.f32.xlu1 %v13065_v36  ;;  %v13068_v42 = vsel %vm5885_vm6, %v13054_v50, 0.0 }
0x14ca   :  { %v13092_v37 = vmul.f32 %v19425_v63, %v21593_v4  ;;  %13069 = vadd.xlane.f32.xlu0 %v13068_v42  ;;  %v13055_v43 = vmul.f32 %v21644_v18, %v21644_v18  ;;  %v17125_v4 = vld [vmem:[%s22207_s10 + $0x7] ss:$0 sm:$0xff]  ;;  %v19227_v63 = vpack.c.bf16 %v17161_v46, %v17160_v49  ;;  %v17162_v42 = vld [vmem:[%s22208_s13 + $0x70] sm:$0xff]  ;;  %v17178_v46 = vld [vmem:[%s22210_s14 + $0x6] ss:$0 sm:$0xff] }
0x14cc   :  { %v19427_v1 = vpop.eup %19426  ;;  %v13071_v45 = vsel %vm5885_vm6, %v13055_v43, 0.0  ;;  %v13134_v28 = vmul.f32 %v17118_v8, %v13092_v37  ;;  %v17163_v8 = vld [vmem:[%s22208_s13 + $0x78] sm:$0xff] }
0x14cd   :  { %v13093_v30 = vmul.f32 %v19427_v1, %v21600_v56  ;;  %13072 = vadd.xlane.f32.xlu1 %v13071_v45  ;;  %v17136_v56 = vld [vmem:[%s22261_s27 + $0x90] sm:$0xff]  ;;  %v17148_v45 = vld [vmem:[%s22209_s12 + $0x6] ss:$0 sm:$0xff] }
0x14ce   :  { %v21662_v5 = vadd.f32 %v17124_v41, %v13134_v28  ;;  %v19218_v7 = vpack.c.bf16 %v17137_v59, %v17136_v56  ;;  %v19230_v41 = vpack.c.bf16 %v17163_v8, %v17162_v42  ;;  %v17164_v59 = vld [vmem:[%s22208_s13 + $0x80] sm:$0xff] }
0x14cf   :  { %v13135_v39 = vmul.f32 %v17119_v3, %v13093_v30 }
0x14d0   :  { %18711 = vmatmul.mubr.msk.f32.vlgmr.msra.gmra.mrb[156].mxu0 %vm143_vm1, %v21662_v5 }
0x14d1   :  { %v21669_v44 = vadd.f32 %v17125_v4, %v13135_v39  ;;  %18724 = vmatprep.mubr.msk.f32.mxu0 %vm19471_vm0, %v19472_v6  ;;  %19216 = vmatpush3.bf16.msra.mxu0 %v19215_v47  ;;  %v17149_v4 = vld [vmem:[%s22209_s12 + $0x7] ss:$0 sm:$0xff] }
0x14d2   :  { %19220 = vmatprep.subr.bf16.mxu0 %v19470_v0 }
0x14d3   :  { %18718 = vmatmul.mubr.msk.f32.vlgmr.msra.gmra.mrb[156].mxu1 %vm143_vm1, %v21669_v44 }
0x14d4   :  { %18731 = vmatprep.mubr.msk.f32.mxu1 %vm19471_vm0, %v19472_v6  ;;  %19219 = vmatpush3.bf16.msra.mxu1 %v19218_v7  ;;  %v17165_v7 = vld [vmem:[%s22208_s13 + $0x88] sm:$0xff] }
0x14d5   :  { %19223 = vmatprep.subr.bf16.mxu1 %v19470_v0 }
0x1553   :  { %v13064_v55 = vpop.xlane.xlu0 %13063 }
0x1554   :  { %v13076_v10 = vmul.f32 0.0625, %v13064_v55  ;;  %v19233_v55 = vpack.c.bf16 %v17165_v7, %v17164_v59 }
0x1556   :  { %v13082_v12 = vadd.f32 1e-05, %v13076_v10  ;;  %v13067_v58 = vpop.xlane.xlu1 %13066  ;;  %v17166_v10 = vld [vmem:[%s22208_s13 + $0x90] sm:$0xff] }
0x1557   :  { %v13077_v13 = vmul.f32 0.0625, %v13067_v58  ;;  %v13070_v14 = vpop.xlane.xlu0 %13069 }
0x1558   :  { %19428 = vrsqrt.f32 %v13082_v12  ;;  %v13078_v60 = vmul.f32 0.0625, %v13070_v14  ;;  %v17167_v12 = vld [vmem:[%s22208_s13 + $0x98] sm:$0xff]  ;;  %v17168_v14 = vld [vmem:[%s22208_s13 + $0xa0] sm:$0xff] }
0x1559   :  { %v13083_v22 = vadd.f32 1e-05, %v13077_v13  ;;  %v19236_v58 = vpack.c.bf16 %v17167_v12, %v17166_v10  ;;  %v17150_v13 = vld [vmem:[%s22209_s12 + $0x8] ss:$0 sm:$0xff] }
0x155a   :  { %v13084_v38 = vadd.f32 1e-05, %v13078_v60  ;;  %v13073_v15 = vpop.xlane.xlu1 %13072  ;;  %v17169_v60 = vld [vmem:[%s22208_s13 + $0xa8] sm:$0xff] }
0x155b   :  { %19430 = vrsqrt.f32 %v13083_v22  ;;  %v13079_v57 = vmul.f32 0.0625, %v13073_v15 }
0x155c   :  { %19432 = vrsqrt.f32 %v13084_v38 }
0x155d   :  { %v13085_v40 = vadd.f32 1e-05, %v13079_v57  ;;  %v17151_v57 = vld [vmem:[%s22209_s12 + $0x9] ss:$0 sm:$0xff] }
0x155f   :  { %19434 = vrsqrt.f32 %v13085_v40  ;;  %v17152_v40 = vld [vmem:[%s22209_s12 + $0xa] ss:$0 sm:$0xff] }
0x1562   :  { %v19429_v23 = vpop.eup %19428 }
0x1563   :  { %v13094_v16 = vmul.f32 %v19429_v23, %v21631_v27  ;;  %v17141_v27 = vld [vmem:[%s22261_s27 + $0xb8] sm:$0xff]  ;;  %v19239_v23 = vpack.c.bf16 %v17169_v60, %v17168_v14 }
0x1564   :  { %v19224_v51 = vpack.c.bf16 %v17141_v27, %v17140_v26 }
0x1565   :  { %v19431_v48 = vpop.eup %19430  ;;  %v13136_v61 = vmul.f32 %v17120_v62, %v13094_v16  ;;  %v17170_v62 = vld [vmem:[%s22208_s13 + $0xb0] sm:$0xff]  ;;  %v17171_v16 = vld [vmem:[%s22208_s13 + $0xb8] sm:$0xff] }
0x1566   :  { %v19433_v21 = vpop.eup %19432  ;;  %v13095_v24 = vmul.f32 %v19431_v48, %v21635_v31 }
0x1567   :  { %v13096_v29 = vmul.f32 %v19433_v21, %v21637_v11  ;;  %v21718_v9 = vadd.f32 %v17126_v2, %v13136_v61 }
0x1568   :  { %v13137_v31 = vmul.f32 %v17121_v19, %v13095_v24  ;;  %v17153_v24 = vld [vmem:[%s22209_s12 + $0xb] ss:$0 sm:$0xff] }
0x1569   :  { %v19435_v11 = vpop.eup %19434  ;;  %18725 = vmatmul.mubr.msk.f32.vlgmr.msra.gmra.mrb[158].mxu0 %vm143_vm1, %v21718_v9  ;;  %v13138_v34 = vmul.f32 %v17122_v25, %v13096_v29 }
0x156a   :  { %v13097_v50 = vmul.f32 %v19435_v11, %v21644_v18  ;;  %19222 = vmatpush3.bf16.msra.mxu0 %v19221_v20  ;;  %18738 = vmatprep.mubr.msk.f32.mxu0 %vm19471_vm0, %v19472_v6  ;;  %v21740_v36 = vadd.f32 %v17127_v54, %v13137_v31  ;;  %v17129_v18 = vld [vmem:[%s22207_s10 + $0xb] ss:$0 sm:$0xff]  ;;  %v19242_v20 = vpack.c.bf16 %v17171_v16, %v17170_v62 }
0x156b   :  { %v21748_v37 = vadd.f32 %v17128_v33, %v13138_v34  ;;  %19226 = vmatprep.subr.bf16.mxu0 %v19470_v0  ;;  %v17179_v34 = vld [vmem:[%s22210_s14 + $0x7] ss:$0 sm:$0xff] }
0x156c   :  { %18732 = vmatmul.mubr.msk.f32.vlgmr.msra.gmra.mrb[158].mxu1 %vm143_vm1, %v21740_v36  ;;  %v13139_v43 = vmul.f32 %v17123_v35, %v13097_v50 }
0x156d   :  { %18739 = vmatmul.mubr.msk.f32.vlgmr.msra.gmra.mrb[160].mxu0 %vm143_vm1, %v21748_v37  ;;  %19225 = vmatpush3.bf16.msra.mxu1 %v19224_v51 }
0x156e   :  { %18745 = vmatprep.mubr.msk.f32.mxu1 %vm19471_vm0, %v19472_v6  ;;  %v21760_v1 = vadd.f32 %v17129_v18, %v13139_v43  ;;  %19228 = vmatpush3.bf16.msra.mxu0 %v19227_v63 }
0x156f   :  { %18752 = vmatprep.mubr.msk.f32.mxu0 %vm19471_vm0, %v19472_v6  ;;  %19229 = vmatprep.subr.bf16.mxu1 %v19470_v0 }
0x1570   :  { %18746 = vmatmul.mubr.msk.f32.vlgmr.msra.gmra.mrb[160].mxu1 %vm143_vm1, %v21760_v1  ;;  %19232 = vmatprep.subr.bf16.mxu0 %v19470_v0 }
0x1571   :  { %19231 = vmatpush3.bf16.msra.mxu1 %v19230_v41  ;;  %18759 = vmatprep.mubr.msk.f32.mxu1 %vm19471_vm0, %v19472_v6 }
0x1572   :  { %19235 = vmatprep.subr.bf16.mxu1 %v19470_v0 }
0x15a3   :  { %v13307_v28 = vpop.f32.mrb[156].mxu0 }
0x15a4   :  { %v13308_v3 = vadd.f32 %v17148_v45, %v13307_v28  ;;  %v18712_v30 = vpop.f32.mrb[157].mxu0 }
0x15a6   :  { %v13676_v39 = vmax.f32 %v13308_v3, 0.0  ;;  %v13380_v52 = vpop.f32.mrb[156].mxu1 }
0x15a7   :  { %v13381_v53 = vadd.f32 %v17149_v4, %v13380_v52  ;;  %v18719_v47 = vpop.f32.mrb[157].mxu1 }
0x15a8   :  { %18753 = vmatmul.mubr.msk.f32.vlgmr.msra.gmra.mrb[162].mxu0 %vm143_vm1, %v13676_v39  ;;  %v17182_v47 = vld [vmem:[%s22210_s14 + $0xa] ss:$0 sm:$0xff] }
0x15a9   :  { %v13677_v56 = vmax.f32 %v13381_v53, 0.0  ;;  %18766 = vmatprep.mubr.msk.f32.mxu0 %vm19471_vm0, %v19472_v6  ;;  %19234 = vmatpush3.bf16.msra.mxu0 %v19233_v55 }
0x15aa   :  { %19238 = vmatprep.subr.bf16.mxu0 %v19470_v0 }
0x15ab   :  { %18760 = vmatmul.mubr.msk.f32.vlgmr.msra.gmra.mrb[162].mxu1 %vm143_vm1, %v13677_v56 }
0x15ac   :  { %18773 = vmatprep.mubr.msk.f32.mxu1 %vm19471_vm0, %v19472_v6  ;;  %19237 = vmatpush3.bf16.msra.mxu1 %v19236_v58 }
0x15ad   :  { %19241 = vmatprep.subr.bf16.mxu1 %v19470_v0 }
0x163c   :  { %v13453_v22 = vpop.f32.mrb[158].mxu0 }
0x163d   :  { %v13454_v38 = vadd.f32 %v17150_v13, %v13453_v22  ;;  %v18726_v15 = vpop.f32.mrb[159].mxu0 }
0x163f   :  { %v13678_v32 = vmax.f32 %v13454_v38, 0.0  ;;  %v13526_v17 = vpop.f32.mrb[158].mxu1 }
0x1640   :  { %v13527_v2 = vadd.f32 %v17151_v57, %v13526_v17  ;;  %v13599_v48 = vpop.f32.mrb[160].mxu0  ;;  %v18733_v61 = vpop.f32.mrb[159].mxu1  ;;  %v14359_v57 = vld [vmem:[%s22213_s17 + $0x8] sm:$0xff] }
0x1641   :  { %v13600_v19 = vadd.f32 %v17152_v40, %v13599_v48  ;;  %v18740_v21 = vpop.f32.mrb[161].mxu0  ;;  %18767 = vmatmul.mubr.msk.f32.vlgmr.msra.gmra.mrb[164].mxu0 %vm143_vm1, %v13678_v32  ;;  %v17181_v48 = vld [vmem:[%s22210_s14 + $0x9] ss:$0 sm:$0xff] }
0x1642   :  { %v13679_v25 = vmax.f32 %v13527_v2, 0.0  ;;  %19240 = vmatpush3.bf16.msra.mxu0 %v19239_v23  ;;  %18780 = vmatprep.mubr.msk.f32.mxu0 %vm19471_vm0, %v19472_v6  ;;  %v14360_v23 = vld [vmem:[%s22213_s17 + $0x10] sm:$0xff] }
0x1643   :  { %v13680_v26 = vmax.f32 %v13600_v19, 0.0  ;;  %v13672_v27 = vpop.f32.mrb[160].mxu1  ;;  %19244 = vmatprep.subr.bf16.mxu0 %v19470_v0 }
0x1644   :  { %v13673_v29 = vadd.f32 %v17153_v24, %v13672_v27  ;;  %v18747_v54 = vpop.f32.mrb[161].mxu1  ;;  %18774 = vmatmul.mubr.msk.f32.vlgmr.msra.gmra.mrb[164].mxu1 %vm143_vm1, %v13679_v25 }
0x1645   :  { %18781 = vmatmul.mubr.msk.f32.vlgmr.msra.gmra.mrb[166].mxu0 %vm143_vm1, %v13680_v26  ;;  %19243 = vmatpush3.bf16.msra.mxu1 %v19242_v20  ;;  %v17183_v26 = vld [vmem:[%s22210_s14 + $0xb] ss:$0 sm:$0xff] }
0x1646   :  { %v13681_v49 = vmax.f32 %v13673_v29, 0.0  ;;  %18787 = vmatprep.mubr.msk.f32.mxu1 %vm19471_vm0, %v19472_v6  ;;  %18794 = vmatprep.mubr.msk.f32.mxu0 %vm19471_vm0, %v19472_v6 }
0x1647   :  { %19247 = vmatprep.subr.bf16.mxu1 %v19470_v0 }
0x1648   :  { %18788 = vmatmul.mubr.msk.f32.vlgmr.msra.gmra.mrb[166].mxu1 %vm143_vm1, %v13681_v49 }
0x1649   :  { %18801 = vmatprep.mubr.msk.f32.mxu1 %vm19471_vm0, %v19472_v6 }
0x167b   :  { %v13807_v31 = vpop.f32.mrb[162].mxu0 }
0x167c   :  { %v13808_v33 = vadd.f32 %v17178_v46, %v13807_v31  ;;  %v18754_v11 = vpop.f32.mrb[163].mxu0 }
0x167e   :  { %v13880_v51 = vpop.f32.mrb[162].mxu1  ;;  %v14176_v35 = vadd.f32 %v13808_v33, %v21662_v5  ;;  %v17180_v5 = vld [vmem:[%s22210_s14 + $0x8] ss:$0 sm:$0xff] }
0x167f   :  { %v13881_v50 = vadd.f32 %v17179_v34, %v13880_v51  ;;  %v18761_v63 = vpop.f32.mrb[163].mxu1 }
0x1680   :  { %v14196_v42 = vsel %vm5885_vm6, %v14176_v35, 0.0  ;;  %v17202_v63 = vld [vmem:[%s22211_s15 + $0x6] ss:$0 sm:$0xff] }
0x1681   :  { %14197 = vadd.xlane.f32.xlu0 %v14196_v42  ;;  %v14177_v8 = vadd.f32 %v13881_v50, %v21669_v44 }
0x1683   :  { %v14199_v18 = vsel %vm5885_vm6, %v14177_v8, 0.0 }
0x1684   :  { %14200 = vadd.xlane.f32.xlu1 %v14199_v18 }
0x170e   :  { %v14198_v43 = vpop.xlane.xlu0 %14197 }
0x170f   :  { %v14214_v41 = vmul.f32 0.0625, %v14198_v43  ;;  %v17203_v43 = vld [vmem:[%s22211_s15 + $0x7] ss:$0 sm:$0xff] }
0x1711   :  { %v21845_v45 = vsub.f32 %v14176_v35, %v14214_v41  ;;  %v14201_v28 = vpop.xlane.xlu1 %14200 }
0x1712   :  { %v14215_v3 = vmul.f32 0.0625, %v14201_v28 }
0x1713   :  { %v14226_v30 = vmul.f32 %v21845_v45, %v21845_v45 }
0x1714   :  { %v21852_v4 = vsub.f32 %v14177_v8, %v14215_v3  ;;  %v13953_v39 = vpop.f32.mrb[164].mxu0 }
0x1715   :  { %v13954_v44 = vadd.f32 %v17180_v5, %v13953_v39  ;;  %v18768_v52 = vpop.f32.mrb[165].mxu0  ;;  %v14232_v53 = vsel %vm5885_vm6, %v14226_v30, 0.0  ;;  %v14362_v30 = vld [vmem:[%s22213_s17 + $0x20] sm:$0xff] }
0x1716   :  { %14233 = vadd.xlane.f32.xlu0 %v14232_v53  ;;  %v14227_v56 = vmul.f32 %v21852_v4, %v21852_v4 }
0x1717   :  { %v14026_v59 = vpop.f32.mrb[164].mxu1  ;;  %v14178_v7 = vadd.f32 %v13954_v44, %v21718_v9  ;;  %v14358_v9 = vld [vmem:[%s22213_s17] sm:$0xff] }
0x1718   :  { %v14099_v55 = vpop.f32.mrb[166].mxu0  ;;  %v18775_v10 = vpop.f32.mrb[165].mxu1  ;;  %v14235_v12 = vsel %vm5885_vm6, %v14227_v56, 0.0  ;;  %v19245_v40 = vpack.c.bf16 %v14359_v57, %v14358_v9  ;;  %v14027_v20 = vadd.f32 %v17181_v48, %v14026_v59  ;;  %v17204_v9 = vld [vmem:[%s22211_s15 + $0x8] ss:$0 sm:$0xff] }
0x1719   :  { %v14100_v58 = vadd.f32 %v17182_v47, %v14099_v55  ;;  %v18782_v13 = vpop.f32.mrb[167].mxu0  ;;  %14236 = vadd.xlane.f32.xlu1 %v14235_v12  ;;  %v14202_v14 = vsel %vm5885_vm6, %v14178_v7, 0.0 }
0x171a   :  { %14203 = vadd.xlane.f32.xlu0 %v14202_v14  ;;  %19246 = vmatpush3.bf16.msra.mxu0 %v19245_v40  ;;  %v14179_v33 = vadd.f32 %v14027_v20, %v21740_v36  ;;  %v17208_v36 = vld [vmem:[%s22212_s16 + $0x6] ss:$0 sm:$0xff]  ;;  %v14364_v20 = vld [vmem:[%s22213_s17 + $0x30] sm:$0xff] }
0x171b   :  { %v14172_v60 = vpop.f32.mrb[166].mxu1  ;;  %v14180_v22 = vadd.f32 %v14100_v58, %v21748_v37  ;;  %v14361_v37 = vld [vmem:[%s22213_s17 + $0x18] sm:$0xff]  ;;  %19250 = vmatprep.subr.bf16.mxu0 %v19470_v0  ;;  %v14366_v40 = vld [vmem:[%s22213_s17 + $0x40] sm:$0xff] }
0x171c   :  { %v18789_v38 = vpop.f32.mrb[167].mxu1  ;;  %v19248_v62 = vpack.c.bf16 %v14361_v37, %v14360_v23  ;;  %v14173_v49 = vadd.f32 %v17183_v26, %v14172_v60  ;;  %v14205_v51 = vsel %vm5885_vm6, %v14179_v33, 0.0  ;;  %v14367_v23 = vld [vmem:[%s22213_s17 + $0x48] sm:$0xff] }
0x171d   :  { %v14208_v15 = vsel %vm5885_vm6, %v14180_v22, 0.0  ;;  %v17210_v37 = vld [vmem:[%s22212_s16 + $0x8] ss:$0 sm:$0xff] }
0x171e   :  { %14209 = vadd.xlane.f32.xlu1 %v14208_v15  ;;  %19249 = vmatpush3.bf16.msra.mxu1 %v19248_v62  ;;  %v14181_v50 = vadd.f32 %v14173_v49, %v21760_v1 }
0x171f   :  { %19253 = vmatprep.subr.bf16.mxu1 %v19470_v0 }
0x1720   :  { %v14211_v41 = vsel %vm5885_vm6, %v14181_v50, 0.0 }
0x17a3   :  { %v14234_v16 = vpop.xlane.xlu0 %14233 }
0x17a4   :  { %v14250_v32 = vmul.f32 0.0625, %v14234_v16 }
0x17a6   :  { %v14256_v17 = vadd.f32 1e-05, %v14250_v32  ;;  %v14237_v2 = vpop.xlane.xlu1 %14236  ;;  %v19257_v32 = vpack.c.bf16 %v14367_v23, %v14366_v40 }
0x17a7   :  { %v14251_v61 = vmul.f32 0.0625, %v14237_v2  ;;  %v14204_v19 = vpop.xlane.xlu0 %14203 }
0x17a8   :  { %19436 = vrsqrt.f32 %v14256_v17  ;;  %v14216_v21 = vmul.f32 0.0625, %v14204_v19  ;;  %v17206_v17 = vld [vmem:[%s22211_s15 + $0xa] ss:$0 sm:$0xff] }
0x17a9   :  { %v14257_v24 = vadd.f32 1e-05, %v14251_v61  ;;  %v17212_v61 = vld [vmem:[%s22212_s16 + $0xa] ss:$0 sm:$0xff] }
0x17aa   :  { %v14222_v25 = vsub.f32 %v14178_v7, %v14216_v21 }
0x17ab   :  { %19438 = vrsqrt.f32 %v14257_v24  ;;  %v14210_v27 = vpop.xlane.xlu1 %14209  ;;  %v21958_v24 = vld [vmem:[%s22214_s20] sm:$0xff] }
0x17ac   :  { %v14218_v29 = vmul.f32 0.0625, %v14210_v27  ;;  %v14228_v54 = vmul.f32 %v14222_v25, %v14222_v25  ;;  %v21975_v27 = vld [vmem:[%s22215_s18] ss:$0 sm:$0xff] }
0x17ae   :  { %v21885_v46 = vsub.f32 %v14180_v22, %v14218_v29  ;;  %v14238_v31 = vsel %vm5885_vm6, %v14228_v54, 0.0 }
0x17af   :  { %14239 = vadd.xlane.f32.xlu0 %v14238_v31 }
0x17b0   :  { %v14230_v11 = vmul.f32 %v21885_v46, %v21885_v46 }
0x17b2   :  { %v19437_v34 = vpop.eup %19436  ;;  %v14244_v35 = vsel %vm5885_vm6, %v14230_v11, 0.0 }
0x17b3   :  { %v14268_v42 = vmul.f32 %v19437_v34, %v21845_v45  ;;  %14206 = vadd.xlane.f32.xlu0 %v14205_v51  ;;  %14245 = vadd.xlane.f32.xlu1 %v14244_v35  ;;  %v17209_v45 = vld [vmem:[%s22212_s16 + $0x7] ss:$0 sm:$0xff]  ;;  %v14827_v51 = vld [vmem:[%s22216_s22 + $0x8] sm:$0xff] }
0x17b4   :  { %v14826_v34 = vld [vmem:[%s22216_s22] sm:$0xff] }
0x17b5   :  { %v19439_v8 = vpop.eup %19438  ;;  %v14310_v18 = vmul.f32 %v17202_v63, %v14268_v42  ;;  %v21990_v35 = vpack.c.bf16 %v14827_v51, %v14826_v34 }
0x17b6   :  { %v14269_v1 = vmul.f32 %v19439_v8, %v21852_v4  ;;  %v14363_v4 = vld [vmem:[%s22213_s17 + $0x28] sm:$0xff] }
0x17b7   :  { %14212 = vadd.xlane.f32.xlu1 %v14211_v41  ;;  %v14352_v28 = vadd.f32 %v17208_v36, %v14310_v18  ;;  %v19251_v39 = vpack.c.bf16 %v14363_v4, %v14362_v30 }
0x17b8   :  { %v14311_v3 = vmul.f32 %v17203_v43, %v14269_v1  ;;  %v17205_v1 = vld [vmem:[%s22211_s15 + $0x9] ss:$0 sm:$0xff] }
0x17b9   :  { %18795 = vmatmul.mubr.msk.f32.vlgmr.msra.gmra.mrb[168].mxu0 %vm143_vm1, %v14352_v28  ;;  %v14368_v28 = vld [vmem:[%s22213_s17 + $0x50] sm:$0xff] }
0x17ba   :  { %v14353_v5 = vadd.f32 %v17209_v45, %v14311_v3  ;;  %18808 = vmatprep.mubr.msk.f32.mxu0 %vm19471_vm0, %v19472_v6  ;;  %19252 = vmatpush3.bf16.msra.mxu0 %v19251_v39  ;;  %v14369_v45 = vld [vmem:[%s22213_s17 + $0x58] sm:$0xff]  ;;  %v17211_v3 = vld [vmem:[%s22212_s16 + $0x9] ss:$0 sm:$0xff]  ;;  %v17207_v39 = vld [vmem:[%s22211_s15 + $0xb] ss:$0 sm:$0xff] }
0x17bb   :  { %19256 = vmatprep.subr.bf16.mxu0 %v19470_v0  ;;  %v19260_v4 = vpack.c.bf16 %v14369_v45, %v14368_v28 }
0x17bc   :  { %18802 = vmatmul.mubr.msk.f32.vlgmr.msra.gmra.mrb[168].mxu1 %vm143_vm1, %v14353_v5 }
0x17bd   :  { %18815 = vmatprep.mubr.msk.f32.mxu1 %vm19471_vm0, %v19472_v6 }
0x183c   :  { %v14240_v44 = vpop.xlane.xlu0 %14239 }
0x183d   :  { %v14252_v52 = vmul.f32 0.0625, %v14240_v44 }
0x183f   :  { %v14258_v53 = vadd.f32 1e-05, %v14252_v52 }
0x1840   :  { %v14207_v47 = vpop.xlane.xlu0 %14206  ;;  %v14246_v56 = vpop.xlane.xlu1 %14245 }
0x1841   :  { %19440 = vrsqrt.f32 %v14258_v53  ;;  %v14217_v59 = vmul.f32 0.0625, %v14207_v47  ;;  %v14254_v7 = vmul.f32 0.0625, %v14246_v56  ;;  %v14824_v53 = vld [vmem:[%s22217_s21] sm:$0xff]  ;;  %v14825_v47 = vld [vmem:[%s22217_s21 + $0x8] sm:$0xff]  ;;  %s22263_s21 = sld [smem:[#allocation14_spill]] }
0x1842   :  { %v17213_v56 = vld [vmem:[%s22212_s16 + $0xb] ss:$0 sm:$0xff] }
0x1843   :  { %v21922_v55 = vsub.f32 %v14179_v33, %v14217_v59  ;;  %v14260_v10 = vadd.f32 1e-05, %v14254_v7  ;;  %v22023_v7 = vpack.c.bf16 %v14825_v47, %v14824_v53 }
0x1844   :  { %v14213_v12 = vpop.xlane.xlu1 %14212 }
0x1845   :  { %19442 = vrsqrt.f32 %v14260_v10  ;;  %v14219_v58 = vmul.f32 0.0625, %v14213_v12  ;;  %v14229_v13 = vmul.f32 %v21922_v55, %v21922_v55 }
0x1847   :  { %v21926_v14 = vsub.f32 %v14181_v50, %v14219_v58  ;;  %v14241_v60 = vsel %vm5885_vm6, %v14229_v13, 0.0 }
0x1848   :  { %14242 = vadd.xlane.f32.xlu0 %v14241_v60 }
0x1849   :  { %v14231_v22 = vmul.f32 %v21926_v14, %v21926_v14 }
0x184b   :  { %v19441_v38 = vpop.eup %19440  ;;  %v14247_v15 = vsel %vm5885_vm6, %v14231_v22, 0.0  ;;  %v19473_v22 = vmov 0  }
0x184c   :  { %v14270_v57 = vmul.f32 %v19441_v38, %v14222_v25  ;;  %14248 = vadd.xlane.f32.xlu1 %v14247_v15  ;;  %v14365_v25 = vld [vmem:[%s22213_s17 + $0x38] sm:$0xff]  ;;  %19302 = vset.pattern.permute.xlu0 %v19473_v22 }
0x184d   :  { %v19254_v26 = vpack.c.bf16 %v14365_v25, %v14364_v20 }
0x184e   :  { %v14312_v62 = vmul.f32 %v17204_v9, %v14270_v57 }
0x184f   :  { %v19443_v16 = vpop.eup %19442  ;;  %19255 = vmatpush3.bf16.msra.mxu1 %v19254_v26  ;;  %v22054_v26 = vld [vmem:[%s22263_s21] sm:$0x3f] }
0x1850   :  { %v14272_v2 = vmul.f32 %v19443_v16, %v21885_v46  ;;  %v14354_v48 = vadd.f32 %v17210_v37, %v14312_v62  ;;  %19259 = vmatprep.subr.bf16.mxu1 %v19470_v0  ;;  %vm15090_vm10 = vcmp.gt.f32.partialorder %v22054_v26, 0.0 }
0x1852   :  { %18809 = vmatmul.mubr.msk.f32.vlgmr.msra.gmra.mrb[170].mxu0 %vm143_vm1, %v14354_v48  ;;  %v14314_v19 = vmul.f32 %v17206_v17, %v14272_v2  ;;  %v15082_v48 = vlaneseq }
0x1853   :  { %19258 = vmatpush3.bf16.msra.mxu0 %v19257_v32  ;;  %18822 = vmatprep.mubr.msk.f32.mxu0 %vm19471_vm0, %v19472_v6 }
0x1854   :  { %v14356_v21 = vadd.f32 %v17212_v61, %v14314_v19  ;;  %18832 = vmatprep.subr.mxu0 %v19472_v6  ;;  %v15083_v61 = vshrl.u32 %v15082_v48, 7 }
0x1856   :  { %18823 = vmatmul.mubr.msk.f32.vlgmr.msra.gmra.mrb[172].mxu0 %vm143_vm1, %v14356_v21  ;;  %v22048_v19 = vsub.s32 0, %v15083_v61 }
0x1857   :  { %18833 = vmatpush3.msra.mxu0 %v21958_v24  ;;  %18834 = vmatprep.mubr.msk.f32.mxu0 %vm19471_vm0, %v19472_v6 }
0x1858   :  { %19265 = vmatprep.subr.bf16.mxu0 %v19470_v0 }
0x188c   :  { %v14446_v29 = vpop.f32.mrb[168].mxu0 }
0x188d   :  { %v14447_v54 = vadd.f32 %v21975_v27, %v14446_v29  ;;  %v18796_v49 = vpop.f32.mrb[169].mxu0 }
0x188f   :  { %14816 = vst.msk [vmem:[#allocation2] sm:$0xf] %vm14815_vm7, %v14447_v54  ;;  %v14519_v46 = vpop.f32.mrb[168].mxu1 }
0x1890   :  { %v14520_v31 = vadd.f32 %v21975_v27, %v14519_v46  ;;  %v18803_v33 = vpop.f32.mrb[169].mxu1 }
0x1892   :  { %14817 = vst.msk [vmem:[#allocation2 + $0x4] sm:$0xf] %vm14815_vm7, %v14520_v31 }
0x1899   :  { %v14828_v11 = vld [vmem:[#allocation2] sm:$0x3f] }
0x189a   :  { %18835 = vmatmul.mubr.msk.f32.vlgmr.msra.gmra.mrb[174].mxu0 %vm1530_vm2, %v14828_v11 }
0x189b   :  { %18848 = vmatprep.mubr.msk.f32.mxu0 %vm19471_vm0, %v19472_v6  ;;  %19267 = vmatpush3.bf16.msra.mxu0 %v21990_v35 }
0x189c   :  { %19268 = vmatprep.subr.bf16.mxu0 %v19470_v0 }
0x18d5   :  { %v14243_v50 = vpop.xlane.xlu0 %14242 }
0x18d6   :  { %v14253_v63 = vmul.f32 0.0625, %v14243_v50  ;;  %v15188_v50 = vld [vmem:[%s22264_s8] sm:$0xff] }
0x18d8   :  { %v14259_v42 = vadd.f32 1e-05, %v14253_v63  ;;  %v15189_v63 = vld [vmem:[%s22264_s8 + $0x8] sm:$0xff] }
0x18d9   :  { %v14249_v36 = vpop.xlane.xlu1 %14248 }
0x18da   :  { %19444 = vrsqrt.f32 %v14259_v42  ;;  %v14255_v8 = vmul.f32 0.0625, %v14249_v36  ;;  %v22067_v42 = vpack.c.bf16 %v15189_v63, %v15188_v50 }
0x18dc   :  { %v14261_v18 = vadd.f32 1e-05, %v14255_v8 }
0x18de   :  { %19446 = vrsqrt.f32 %v14261_v18 }
0x18e4   :  { %v19445_v43 = vpop.eup %19444 }
0x18e5   :  { %v14271_v41 = vmul.f32 %v19445_v43, %v21922_v55 }
0x18e7   :  { %v14313_v5 = vmul.f32 %v17205_v1, %v14271_v41  ;;  %v22084_v1 = vld [vmem:[%s22265_s1] ss:$0 sm:$0xff] }
0x18e8   :  { %v19447_v30 = vpop.eup %19446 }
0x18e9   :  { %v14273_v44 = vmul.f32 %v19447_v30, %v21926_v14  ;;  %v14355_v52 = vadd.f32 %v17211_v3, %v14313_v5  ;;  %v22105_v30 = vld [vmem:[%s22266_s19] ss:$0 sm:$0xff] }
0x18eb   :  { %18816 = vmatmul.mubr.msk.f32.vlgmr.msra.gmra.mrb[170].mxu1 %vm143_vm1, %v14355_v52  ;;  %v14315_v59 = vmul.f32 %v17207_v39, %v14273_v44 }
0x18ec   :  { %19261 = vmatpush3.bf16.msra.mxu1 %v19260_v4  ;;  %18829 = vmatprep.mubr.msk.f32.mxu1 %vm19471_vm0, %v19472_v6 }
0x18ed   :  { %v14357_v55 = vadd.f32 %v17213_v56, %v14315_v59  ;;  %19262 = vmatprep.subr.bf16.mxu1 %v19470_v0 }
0x18ef   :  { %18830 = vmatmul.mubr.msk.f32.vlgmr.msra.gmra.mrb[172].mxu1 %vm143_vm1, %v14357_v55 }
0x18f0   :  { %19264 = vmatpush3.bf16.msra.mxu1 %v22023_v7  ;;  %18841 = vmatprep.mubr.msk.f32.mxu1 %vm19471_vm0, %v19472_v6 }
0x18f1   :  { %18851 = vmatprep.subr.mxu1 %v19472_v6 }
0x1925   :  { %v14592_v10 = vpop.f32.mrb[170].mxu0 }
0x1926   :  { %v14593_v12 = vadd.f32 %v21975_v27, %v14592_v10  ;;  %v18810_v58 = vpop.f32.mrb[171].mxu0 }
0x1928   :  { %14818 = vst.msk [vmem:[#allocation2 + $0x8] sm:$0xf] %vm14815_vm7, %v14593_v12 }
0x1929   :  { %v14738_v13 = vpop.f32.mrb[172].mxu0 }
0x192a   :  { %v14739_v14 = vadd.f32 %v21975_v27, %v14738_v13  ;;  %v18824_v60 = vpop.f32.mrb[173].mxu0 }
0x192c   :  { %14820 = vst.msk [vmem:[#allocation2 + $0x10] sm:$0xf] %vm14815_vm7, %v14739_v14 }
0x192f   :  { %v15272_v43 = vld [vmem:[#allocation2 + $0x6] sm:$0x3f] }
0x196d   :  { %v14898_v38 = vpop.f32.mrb[174].mxu0 }
0x196e   :  { %v18836_v15 = vpop.f32.mrb[175].mxu0  ;;  %18842 = vmatmul.mubr.msk.f32.vlgmr.msra.gmra.mrb[174].mxu1 %vm143_vm1, %v14898_v38  ;;  %18849 = vmatmul.mubr.msk.f32.vlgmr.msra.gmra.mrb[176].mxu0 %vm143_vm1, %v14898_v38 }
0x196f   :  { %18852 = vmatpush3.msk.msra.mxu1 %vm15115_vm8, %v14898_v38  ;;  %18853 = vmatprep.mubr.msk.f32.mxu1 %vm19471_vm0, %v19472_v6 }
0x1970   :  { %18863 = vmatprep.subr.mxu1 %v19472_v6  ;;  %18860 = vmatprep.mubr.msk.f32.mxu0 %vm19471_vm0, %v19472_v6 }
0x1971   :  { %19270 = vmatpush3.bf16.msra.mxu0 %v22067_v42 }
0x1972   :  { %19271 = vmatprep.subr.bf16.mxu0 %v19470_v0 }
0x19be   :  { %v14665_v9 = vpop.f32.mrb[170].mxu1 }
0x19bf   :  { %v14666_v57 = vadd.f32 %v21975_v27, %v14665_v9  ;;  %v18817_v40 = vpop.f32.mrb[171].mxu1 }
0x19c1   :  { %14819 = vst.msk [vmem:[#allocation2 + $0xc] sm:$0xf] %vm14815_vm7, %v14666_v57 }
0x19c2   :  { %v14811_v23 = vpop.f32.mrb[172].mxu1 }
0x19c3   :  { %v14812_v37 = vadd.f32 %v21975_v27, %v14811_v23  ;;  %v18831_v62 = vpop.f32.mrb[173].mxu1 }
0x19c5   :  { %14821 = vst.msk [vmem:[#allocation2 + $0x14] sm:$0xf] %vm14815_vm7, %v14812_v37 }
0x1a41   :  { %v14971_v16 = vpop.f32.mrb[174].mxu1  ;;  %v15041_v32 = vpop.f32.mrb[176].mxu0 }
0x1a42   :  { %15045 = vxpose.xlu1.b32.start.end [1/1] (short) (narrow) %v14971_v16, 8  ;;  %v18843_v17 = vpop.f32.mrb[175].mxu1  ;;  %15079 = vperm.xlu0 %19302, %v15041_v32   ;;  %v18850_v2 = vpop.f32.mrb[177].mxu0  ;;  %v15712_v16 = vld [vmem:[#allocation2 + $0xc] sm:$0x3f] }
0x1ac1   :  { %v15080_v25 = vpop.permute.xlu0 %15079 }
0x1ac2   :  { %v15061_v21 = vpop.trf.xlu1 }
0x1ac3   :  { %v15085_v20 = vrot.slane %v15061_v21, %v22048_v19 }
0x1ac5   :  { %v15086_v27 = vadd.f32 %v15085_v20, %v15080_v25 }
0x1ac7   :  { %v15088_v29 = vmul.f32 0.2, %v15086_v27  ;;  %vm15087_vm9 = vcmp.ge.f32.partialorder %v15086_v27, 0.0 }
0x1ac9   :  { %v15089_v54 = vsel %vm15087_vm9, %v15086_v27, %v15088_v29 }
0x1aca   :  { %v15091_v49 = vsel %vm15090_vm10, %v15089_v54, -1e+30 }
0x1acb   :  { %v15093_v46 = vsel %vm15092_vm11, %v15091_v49, -inf }
0x1acc   :  { %15094 = vmax.xlane.f32.xlu0 %v15093_v46 }
0x1b59   :  { %v15095_v31 = vpop.xlane.xlu0 %15094 }
0x1b5a   :  { %v15096_v33 = vsub.f32 %v15091_v49, %v15095_v31 }
0x1b5c   :  { %v15097_v11 = vmul.f32 1.442695, %v15096_v33 }
0x1b5e   :  { %19448 = vpow2.f32 %v15097_v11 }
0x1b68   :  { %v19449_v34 = vpop.eup %19448 }
0x1b69   :  { %v15099_v51 = vsel %vm15092_vm11, %v19449_v34, 0.0 }
0x1b6a   :  { %15100 = vadd.xlane.f32.xlu1 %v15099_v51 }
0x1bf7   :  { %v15101_v36 = vpop.xlane.xlu1 %15100 }
0x1bf8   :  { %19450 = vrcp.f32 %v15101_v36 }
0x1c02   :  { %v19451_v8 = vpop.eup %19450 }
0x1c03   :  { %v15103_v18 = vmul.f32 %v19451_v8, %v19449_v34 }
0x1c05   :  { %18854 = vmatmul.mubr.msk.f32.vlgmr.msra.gmra.mrb[176].mxu1 %vm15111_vm12, %v15103_v18 }
0x1c06   :  { %18864 = vmatpush3.msra.mxu1 %v21958_v24  ;;  %18865 = vmatprep.mubr.msk.f32.mxu1 %vm19471_vm0, %v19472_v6 }
0x1c07   :  { %19274 = vmatprep.subr.bf16.mxu1 %v19470_v0 }
0x1c09   :  { %18866 = vmatmul.mubr.msk.f32.vlgmr.msra.gmra.mrb[178].mxu1 %vm1530_vm2, %v15272_v43 }
0x1c0a   :  { %19276 = vmatpush3.bf16.msra.mxu1 %v21990_v35  ;;  %18879 = vmatprep.mubr.msk.f32.mxu1 %vm19471_vm0, %v19472_v6 }
0x1c0b   :  { %19277 = vmatprep.subr.bf16.mxu1 %v19470_v0 }
0x1cd8   :  { %v15184_v41 = vpop.f32.mrb[176].mxu1 }
0x1cd9   :  { %v15185_v28 = vadd.f32 %v22084_v1, %v15184_v41  ;;  %v18855_v45 = vpop.f32.mrb[177].mxu1 }
0x1cdb   :  { %18861 = vmatmul.mubr.msk.f32.vlgmr.msra.gmra.mrb[178].mxu0 %vm143_vm1, %v15185_v28 }
0x1cdc   :  { %19273 = vmatpush3.bf16.msra.mxu0 %v22023_v7  ;;  %v15342_v3 = vpop.f32.mrb[178].mxu1  ;;  %18872 = vmatprep.mubr.msk.f32.mxu0 %vm19471_vm0, %v19472_v6 }
0x1cdd   :  { %v18867_v5 = vpop.f32.mrb[179].mxu1  ;;  %18880 = vmatmul.mubr.msk.f32.vlgmr.msra.gmra.mrb[180].mxu1 %vm143_vm1, %v15342_v3  ;;  %18882 = vmatprep.subr.mxu0 %v19472_v6 }
0x1cde   :  { %19279 = vmatpush3.bf16.msra.mxu1 %v22067_v42  ;;  %18891 = vmatprep.mubr.msk.f32.mxu1 %vm19471_vm0, %v19472_v6 }
0x1cdf   :  { %18873 = vmatmul.mubr.msk.f32.vlgmr.msra.gmra.mrb[180].mxu0 %vm143_vm1, %v15342_v3  ;;  %19280 = vmatprep.subr.bf16.mxu1 %v19470_v0 }
0x1ce0   :  { %18883 = vmatpush3.msk.msra.mxu0 %vm15115_vm8, %v15342_v3  ;;  %18884 = vmatprep.mubr.msk.f32.mxu0 %vm19471_vm0, %v19472_v6  ;;  %v16152_v3 = vld [vmem:[#allocation2 + $0x12] sm:$0x3f] }
0x1ce1   :  { %18894 = vmatprep.subr.mxu0 %v19472_v6 }
0x1dae   :  { %v15266_v4 = vpop.f32.mrb[178].mxu0 }
0x1daf   :  { %v15267_v39 = vadd.f32 %v22105_v30, %v15266_v4  ;;  %v18862_v44 = vpop.f32.mrb[179].mxu0 }
0x1db0   :  { %v15485_v52 = vpop.f32.mrb[180].mxu1 }
0x1db1   :  { %15271 = vst.msk [vmem:[%s22267_s3] sm:$0x3f] %vm15270_vm13, %v15267_v39  ;;  %15523 = vperm.xlu0 %19302, %v15485_v52   ;;  %v18881_v53 = vpop.f32.mrb[181].mxu1 }
0x1db2   :  { %v15415_v47 = vpop.f32.mrb[180].mxu0 }
0x1db3   :  { %15489 = vxpose.xlu1.b32.start.end [1/1] (short) (narrow) %v15415_v47, 8  ;;  %v18874_v56 = vpop.f32.mrb[181].mxu0 }
0x1e30   :  { %v15524_v10 = vpop.permute.xlu0 %15523 }
0x1e33   :  { %v15505_v59 = vpop.trf.xlu1 }
0x1e34   :  { %v15529_v55 = vrot.slane %v15505_v59, %v22048_v19 }
0x1e36   :  { %v15530_v12 = vadd.f32 %v15529_v55, %v15524_v10 }
0x1e38   :  { %v15532_v58 = vmul.f32 0.2, %v15530_v12  ;;  %vm15531_vm14 = vcmp.ge.f32.partialorder %v15530_v12, 0.0 }
0x1e3a   :  { %v15533_v13 = vsel %vm15531_vm14, %v15530_v12, %v15532_v58 }
0x1e3b   :  { %v15534_v14 = vsel %vm15090_vm10, %v15533_v13, -1e+30 }
0x1e3c   :  { %v15535_v60 = vsel %vm15092_vm11, %v15534_v14, -inf }
0x1e3d   :  { %15536 = vmax.xlane.f32.xlu0 %v15535_v60 }
0x1eca   :  { %v15537_v38 = vpop.xlane.xlu0 %15536 }
0x1ecb   :  { %v15538_v15 = vsub.f32 %v15534_v14, %v15537_v38 }
0x1ecd   :  { %v15539_v9 = vmul.f32 1.442695, %v15538_v15 }
0x1ecf   :  { %19452 = vpow2.f32 %v15539_v9 }
0x1ed9   :  { %v19453_v57 = vpop.eup %19452 }
0x1eda   :  { %v15541_v40 = vsel %vm15092_vm11, %v19453_v57, 0.0 }
0x1edb   :  { %15542 = vadd.xlane.f32.xlu0 %v15541_v40 }
0x1f68   :  { %v15543_v23 = vpop.xlane.xlu0 %15542 }
0x1f69   :  { %19454 = vrcp.f32 %v15543_v23 }
0x1f73   :  { %v19455_v37 = vpop.eup %19454 }
0x1f74   :  { %v15545_v62 = vmul.f32 %v19455_v37, %v19453_v57 }
0x1f76   :  { %18885 = vmatmul.mubr.msk.f32.vlgmr.msra.gmra.mrb[182].mxu0 %vm15111_vm12, %v15545_v62 }
0x1f77   :  { %18895 = vmatpush3.msra.mxu0 %v21958_v24  ;;  %18896 = vmatprep.mubr.msk.f32.mxu0 %vm19471_vm0, %v19472_v6 }
0x1f78   :  { %19283 = vmatprep.subr.bf16.mxu0 %v19470_v0 }
0x1f7a   :  { %18897 = vmatmul.mubr.msk.f32.vlgmr.msra.gmra.mrb[184].mxu0 %vm1530_vm2, %v15712_v16 }
0x1f7b   :  { %19285 = vmatpush3.bf16.msra.mxu0 %v21990_v35  ;;  %18910 = vmatprep.mubr.msk.f32.mxu0 %vm19471_vm0, %v19472_v6 }
0x1f7c   :  { %19286 = vmatprep.subr.bf16.mxu0 %v19470_v0 }
0x2049   :  { %v15624_v32 = vpop.f32.mrb[182].mxu0 }
0x204a   :  { %v15625_v17 = vadd.f32 %v22084_v1, %v15624_v32  ;;  %v18886_v2 = vpop.f32.mrb[183].mxu0 }
0x204c   :  { %18892 = vmatmul.mubr.msk.f32.vlgmr.msra.gmra.mrb[182].mxu1 %vm143_vm1, %v15625_v17 }
0x204d   :  { %19282 = vmatpush3.bf16.msra.mxu1 %v22023_v7  ;;  %v15782_v48 = vpop.f32.mrb[184].mxu0  ;;  %18903 = vmatprep.mubr.msk.f32.mxu1 %vm19471_vm0, %v19472_v6 }
0x204e   :  { %v18898_v61 = vpop.f32.mrb[185].mxu0  ;;  %18911 = vmatmul.mubr.msk.f32.vlgmr.msra.gmra.mrb[186].mxu0 %vm143_vm1, %v15782_v48  ;;  %18913 = vmatprep.subr.mxu1 %v19472_v6 }
0x204f   :  { %19288 = vmatpush3.bf16.msra.mxu0 %v22067_v42  ;;  %18922 = vmatprep.mubr.msk.f32.mxu0 %vm19471_vm0, %v19472_v6 }
0x2050   :  { %18904 = vmatmul.mubr.msk.f32.vlgmr.msra.gmra.mrb[184].mxu1 %vm143_vm1, %v15782_v48  ;;  %19289 = vmatprep.subr.bf16.mxu0 %v19470_v0 }
0x2051   :  { %18914 = vmatpush3.msk.msra.mxu1 %vm15115_vm8, %v15782_v48  ;;  %18915 = vmatprep.mubr.msk.f32.mxu1 %vm19471_vm0, %v19472_v6 }
0x2052   :  { %18925 = vmatprep.subr.mxu1 %v19472_v6 }
0x211f   :  { %v15706_v21 = vpop.f32.mrb[182].mxu1 }
0x2120   :  { %v15707_v20 = vadd.f32 %v22105_v30, %v15706_v21  ;;  %v18893_v25 = vpop.f32.mrb[183].mxu1 }
0x2121   :  { %v15925_v27 = vpop.f32.mrb[186].mxu0 }
0x2122   :  { %17237 = vst.msk [vmem:[%s22267_s3 + $0x8] sm:$0x3f] %vm15270_vm13, %v15707_v20  ;;  %15963 = vperm.xlu0 %19302, %v15925_v27   ;;  %v18912_v29 = vpop.f32.mrb[187].mxu0 }
0x2123   :  { %v15855_v54 = vpop.f32.mrb[184].mxu1 }
0x2124   :  { %15929 = vxpose.xlu1.b32.start.end [1/1] (short) (narrow) %v15855_v54, 8  ;;  %v18905_v49 = vpop.f32.mrb[185].mxu1 }
0x2142   :  { %19303 = vset.pattern.permute.xlu1 %v19473_v22 }
0x21a1   :  { %v15964_v33 = vpop.permute.xlu0 %15963 }
0x21a4   :  { %v15945_v46 = vpop.trf.xlu1 }
0x21a5   :  { %v15969_v31 = vrot.slane %v15945_v46, %v22048_v19 }
0x21a7   :  { %v15970_v11 = vadd.f32 %v15969_v31, %v15964_v33 }
0x21a9   :  { %v15972_v34 = vmul.f32 0.2, %v15970_v11  ;;  %vm15971_vm15 = vcmp.ge.f32.partialorder %v15970_v11, 0.0 }
0x21ab   :  { %v15973_v51 = vsel %vm15971_vm15, %v15970_v11, %v15972_v34 }
0x21ac   :  { %v15974_v50 = vsel %vm15090_vm10, %v15973_v51, -1e+30 }
0x21ad   :  { %v15975_v63 = vsel %vm15092_vm11, %v15974_v50, -inf }
0x21ae   :  { %15976 = vmax.xlane.f32.xlu1 %v15975_v63 }
0x223b   :  { %v15977_v36 = vpop.xlane.xlu1 %15976 }
0x223c   :  { %v15978_v8 = vsub.f32 %v15974_v50, %v15977_v36 }
0x223e   :  { %v15979_v18 = vmul.f32 1.442695, %v15978_v8 }
0x2240   :  { %19456 = vpow2.f32 %v15979_v18 }
0x224a   :  { %v19457_v43 = vpop.eup %19456 }
0x224b   :  { %v15981_v22 = vsel %vm15092_vm11, %v19457_v43, 0.0 }
0x224c   :  { %15982 = vadd.xlane.f32.xlu0 %v15981_v22 }
0x22d9   :  { %v15983_v41 = vpop.xlane.xlu0 %15982 }
0x22da   :  { %19458 = vrcp.f32 %v15983_v41 }
0x22e4   :  { %v19459_v28 = vpop.eup %19458 }
0x22e5   :  { %v15985_v45 = vmul.f32 %v19459_v28, %v19457_v43 }
0x22e7   :  { %18916 = vmatmul.mubr.msk.f32.vlgmr.msra.gmra.mrb[186].mxu1 %vm15111_vm12, %v15985_v45 }
0x22e8   :  { %18926 = vmatpush3.msra.mxu1 %v21958_v24  ;;  %18927 = vmatprep.mubr.msk.f32.mxu1 %vm19471_vm0, %v19472_v6 }
0x22e9   :  { %19292 = vmatprep.subr.bf16.mxu1 %v19470_v0 }
0x22eb   :  { %18928 = vmatmul.mubr.msk.f32.vlgmr.msra.gmra.mrb[188].mxu1 %vm1530_vm2, %v16152_v3 }
0x22ec   :  { %19294 = vmatpush3.bf16.msra.mxu1 %v21990_v35  ;;  %18941 = vmatprep.mubr.msk.f32.mxu1 %vm19471_vm0, %v19472_v6 }
0x22ed   :  { %19295 = vmatprep.subr.bf16.mxu1 %v19470_v0 }
0x23ba   :  { %v16064_v5 = vpop.f32.mrb[186].mxu1 }
0x23bb   :  { %v16065_v4 = vadd.f32 %v22084_v1, %v16064_v5  ;;  %v18917_v39 = vpop.f32.mrb[187].mxu1 }
0x23bd   :  { %18923 = vmatmul.mubr.msk.f32.vlgmr.msra.gmra.mrb[188].mxu0 %vm143_vm1, %v16065_v4 }
0x23be   :  { %19291 = vmatpush3.bf16.msra.mxu0 %v22023_v7  ;;  %v16222_v24 = vpop.f32.mrb[188].mxu1  ;;  %18934 = vmatprep.mubr.msk.f32.mxu0 %vm19471_vm0, %v19472_v6 }
0x23bf   :  { %v18929_v44 = vpop.f32.mrb[189].mxu1  ;;  %18942 = vmatmul.mubr.msk.f32.vlgmr.msra.gmra.mrb[190].mxu1 %vm143_vm1, %v16222_v24  ;;  %18944 = vmatprep.subr.mxu0 %v19472_v6 }
0x23c0   :  { %19297 = vmatpush3.bf16.msra.mxu1 %v22067_v42  ;;  %18953 = vmatprep.mubr.msk.f32.mxu1 %vm19471_vm0, %v19472_v6 }
0x23c1   :  { %18935 = vmatmul.mubr.msk.f32.vlgmr.msra.gmra.mrb[190].mxu0 %vm143_vm1, %v16222_v24 }
0x23c2   :  { %18945 = vmatpush3.msk.msra.mxu0 %vm15115_vm8, %v16222_v24  ;;  %18946 = vmatprep.mubr.msk.f32.mxu0 %vm19471_vm0, %v19472_v6 }
0x2490   :  { %v16146_v0 = vpop.f32.mrb[188].mxu0 }
0x2491   :  { %v16147_v35 = vadd.f32 %v22105_v30, %v16146_v0  ;;  %v18924_v7 = vpop.f32.mrb[189].mxu0 }
0x2492   :  { %v16365_v52 = vpop.f32.mrb[190].mxu1 }
0x2493   :  { %17246 = vst.msk [vmem:[%s22267_s3 + $0x10] sm:$0x3f] %vm15270_vm13, %v16147_v35  ;;  %16403 = vperm.xlu1 %19303, %v16365_v52   ;;  %v18943_v42 = vpop.f32.mrb[191].mxu1 }
0x2494   :  { %v16295_v53 = vpop.f32.mrb[190].mxu0 }
0x2495   :  { %16369 = vxpose.xlu0.b32.start.end [1/1] (short) (narrow) %v16295_v53, 8  ;;  %v18936_v47 = vpop.f32.mrb[191].mxu0 }
0x2512   :  { %v16404_v55 = vpop.permute.xlu1 %16403 }
0x2515   :  { %v16385_v56 = vpop.trf.xlu0 }
0x2516   :  { %v16409_v59 = vrot.slane %v16385_v56, %v22048_v19 }
0x2518   :  { %v16410_v6 = vadd.f32 %v16409_v59, %v16404_v55 }
0x251a   :  { %v16412_v10 = vmul.f32 0.2, %v16410_v6  ;;  %vm16411_vm0 = vcmp.ge.f32.partialorder %v16410_v6, 0.0 }
0x251c   :  { %v16413_v12 = vsel %vm16411_vm0, %v16410_v6, %v16412_v10 }
0x251d   :  { %v16414_v58 = vsel %vm15090_vm10, %v16413_v12, -1e+30 }
0x251e   :  { %v16415_v13 = vsel %vm15092_vm11, %v16414_v58, -inf }
0x251f   :  { %16416 = vmax.xlane.f32.xlu1 %v16415_v13 }
0x25ac   :  { %v16417_v14 = vpop.xlane.xlu1 %16416 }
0x25ad   :  { %v16418_v60 = vsub.f32 %v16414_v58, %v16417_v14 }
0x25af   :  { %v16419_v38 = vmul.f32 1.442695, %v16418_v60 }
0x25b1   :  { %19460 = vpow2.f32 %v16419_v38 }
0x25bb   :  { %v19461_v15 = vpop.eup %19460 }
0x25bc   :  { %v16421_v9 = vsel %vm15092_vm11, %v19461_v15, 0.0 }
0x25bd   :  { %16422 = vadd.xlane.f32.xlu0 %v16421_v9 }
0x264a   :  { %v16423_v19 = vpop.xlane.xlu0 %16422 }
0x264b   :  { %19462 = vrcp.f32 %v16423_v19 }
0x2655   :  { %v19463_v57 = vpop.eup %19462 }
0x2656   :  { %v16425_v40 = vmul.f32 %v19463_v57, %v19461_v15 }
0x2658   :  { %18947 = vmatmul.mubr.msk.f32.vlgmr.msra.gmra.mrb[192].mxu0 %vm15111_vm12, %v16425_v40 }
0x272b   :  { %v16504_v23 = vpop.f32.mrb[192].mxu0 }
0x272c   :  { %v16505_v26 = vadd.f32 %v22084_v1, %v16504_v23  ;;  %v18948_v37 = vpop.f32.mrb[193].mxu0 }
0x272e   :  { %18954 = vmatmul.mubr.msk.f32.vlgmr.msra.gmra.mrb[192].mxu1 %vm143_vm1, %v16505_v26 }
0x2801   :  { %v16586_v62 = vpop.f32.mrb[192].mxu1 }
0x2802   :  { %v16587_v16 = vadd.f32 %v22105_v30, %v16586_v62  ;;  %v18955_v32 = vpop.f32.mrb[193].mxu1 }
0x2804   :  { %17255 = vst.msk [vmem:[%s22267_s3 + $0x18] sm:$0x3f] %vm15270_vm13, %v16587_v16 }

</bundles_post_ra>
